<compile_context>
chip_gen: v6e
topology: v6e:2x2x1
jax: 0.10.0
libtpu: 0.0.40
codegen_flags: <defaults>
</compile_context>

<pallas_src>
import functools
import math

import jax
import jax.numpy as jnp
from jax import lax
from jax.experimental import pallas as pl
from jax.experimental.pallas import tpu as pltpu

LN_EPS = 1e-5          # torch.nn.LayerNorm default
NEG_BIG = -1e30        # finite "minus infinity" for key-padding masks


def _layer_norm(x, gamma, beta):
    mean = jnp.mean(x, axis=-1, keepdims=True)
    var = jnp.mean((x - mean) ** 2, axis=-1, keepdims=True)
    return (x - mean) * lax.rsqrt(var + LN_EPS) * gamma + beta


def _mm(a_bf, w_bf):
    """(pre-cast bf16 activation) @ (bf16 weight), f32 accumulation (MXU)."""
    return lax.dot_general(a_bf, w_bf, (((1,), (0,)), ((), ())),
                           preferred_element_type=jnp.float32)


def _attention(xq_bf, xkv_bf, p, kpad_list, add_mask, need_attn, num_heads,
               bblk, tq, tk):
    """fairseq MultiheadAttention (eval) over a block of `bblk` sequences.

    xq_bf : (bblk*tq, Dq) bf16 queries (flattened over the batch block)
    xkv_bf: (bblk*tk, Dk) bf16 keys/values
    p     : (wq, bq, wk, bk, wv, bv, wo, bo) refs; weights (in, out) bf16,
            biases f32; 1/sqrt(d_head) already folded into wq/bq.
    kpad_list: per-batch (1, tk) float masks, nonzero = padding.
    add_mask : optional (tq, tk) additive mask (same for every head/batch).
    Returns (out_flat (bblk*tq, D) f32, [per-batch (tq, tk) head-avg probs]).
    """
    wq, bq = p[0][...], p[1][...]
    wk, bk = p[2][...], p[3][...]
    wv, bv = p[4][...], p[5][...]
    wo, bo = p[6][...], p[7][...]
    d_model = wq.shape[1]
    dh = d_model // num_heads
    bf = jnp.bfloat16

    q = (_mm(xq_bf, wq) + bq).astype(bf)               # (bblk*tq, D)
    k = (_mm(xkv_bf, wk) + bk).astype(bf)              # (bblk*tk, D)
    v = (_mm(xkv_bf, wv) + bv).astype(bf)              # (bblk*tk, D)

    ctx_rows = []
    attn_list = [] if need_attn else None
    for b in range(bblk):
        qb = q[b * tq:(b + 1) * tq]
        kb = k[b * tk:(b + 1) * tk]
        vb = v[b * tk:(b + 1) * tk]
        kpad = kpad_list[b]                            # (1, tk)
        head_ctx = []
        attn_sum = None
        for h in range(num_heads):
            sl = slice(h * dh, (h + 1) * dh)
            s = lax.dot_general(qb[:, sl], kb[:, sl], (((1,), (1,)), ((), ())),
                                preferred_element_type=jnp.float32)   # (tq, tk)
            if add_mask is not None:
                s = s + add_mask
            s = jnp.where(kpad != 0.0, NEG_BIG, s)
            m = jnp.max(s, axis=-1, keepdims=True)
            e = jnp.exp(s - m)
            denom = jnp.sum(e, axis=-1, keepdims=True)
            if need_attn:
                probs = e / denom                      # exact: probs are emitted
            else:
                probs = e * pl.reciprocal(denom, approx=True)
            ctx_h = _mm(probs.astype(bf), vb[:, sl])   # (tq, dh) f32
            head_ctx.append(ctx_h.astype(bf))
            if need_attn:
                attn_sum = probs if attn_sum is None else attn_sum + probs
        ctx_rows.append(jnp.concatenate(head_ctx, axis=-1))           # (tq, D) bf16
        if need_attn:
            attn_list.append(attn_sum * (1.0 / num_heads))
    ctx = ctx_rows[0] if bblk == 1 else jnp.concatenate(ctx_rows, axis=0)
    out = _mm(ctx, wo) + bo                            # (bblk*tq, D) f32
    return out, attn_list


def decoder_layer_kernel(*refs, num_heads):
    (x_ref, enc_ref, prev_ref, post_ref,
     selfpad_ref, encpad_ref, prevpad_ref, postpad_ref, causal_ref) = refs[:9]
    sa = refs[9:19]
    ea = refs[19:29]
    ca = refs[29:39]
    xa = refs[39:49]
    wg1_ref, bg1_ref, wg2_ref, wprev_ref, wpost_ref = refs[49:54]
    w1_ref, b1_ref, w2_ref, b2_ref, flng_ref, flnb_ref = refs[54:60]
    out_ref, attn_ref = refs[60], refs[61]

    bblk, t_len, d = x_ref.shape
    s_len = enc_ref.shape[1]
    bf = jnp.bfloat16

    x = x_ref[...].reshape(bblk * t_len, d)            # f32
    enc = enc_ref[...].reshape(bblk * s_len, d)
    causal = causal_ref[...]                           # (T, T) additive mask

    selfpad = [selfpad_ref[b] for b in range(bblk)]    # each (1, T)
    encpad = [encpad_ref[b] for b in range(bblk)]      # each (1, S)
    prevpad = [prevpad_ref[b] for b in range(bblk)]
    postpad = [postpad_ref[b] for b in range(bblk)]

    x_bf = x.astype(bf)
    enc_bf = enc.astype(bf)

    # 1) self-attention (+ causal mask) -> residual -> post-LN
    a1, _ = _attention(x_bf, x_bf, sa[:8], selfpad, causal, False,
                       num_heads, bblk, t_len, t_len)
    x1 = _layer_norm(x + a1, sa[8][...], sa[9][...])
    x1_bf = x1.astype(bf)

    # 2) encoder attention -> residual -> post-LN (head-averaged probs emitted)
    a2, attn_list = _attention(x1_bf, enc_bf, ea[:8], encpad, None, True,
                               num_heads, bblk, t_len, s_len)
    x2 = _layer_norm(x1 + a2, ea[8][...], ea[9][...])
    x2_bf = x2.astype(bf)
    for b in range(bblk):
        attn_ref[b] = attn_list[b]

    # 3) CLSR: clsr_attn(query=encoder_out, kv=x2) -> post-LN (no residual),
    #    gate MLP, hard threshold (eval mode; G == 0 selects the post branch),
    #    gated mix of prev/post contexts + gated padding mask.
    #    TODO(synk): training-mode branch (sigmoid gate + AND of pad masks) not emitted.
    a3, _ = _attention(enc_bf, x2_bf, ca[:8], selfpad, None, False,
                       num_heads, bblk, s_len, t_len)
    curr = _layer_norm(a3, ca[8][...], ca[9][...])
    h1 = jnp.maximum(_mm(curr.astype(bf), wg1_ref[...]) + bg1_ref[...], 0.0)  # (bblk*S, 128)
    wg2 = wg2_ref[...]                                                        # (1, 128) f32
    g_col = (jnp.sum(h1 * wg2, axis=-1, keepdims=True) > 0.0).astype(jnp.float32)
    h_prev = _mm(prev_ref[...].reshape(bblk * s_len, d).astype(bf), wprev_ref[...])
    h_post = _mm(post_ref[...].reshape(bblk * s_len, d).astype(bf), wpost_ref[...])
    clsr = g_col * h_prev + (1.0 - g_col) * h_post                            # (bblk*S, D)
    # lane-oriented gate: one tiny f32 matmul (1,128)x(bblk*S,128)^T -> (1, bblk*S)
    g_row = (lax.dot_general(wg2, h1, (((1,), (1,)), ((), ())),
                             preferred_element_type=jnp.float32) > 0.0
             ).astype(jnp.float32)
    clsr_pad = [g_row[:, b * s_len:(b + 1) * s_len] * prevpad[b]
                + (1.0 - g_row[:, b * s_len:(b + 1) * s_len]) * postpad[b]
                for b in range(bblk)]

    # 4) cross attention over the gated context -> residual -> post-LN
    a4, _ = _attention(x2_bf, clsr.astype(bf), xa[:8], clsr_pad, None, False,
                       num_heads, bblk, t_len, s_len)
    x3 = _layer_norm(x2 + a4, xa[8][...], xa[9][...])

    # 5) FFN (fc1 -> relu -> fc2) -> residual -> post-LN
    h = jnp.maximum(_mm(x3.astype(bf), w1_ref[...]) + b1_ref[...], 0.0)
    o = _mm(h.astype(bf), w2_ref[...]) + b2_ref[...]
    out = _layer_norm(x3 + o, flng_ref[...], flnb_ref[...])
    out_ref[...] = out.reshape(bblk, t_len, d)


# ---------------------------------------------------------------------------
# Host-side wrapper: layout prep, weight pre-transpose/bf16, one pallas_call.
# ---------------------------------------------------------------------------
def _pick_block_b(batch):
    """Largest divisor of `batch` (<= 8) that still leaves >= 2 grid steps."""
    best = 1
    for d in range(1, min(batch, 8) + 1):
        if batch % d == 0 and batch // d >= min(2, batch):
            best = d
    return best


def _prep_attn(p, scaling):
    wq, bq, wk, bk, wv, bv, wo, bo = p
    t = lambda w: jnp.asarray(w.T, jnp.bfloat16)       # (out,in) -> (in,out)
    # fold the 1/sqrt(d_head) query scaling into wq / bq
    return (jnp.asarray(wq.T * scaling, jnp.bfloat16), bq * scaling,
            t(wk), bk, t(wv), bv, t(wo), bo)


def _vmem_limit_bytes():
    try:
        cap = int(pltpu.get_tpu_info().vmem_capacity_bytes)
    except Exception:
        cap = 64 * 1024 * 1024
    return cap * 7 // 8


def autoformer_decoder_layer_forward(params, x, encoder_out, encoder_padding_mask,
                                     prev_out, prev_out_padding_mask,
                                     post_out, post_out_padding_mask,
                                     self_attn_mask, self_attn_padding_mask,
                                     num_heads, block_b=None):
    # x: (T, B, D); encoder_out/prev_out/post_out: (S, B, D); masks: (B, *)
    T, B, D = x.shape
    S = encoder_out.shape[0]
    H = num_heads
    scaling = 1.0 / math.sqrt(D // H)
    bf = jnp.bfloat16

    if block_b is None:
        block_b = _pick_block_b(B)
    assert B % block_b == 0

    # Batch-major copies (blocking the (T,B,D) layout directly would force
    # size-1 second-to-minor blocks, violating the (8,128) rule).
    xb = jnp.transpose(x, (1, 0, 2))
    eb = jnp.transpose(encoder_out, (1, 0, 2))
    pb = jnp.transpose(prev_out, (1, 0, 2))
    qb = jnp.transpose(post_out, (1, 0, 2))

    selfpad = self_attn_padding_mask.astype(jnp.float32).reshape(B, 1, T)
    encpad = encoder_padding_mask.astype(jnp.float32).reshape(B, 1, S)
    prevpad = prev_out_padding_mask.astype(jnp.float32).reshape(B, 1, S)
    postpad = post_out_padding_mask.astype(jnp.float32).reshape(B, 1, S)
    causal = self_attn_mask.astype(jnp.float32)        # (T, T) additive mask

    wg1, bg1, wg2, wprev, wpost = params['clsr']
    w1, b1, w2, b2 = params['ffn']

    inputs, specs = [], []

    def add_b(a):      # per-batch-block (grid-indexed) 3-D input
        inputs.append(a)
        specs.append(pl.BlockSpec((block_b,) + a.shape[1:], lambda b: (b, 0, 0)))

    def add_c(a):      # grid-constant 2-D input (weights / biases / masks)
        inputs.append(a)
        specs.append(pl.BlockSpec(a.shape, lambda b: (0, 0)))

    add_b(xb); add_b(eb); add_b(pb); add_b(qb)
    add_b(selfpad); add_b(encpad); add_b(prevpad); add_b(postpad)
    add_c(causal)
    for name in ('self_attn', 'encoder_attn', 'clsr_attn', 'cross_attn'):
        for a in _prep_attn(params[name], scaling):
            add_c(a)
        for a in params[name + '_ln']:
            add_c(a)
    for a in (jnp.asarray(wg1.T, bf), bg1, wg2,
              jnp.asarray(wprev.T, bf), jnp.asarray(wpost.T, bf)):
        add_c(a)
    for a in (jnp.asarray(w1.T, bf), b1, jnp.asarray(w2.T, bf), b2,
              params['final_ln'][0], params['final_ln'][1]):
        add_c(a)

    out, attn = pl.pallas_call(
        functools.partial(decoder_layer_kernel, num_heads=H),
        grid=(B // block_b,),
        in_specs=specs,
        out_specs=(pl.BlockSpec((block_b, T, D), lambda b: (b, 0, 0)),
                   pl.BlockSpec((block_b, T, S), lambda b: (b, 0, 0))),
        out_shape=(jax.ShapeDtypeStruct((B, T, D), jnp.float32),
                   jax.ShapeDtypeStruct((B, T, S), jnp.float32)),
        compiler_params=pltpu.CompilerParams(
            dimension_semantics=("parallel",),
            vmem_limit_bytes=_vmem_limit_bytes()),
    )(*inputs)

    return jnp.transpose(out, (1, 0, 2)), attn, None


# ---------------------------------------------------------------------------
# Deterministic parameter init (shapes match the torch module __init__).
# ---------------------------------------------------------------------------
def _linear(key, out_dim, in_dim, bias=True):
    kw, kb = jax.random.split(key)
    bound = 1.0 / math.sqrt(in_dim)
    w = jax.random.uniform(kw, (out_dim, in_dim), jnp.float32, -bound, bound)
    if bias:
        b = jax.random.uniform(kb, (1, out_dim), jnp.float32, -bound, bound)
        return w, b
    return w


def _attn_params(key, d, kdim):
    ks = jax.random.split(key, 4)
    wq, bq = _linear(ks[0], d, d)
    wk, bk = _linear(ks[1], d, kdim)
    wv, bv = _linear(ks[2], d, kdim)
    wo, bo = _linear(ks[3], d, d)
    return (wq, bq, wk, bk, wv, bv, wo, bo)


def _ln_params(d):
    return (jnp.ones((1, d), jnp.float32), jnp.zeros((1, d), jnp.float32))


def init_params(key, d, d_enc, ffn_dim):
    ks = jax.random.split(key, 10)
    wg1, bg1 = _linear(ks[4], 128, d)
    wg2 = _linear(ks[5], 1, 128, bias=False)              # (1, 128), no bias
    wprev = _linear(ks[6], d, d, bias=False)
    wpost = _linear(ks[7], d, d, bias=False)
    w1, b1 = _linear(ks[8], ffn_dim, d)
    w2, b2 = _linear(ks[9], d, ffn_dim)
    return {
        'self_attn': _attn_params(ks[0], d, d),
        'self_attn_ln': _ln_params(d),
        'encoder_attn': _attn_params(ks[1], d, d_enc),
        'encoder_attn_ln': _ln_params(d),
        'clsr_attn': _attn_params(ks[2], d, d_enc),
        'clsr_attn_ln': _ln_params(d),
        'cross_attn': _attn_params(ks[3], d, d_enc),
        'cross_attn_ln': _ln_params(d),
        'clsr': (wg1, bg1, wg2, wprev, wpost),
        'ffn': (w1, b1, w2, b2),
        'final_ln': _ln_params(d),
    }


if __name__ == "__main__":
    B, T, S = 2, 8, 8          # batch, tgt_len, src_len
    D, H, F = 32, 4, 64        # decoder_embed_dim, heads, decoder_ffn_embed_dim

    root = jax.random.PRNGKey(0)
    kp, kx, ke, kpr, kpo = jax.random.split(root, 5)
    params = init_params(kp, D, D, F)

    x = jax.random.normal(kx, (T, B, D), jnp.float32)
    encoder_out = jax.random.normal(ke, (S, B, D), jnp.float32)
    prev_out = jax.random.normal(kpr, (S, B, D), jnp.float32)
    post_out = jax.random.normal(kpo, (S, B, D), jnp.float32)

    # padding masks: nonzero = padding (all-valid here)
    encoder_padding_mask = jnp.zeros((B, S), jnp.float32)
    prev_out_padding_mask = jnp.zeros((B, S), jnp.float32)
    post_out_padding_mask = jnp.zeros((B, S), jnp.float32)
    self_attn_padding_mask = jnp.zeros((B, T), jnp.float32)
    # causal additive self-attention mask (future positions masked)
    self_attn_mask = jnp.where(
        jnp.triu(jnp.ones((T, T), jnp.float32), k=1) > 0, -1e9, 0.0)

    out, attn, _ = autoformer_decoder_layer_forward(
        params, x, encoder_out, encoder_padding_mask,
        prev_out, prev_out_padding_mask, post_out, post_out_padding_mask,
        self_attn_mask, self_attn_padding_mask, H)

    jax.block_until_ready((out, attn))
    assert out.shape == (T, B, D) and attn.shape == (B, T, S)
    assert bool(jnp.all(jnp.isfinite(out))) and bool(jnp.all(jnp.isfinite(attn)))
    print("KERNEL_OK")
</pallas_src>

<mosaic_0001>
module attributes {stable_mosaic.version = 11 : i64} {
  func.func @decoder_layer_kernel(%arg0: i32, %arg1: memref<1x8x32xf32, #tpu.memory_space<vmem>>, %arg2: memref<1x8x32xf32, #tpu.memory_space<vmem>>, %arg3: memref<1x8x32xf32, #tpu.memory_space<vmem>>, %arg4: memref<1x8x32xf32, #tpu.memory_space<vmem>>, %arg5: memref<1x1x8xf32, #tpu.memory_space<vmem>>, %arg6: memref<1x1x8xf32, #tpu.memory_space<vmem>>, %arg7: memref<1x1x8xf32, #tpu.memory_space<vmem>>, %arg8: memref<1x1x8xf32, #tpu.memory_space<vmem>>, %arg9: memref<8x8xf32, #tpu.memory_space<vmem>>, %arg10: memref<32x32xbf16, #tpu.memory_space<vmem>>, %arg11: memref<1x32xf32, #tpu.memory_space<vmem>>, %arg12: memref<32x32xbf16, #tpu.memory_space<vmem>>, %arg13: memref<1x32xf32, #tpu.memory_space<vmem>>, %arg14: memref<32x32xbf16, #tpu.memory_space<vmem>>, %arg15: memref<1x32xf32, #tpu.memory_space<vmem>>, %arg16: memref<32x32xbf16, #tpu.memory_space<vmem>>, %arg17: memref<1x32xf32, #tpu.memory_space<vmem>>, %arg18: memref<1x32xf32, #tpu.memory_space<vmem>>, %arg19: memref<1x32xf32, #tpu.memory_space<vmem>>, %arg20: memref<32x32xbf16, #tpu.memory_space<vmem>>, %arg21: memref<1x32xf32, #tpu.memory_space<vmem>>, %arg22: memref<32x32xbf16, #tpu.memory_space<vmem>>, %arg23: memref<1x32xf32, #tpu.memory_space<vmem>>, %arg24: memref<32x32xbf16, #tpu.memory_space<vmem>>, %arg25: memref<1x32xf32, #tpu.memory_space<vmem>>, %arg26: memref<32x32xbf16, #tpu.memory_space<vmem>>, %arg27: memref<1x32xf32, #tpu.memory_space<vmem>>, %arg28: memref<1x32xf32, #tpu.memory_space<vmem>>, %arg29: memref<1x32xf32, #tpu.memory_space<vmem>>, %arg30: memref<32x32xbf16, #tpu.memory_space<vmem>>, %arg31: memref<1x32xf32, #tpu.memory_space<vmem>>, %arg32: memref<32x32xbf16, #tpu.memory_space<vmem>>, %arg33: memref<1x32xf32, #tpu.memory_space<vmem>>, %arg34: memref<32x32xbf16, #tpu.memory_space<vmem>>, %arg35: memref<1x32xf32, #tpu.memory_space<vmem>>, %arg36: memref<32x32xbf16, #tpu.memory_space<vmem>>, %arg37: memref<1x32xf32, #tpu.memory_space<vmem>>, %arg38: memref<1x32xf32, #tpu.memory_space<vmem>>, %arg39: memref<1x32xf32, #tpu.memory_space<vmem>>, %arg40: memref<32x32xbf16, #tpu.memory_space<vmem>>, %arg41: memref<1x32xf32, #tpu.memory_space<vmem>>, %arg42: memref<32x32xbf16, #tpu.memory_space<vmem>>, %arg43: memref<1x32xf32, #tpu.memory_space<vmem>>, %arg44: memref<32x32xbf16, #tpu.memory_space<vmem>>, %arg45: memref<1x32xf32, #tpu.memory_space<vmem>>, %arg46: memref<32x32xbf16, #tpu.memory_space<vmem>>, %arg47: memref<1x32xf32, #tpu.memory_space<vmem>>, %arg48: memref<1x32xf32, #tpu.memory_space<vmem>>, %arg49: memref<1x32xf32, #tpu.memory_space<vmem>>, %arg50: memref<32x128xbf16, #tpu.memory_space<vmem>>, %arg51: memref<1x128xf32, #tpu.memory_space<vmem>>, %arg52: memref<1x128xf32, #tpu.memory_space<vmem>>, %arg53: memref<32x32xbf16, #tpu.memory_space<vmem>>, %arg54: memref<32x32xbf16, #tpu.memory_space<vmem>>, %arg55: memref<32x64xbf16, #tpu.memory_space<vmem>>, %arg56: memref<1x64xf32, #tpu.memory_space<vmem>>, %arg57: memref<64x32xbf16, #tpu.memory_space<vmem>>, %arg58: memref<1x32xf32, #tpu.memory_space<vmem>>, %arg59: memref<1x32xf32, #tpu.memory_space<vmem>>, %arg60: memref<1x32xf32, #tpu.memory_space<vmem>>, %arg61: memref<1x8x32xf32, #tpu.memory_space<vmem>>, %arg62: memref<1x8x8xf32, #tpu.memory_space<vmem>>) attributes {dimension_semantics = [#tpu.dimension_semantics<parallel>], iteration_bounds = array<i64: 2>, scalar_prefetch = 0 : i64, scratch_operands = 0 : i64, tpu.core_type = #tpu.core_type<tc>, window_params = [{transform_indices = @transform_0, window_bounds = array<i64: 1, 8, 32>}, {transform_indices = @transform_1, window_bounds = array<i64: 1, 8, 32>}, {transform_indices = @transform_2, window_bounds = array<i64: 1, 8, 32>}, {transform_indices = @transform_3, window_bounds = array<i64: 1, 8, 32>}, {transform_indices = @transform_4, window_bounds = array<i64: 1, 1, 8>}, {transform_indices = @transform_5, window_bounds = array<i64: 1, 1, 8>}, {transform_indices = @transform_6, window_bounds = array<i64: 1, 1, 8>}, {transform_indices = @transform_7, window_bounds = array<i64: 1, 1, 8>}, {pipeline_mode = #tpu.pipeline_mode<synchronous>, transform_indices = @transform_8, window_bounds = array<i64: 8, 8>}, {pipeline_mode = #tpu.pipeline_mode<synchronous>, transform_indices = @transform_9, window_bounds = array<i64: 32, 32>}, {pipeline_mode = #tpu.pipeline_mode<synchronous>, transform_indices = @transform_10, window_bounds = array<i64: 1, 32>}, {pipeline_mode = #tpu.pipeline_mode<synchronous>, transform_indices = @transform_11, window_bounds = array<i64: 32, 32>}, {pipeline_mode = #tpu.pipeline_mode<synchronous>, transform_indices = @transform_12, window_bounds = array<i64: 1, 32>}, {pipeline_mode = #tpu.pipeline_mode<synchronous>, transform_indices = @transform_13, window_bounds = array<i64: 32, 32>}, {pipeline_mode = #tpu.pipeline_mode<synchronous>, transform_indices = @transform_14, window_bounds = array<i64: 1, 32>}, {pipeline_mode = #tpu.pipeline_mode<synchronous>, transform_indices = @transform_15, window_bounds = array<i64: 32, 32>}, {pipeline_mode = #tpu.pipeline_mode<synchronous>, transform_indices = @transform_16, window_bounds = array<i64: 1, 32>}, {pipeline_mode = #tpu.pipeline_mode<synchronous>, transform_indices = @transform_17, window_bounds = array<i64: 1, 32>}, {pipeline_mode = #tpu.pipeline_mode<synchronous>, transform_indices = @transform_18, window_bounds = array<i64: 1, 32>}, {pipeline_mode = #tpu.pipeline_mode<synchronous>, transform_indices = @transform_19, window_bounds = array<i64: 32, 32>}, {pipeline_mode = #tpu.pipeline_mode<synchronous>, transform_indices = @transform_20, window_bounds = array<i64: 1, 32>}, {pipeline_mode = #tpu.pipeline_mode<synchronous>, transform_indices = @transform_21, window_bounds = array<i64: 32, 32>}, {pipeline_mode = #tpu.pipeline_mode<synchronous>, transform_indices = @transform_22, window_bounds = array<i64: 1, 32>}, {pipeline_mode = #tpu.pipeline_mode<synchronous>, transform_indices = @transform_23, window_bounds = array<i64: 32, 32>}, {pipeline_mode = #tpu.pipeline_mode<synchronous>, transform_indices = @transform_24, window_bounds = array<i64: 1, 32>}, {pipeline_mode = #tpu.pipeline_mode<synchronous>, transform_indices = @transform_25, window_bounds = array<i64: 32, 32>}, {pipeline_mode = #tpu.pipeline_mode<synchronous>, transform_indices = @transform_26, window_bounds = array<i64: 1, 32>}, {pipeline_mode = #tpu.pipeline_mode<synchronous>, transform_indices = @transform_27, window_bounds = array<i64: 1, 32>}, {pipeline_mode = #tpu.pipeline_mode<synchronous>, transform_indices = @transform_28, window_bounds = array<i64: 1, 32>}, {pipeline_mode = #tpu.pipeline_mode<synchronous>, transform_indices = @transform_29, window_bounds = array<i64: 32, 32>}, {pipeline_mode = #tpu.pipeline_mode<synchronous>, transform_indices = @transform_30, window_bounds = array<i64: 1, 32>}, {pipeline_mode = #tpu.pipeline_mode<synchronous>, transform_indices = @transform_31, window_bounds = array<i64: 32, 32>}, {pipeline_mode = #tpu.pipeline_mode<synchronous>, transform_indices = @transform_32, window_bounds = array<i64: 1, 32>}, {pipeline_mode = #tpu.pipeline_mode<synchronous>, transform_indices = @transform_33, window_bounds = array<i64: 32, 32>}, {pipeline_mode = #tpu.pipeline_mode<synchronous>, transform_indices = @transform_34, window_bounds = array<i64: 1, 32>}, {pipeline_mode = #tpu.pipeline_mode<synchronous>, transform_indices = @transform_35, window_bounds = array<i64: 32, 32>}, {pipeline_mode = #tpu.pipeline_mode<synchronous>, transform_indices = @transform_36, window_bounds = array<i64: 1, 32>}, {pipeline_mode = #tpu.pipeline_mode<synchronous>, transform_indices = @transform_37, window_bounds = array<i64: 1, 32>}, {pipeline_mode = #tpu.pipeline_mode<synchronous>, transform_indices = @transform_38, window_bounds = array<i64: 1, 32>}, {pipeline_mode = #tpu.pipeline_mode<synchronous>, transform_indices = @transform_39, window_bounds = array<i64: 32, 32>}, {pipeline_mode = #tpu.pipeline_mode<synchronous>, transform_indices = @transform_40, window_bounds = array<i64: 1, 32>}, {pipeline_mode = #tpu.pipeline_mode<synchronous>, transform_indices = @transform_41, window_bounds = array<i64: 32, 32>}, {pipeline_mode = #tpu.pipeline_mode<synchronous>, transform_indices = @transform_42, window_bounds = array<i64: 1, 32>}, {pipeline_mode = #tpu.pipeline_mode<synchronous>, transform_indices = @transform_43, window_bounds = array<i64: 32, 32>}, {pipeline_mode = #tpu.pipeline_mode<synchronous>, transform_indices = @transform_44, window_bounds = array<i64: 1, 32>}, {pipeline_mode = #tpu.pipeline_mode<synchronous>, transform_indices = @transform_45, window_bounds = array<i64: 32, 32>}, {pipeline_mode = #tpu.pipeline_mode<synchronous>, transform_indices = @transform_46, window_bounds = array<i64: 1, 32>}, {pipeline_mode = #tpu.pipeline_mode<synchronous>, transform_indices = @transform_47, window_bounds = array<i64: 1, 32>}, {pipeline_mode = #tpu.pipeline_mode<synchronous>, transform_indices = @transform_48, window_bounds = array<i64: 1, 32>}, {pipeline_mode = #tpu.pipeline_mode<synchronous>, transform_indices = @transform_49, window_bounds = array<i64: 32, 128>}, {pipeline_mode = #tpu.pipeline_mode<synchronous>, transform_indices = @transform_50, window_bounds = array<i64: 1, 128>}, {pipeline_mode = #tpu.pipeline_mode<synchronous>, transform_indices = @transform_51, window_bounds = array<i64: 1, 128>}, {pipeline_mode = #tpu.pipeline_mode<synchronous>, transform_indices = @transform_52, window_bounds = array<i64: 32, 32>}, {pipeline_mode = #tpu.pipeline_mode<synchronous>, transform_indices = @transform_53, window_bounds = array<i64: 32, 32>}, {pipeline_mode = #tpu.pipeline_mode<synchronous>, transform_indices = @transform_54, window_bounds = array<i64: 32, 64>}, {pipeline_mode = #tpu.pipeline_mode<synchronous>, transform_indices = @transform_55, window_bounds = array<i64: 1, 64>}, {pipeline_mode = #tpu.pipeline_mode<synchronous>, transform_indices = @transform_56, window_bounds = array<i64: 64, 32>}, {pipeline_mode = #tpu.pipeline_mode<synchronous>, transform_indices = @transform_57, window_bounds = array<i64: 1, 32>}, {pipeline_mode = #tpu.pipeline_mode<synchronous>, transform_indices = @transform_58, window_bounds = array<i64: 1, 32>}, {pipeline_mode = #tpu.pipeline_mode<synchronous>, transform_indices = @transform_59, window_bounds = array<i64: 1, 32>}, {transform_indices = @transform_60, window_bounds = array<i64: 1, 8, 32>}, {transform_indices = @transform_61, window_bounds = array<i64: 1, 8, 8>}]} {
    %c0 = arith.constant 0 : index
    %c0_0 = arith.constant 0 : index
    %c0_1 = arith.constant 0 : index
    %0 = vector.load %arg1[%c0, %c0_0, %c0_1] : memref<1x8x32xf32, #tpu.memory_space<vmem>>, vector<1x8x32xf32>
    %1 = vector.shape_cast %0 : vector<1x8x32xf32> to vector<8x32xf32>
    %c0_2 = arith.constant 0 : index
    %c0_3 = arith.constant 0 : index
    %c0_4 = arith.constant 0 : index
    %2 = vector.load %arg2[%c0_2, %c0_3, %c0_4] : memref<1x8x32xf32, #tpu.memory_space<vmem>>, vector<1x8x32xf32>
    %3 = vector.shape_cast %2 : vector<1x8x32xf32> to vector<8x32xf32>
    %c0_5 = arith.constant 0 : index
    %c0_6 = arith.constant 0 : index
    %4 = vector.load %arg9[%c0_5, %c0_6] : memref<8x8xf32, #tpu.memory_space<vmem>>, vector<8x8xf32>
    %c0_7 = arith.constant 0 : index
    %c0_8 = arith.constant 0 : index
    %c0_9 = arith.constant 0 : index
    %5 = vector.load %arg5[%c0_7, %c0_8, %c0_9] : memref<1x1x8xf32, #tpu.memory_space<vmem>>, vector<1x1x8xf32>
    %6 = vector.shape_cast %5 : vector<1x1x8xf32> to vector<1x8xf32>
    %c0_10 = arith.constant 0 : index
    %c0_11 = arith.constant 0 : index
    %c0_12 = arith.constant 0 : index
    %7 = vector.load %arg6[%c0_10, %c0_11, %c0_12] : memref<1x1x8xf32, #tpu.memory_space<vmem>>, vector<1x1x8xf32>
    %8 = vector.shape_cast %7 : vector<1x1x8xf32> to vector<1x8xf32>
    %c0_13 = arith.constant 0 : index
    %c0_14 = arith.constant 0 : index
    %c0_15 = arith.constant 0 : index
    %9 = vector.load %arg7[%c0_13, %c0_14, %c0_15] : memref<1x1x8xf32, #tpu.memory_space<vmem>>, vector<1x1x8xf32>
    %10 = vector.shape_cast %9 : vector<1x1x8xf32> to vector<1x8xf32>
    %c0_16 = arith.constant 0 : index
    %c0_17 = arith.constant 0 : index
    %c0_18 = arith.constant 0 : index
    %11 = vector.load %arg8[%c0_16, %c0_17, %c0_18] : memref<1x1x8xf32, #tpu.memory_space<vmem>>, vector<1x1x8xf32>
    %12 = vector.shape_cast %11 : vector<1x1x8xf32> to vector<1x8xf32>
    %13 = arith.truncf %1 : vector<8x32xf32> to vector<8x32xbf16>
    %14 = arith.truncf %3 : vector<8x32xf32> to vector<8x32xbf16>
    %c0_19 = arith.constant 0 : index
    %c0_20 = arith.constant 0 : index
    %15 = vector.load %arg10[%c0_19, %c0_20] : memref<32x32xbf16, #tpu.memory_space<vmem>>, vector<32x32xbf16>
    %c0_21 = arith.constant 0 : index
    %c0_22 = arith.constant 0 : index
    %16 = vector.load %arg11[%c0_21, %c0_22] : memref<1x32xf32, #tpu.memory_space<vmem>>, vector<1x32xf32>
    %c0_23 = arith.constant 0 : index
    %c0_24 = arith.constant 0 : index
    %17 = vector.load %arg12[%c0_23, %c0_24] : memref<32x32xbf16, #tpu.memory_space<vmem>>, vector<32x32xbf16>
    %c0_25 = arith.constant 0 : index
    %c0_26 = arith.constant 0 : index
    %18 = vector.load %arg13[%c0_25, %c0_26] : memref<1x32xf32, #tpu.memory_space<vmem>>, vector<1x32xf32>
    %c0_27 = arith.constant 0 : index
    %c0_28 = arith.constant 0 : index
    %19 = vector.load %arg14[%c0_27, %c0_28] : memref<32x32xbf16, #tpu.memory_space<vmem>>, vector<32x32xbf16>
    %c0_29 = arith.constant 0 : index
    %c0_30 = arith.constant 0 : index
    %20 = vector.load %arg15[%c0_29, %c0_30] : memref<1x32xf32, #tpu.memory_space<vmem>>, vector<1x32xf32>
    %c0_31 = arith.constant 0 : index
    %c0_32 = arith.constant 0 : index
    %21 = vector.load %arg16[%c0_31, %c0_32] : memref<32x32xbf16, #tpu.memory_space<vmem>>, vector<32x32xbf16>
    %c0_33 = arith.constant 0 : index
    %c0_34 = arith.constant 0 : index
    %22 = vector.load %arg17[%c0_33, %c0_34] : memref<1x32xf32, #tpu.memory_space<vmem>>, vector<1x32xf32>
    %cst = arith.constant dense<0.000000e+00> : vector<8x32xf32>
    %23 = tpu.matmul %13, %15, %cst {dimension_numbers = #tpu.dot_dimension_numbers<[1], [0], [0], [1], [0, 0, 1, 1], [], []>} : vector<8x32xbf16>, vector<32x32xbf16>, vector<8x32xf32> -> vector<8x32xf32>
    %24 = vector.broadcast %16 : vector<1x32xf32> to vector<8x32xf32>
    %25 = arith.addf %23, %24 : vector<8x32xf32>
    %26 = arith.truncf %25 : vector<8x32xf32> to vector<8x32xbf16>
    %cst_35 = arith.constant dense<0.000000e+00> : vector<8x32xf32>
    %27 = tpu.matmul %13, %17, %cst_35 {dimension_numbers = #tpu.dot_dimension_numbers<[1], [0], [0], [1], [0, 0, 1, 1], [], []>} : vector<8x32xbf16>, vector<32x32xbf16>, vector<8x32xf32> -> vector<8x32xf32>
    %28 = vector.broadcast %18 : vector<1x32xf32> to vector<8x32xf32>
    %29 = arith.addf %27, %28 : vector<8x32xf32>
    %30 = arith.truncf %29 : vector<8x32xf32> to vector<8x32xbf16>
    %cst_36 = arith.constant dense<0.000000e+00> : vector<8x32xf32>
    %31 = tpu.matmul %13, %19, %cst_36 {dimension_numbers = #tpu.dot_dimension_numbers<[1], [0], [0], [1], [0, 0, 1, 1], [], []>} : vector<8x32xbf16>, vector<32x32xbf16>, vector<8x32xf32> -> vector<8x32xf32>
    %32 = vector.broadcast %20 : vector<1x32xf32> to vector<8x32xf32>
    %33 = arith.addf %31, %32 : vector<8x32xf32>
    %34 = arith.truncf %33 : vector<8x32xf32> to vector<8x32xbf16>
    %35 = vector.extract_strided_slice %26 {offsets = [0, 0], sizes = [8, 8], strides = [1, 1]} : vector<8x32xbf16> to vector<8x8xbf16>
    %36 = vector.extract_strided_slice %30 {offsets = [0, 0], sizes = [8, 8], strides = [1, 1]} : vector<8x32xbf16> to vector<8x8xbf16>
    %cst_37 = arith.constant dense<0.000000e+00> : vector<8x8xf32>
    %37 = tpu.matmul %35, %36, %cst_37 {dimension_numbers = #tpu.dot_dimension_numbers<[1], [1], [0], [0], [0, 0, 1, 0], [], []>} : vector<8x8xbf16>, vector<8x8xbf16>, vector<8x8xf32> -> vector<8x8xf32>
    %38 = arith.addf %37, %4 : vector<8x8xf32>
    %cst_38 = arith.constant 0.000000e+00 : f32
    %39 = vector.broadcast %cst_38 : f32 to vector<1x8xf32>
    %40 = arith.cmpf one, %6, %39 : vector<1x8xf32>
    %cst_39 = arith.constant -1.000000e+30 : f32
    %41 = vector.shape_cast %40 : vector<1x8xi1> to vector<1x8xi1>
    %42 = vector.broadcast %41 : vector<1x8xi1> to vector<8x8xi1>
    %43 = vector.broadcast %cst_39 : f32 to vector<8x8xf32>
    %44 = arith.select %42, %43, %38 : vector<8x8xi1>, vector<8x8xf32>
    %cst_40 = arith.constant dense<0xFF800000> : vector<8xf32>
    %45 = vector.multi_reduction <maximumf>, %44, %cst_40 [1] : vector<8x8xf32> to vector<8xf32>
    %46 = vector.shape_cast %45 : vector<8xf32> to vector<8x1xf32>
    %47 = vector.broadcast %46 : vector<8x1xf32> to vector<8x8xf32>
    %48 = arith.subf %44, %47 : vector<8x8xf32>
    %49 = math.exp %48 : vector<8x8xf32>
    %cst_41 = arith.constant dense<0.000000e+00> : vector<8xf32>
    %50 = vector.multi_reduction <add>, %49, %cst_41 [1] : vector<8x8xf32> to vector<8xf32>
    %51 = vector.shape_cast %50 : vector<8xf32> to vector<8x1xf32>
    %52 = tpu.reciprocal %51 {approx = true} : vector<8x1xf32> -> vector<8x1xf32>
    %53 = vector.broadcast %52 : vector<8x1xf32> to vector<8x8xf32>
    %54 = arith.mulf %49, %53 : vector<8x8xf32>
    %55 = arith.truncf %54 : vector<8x8xf32> to vector<8x8xbf16>
    %56 = vector.extract_strided_slice %34 {offsets = [0, 0], sizes = [8, 8], strides = [1, 1]} : vector<8x32xbf16> to vector<8x8xbf16>
    %cst_42 = arith.constant dense<0.000000e+00> : vector<8x8xf32>
    %57 = tpu.matmul %55, %56, %cst_42 {dimension_numbers = #tpu.dot_dimension_numbers<[1], [0], [0], [1], [0, 0, 1, 1], [], []>} : vector<8x8xbf16>, vector<8x8xbf16>, vector<8x8xf32> -> vector<8x8xf32>
    %58 = arith.truncf %57 : vector<8x8xf32> to vector<8x8xbf16>
    %59 = vector.extract_strided_slice %26 {offsets = [0, 8], sizes = [8, 8], strides = [1, 1]} : vector<8x32xbf16> to vector<8x8xbf16>
    %60 = vector.extract_strided_slice %30 {offsets = [0, 8], sizes = [8, 8], strides = [1, 1]} : vector<8x32xbf16> to vector<8x8xbf16>
    %cst_43 = arith.constant dense<0.000000e+00> : vector<8x8xf32>
    %61 = tpu.matmul %59, %60, %cst_43 {dimension_numbers = #tpu.dot_dimension_numbers<[1], [1], [0], [0], [0, 0, 1, 0], [], []>} : vector<8x8xbf16>, vector<8x8xbf16>, vector<8x8xf32> -> vector<8x8xf32>
    %62 = arith.addf %61, %4 : vector<8x8xf32>
    %cst_44 = arith.constant 0.000000e+00 : f32
    %63 = vector.broadcast %cst_44 : f32 to vector<1x8xf32>
    %64 = arith.cmpf one, %6, %63 : vector<1x8xf32>
    %cst_45 = arith.constant -1.000000e+30 : f32
    %65 = vector.shape_cast %64 : vector<1x8xi1> to vector<1x8xi1>
    %66 = vector.broadcast %65 : vector<1x8xi1> to vector<8x8xi1>
    %67 = vector.broadcast %cst_45 : f32 to vector<8x8xf32>
    %68 = arith.select %66, %67, %62 : vector<8x8xi1>, vector<8x8xf32>
    %cst_46 = arith.constant dense<0xFF800000> : vector<8xf32>
    %69 = vector.multi_reduction <maximumf>, %68, %cst_46 [1] : vector<8x8xf32> to vector<8xf32>
    %70 = vector.shape_cast %69 : vector<8xf32> to vector<8x1xf32>
    %71 = vector.broadcast %70 : vector<8x1xf32> to vector<8x8xf32>
    %72 = arith.subf %68, %71 : vector<8x8xf32>
    %73 = math.exp %72 : vector<8x8xf32>
    %cst_47 = arith.constant dense<0.000000e+00> : vector<8xf32>
    %74 = vector.multi_reduction <add>, %73, %cst_47 [1] : vector<8x8xf32> to vector<8xf32>
    %75 = vector.shape_cast %74 : vector<8xf32> to vector<8x1xf32>
    %76 = tpu.reciprocal %75 {approx = true} : vector<8x1xf32> -> vector<8x1xf32>
    %77 = vector.broadcast %76 : vector<8x1xf32> to vector<8x8xf32>
    %78 = arith.mulf %73, %77 : vector<8x8xf32>
    %79 = arith.truncf %78 : vector<8x8xf32> to vector<8x8xbf16>
    %80 = vector.extract_strided_slice %34 {offsets = [0, 8], sizes = [8, 8], strides = [1, 1]} : vector<8x32xbf16> to vector<8x8xbf16>
    %cst_48 = arith.constant dense<0.000000e+00> : vector<8x8xf32>
    %81 = tpu.matmul %79, %80, %cst_48 {dimension_numbers = #tpu.dot_dimension_numbers<[1], [0], [0], [1], [0, 0, 1, 1], [], []>} : vector<8x8xbf16>, vector<8x8xbf16>, vector<8x8xf32> -> vector<8x8xf32>
    %82 = arith.truncf %81 : vector<8x8xf32> to vector<8x8xbf16>
    %83 = vector.extract_strided_slice %26 {offsets = [0, 16], sizes = [8, 8], strides = [1, 1]} : vector<8x32xbf16> to vector<8x8xbf16>
    %84 = vector.extract_strided_slice %30 {offsets = [0, 16], sizes = [8, 8], strides = [1, 1]} : vector<8x32xbf16> to vector<8x8xbf16>
    %cst_49 = arith.constant dense<0.000000e+00> : vector<8x8xf32>
    %85 = tpu.matmul %83, %84, %cst_49 {dimension_numbers = #tpu.dot_dimension_numbers<[1], [1], [0], [0], [0, 0, 1, 0], [], []>} : vector<8x8xbf16>, vector<8x8xbf16>, vector<8x8xf32> -> vector<8x8xf32>
    %86 = arith.addf %85, %4 : vector<8x8xf32>
    %cst_50 = arith.constant 0.000000e+00 : f32
    %87 = vector.broadcast %cst_50 : f32 to vector<1x8xf32>
    %88 = arith.cmpf one, %6, %87 : vector<1x8xf32>
    %cst_51 = arith.constant -1.000000e+30 : f32
    %89 = vector.shape_cast %88 : vector<1x8xi1> to vector<1x8xi1>
    %90 = vector.broadcast %89 : vector<1x8xi1> to vector<8x8xi1>
    %91 = vector.broadcast %cst_51 : f32 to vector<8x8xf32>
    %92 = arith.select %90, %91, %86 : vector<8x8xi1>, vector<8x8xf32>
    %cst_52 = arith.constant dense<0xFF800000> : vector<8xf32>
    %93 = vector.multi_reduction <maximumf>, %92, %cst_52 [1] : vector<8x8xf32> to vector<8xf32>
    %94 = vector.shape_cast %93 : vector<8xf32> to vector<8x1xf32>
    %95 = vector.broadcast %94 : vector<8x1xf32> to vector<8x8xf32>
    %96 = arith.subf %92, %95 : vector<8x8xf32>
    %97 = math.exp %96 : vector<8x8xf32>
    %cst_53 = arith.constant dense<0.000000e+00> : vector<8xf32>
    %98 = vector.multi_reduction <add>, %97, %cst_53 [1] : vector<8x8xf32> to vector<8xf32>
    %99 = vector.shape_cast %98 : vector<8xf32> to vector<8x1xf32>
    %100 = tpu.reciprocal %99 {approx = true} : vector<8x1xf32> -> vector<8x1xf32>
    %101 = vector.broadcast %100 : vector<8x1xf32> to vector<8x8xf32>
    %102 = arith.mulf %97, %101 : vector<8x8xf32>
    %103 = arith.truncf %102 : vector<8x8xf32> to vector<8x8xbf16>
    %104 = vector.extract_strided_slice %34 {offsets = [0, 16], sizes = [8, 8], strides = [1, 1]} : vector<8x32xbf16> to vector<8x8xbf16>
    %cst_54 = arith.constant dense<0.000000e+00> : vector<8x8xf32>
    %105 = tpu.matmul %103, %104, %cst_54 {dimension_numbers = #tpu.dot_dimension_numbers<[1], [0], [0], [1], [0, 0, 1, 1], [], []>} : vector<8x8xbf16>, vector<8x8xbf16>, vector<8x8xf32> -> vector<8x8xf32>
    %106 = arith.truncf %105 : vector<8x8xf32> to vector<8x8xbf16>
    %107 = vector.extract_strided_slice %26 {offsets = [0, 24], sizes = [8, 8], strides = [1, 1]} : vector<8x32xbf16> to vector<8x8xbf16>
    %108 = vector.extract_strided_slice %30 {offsets = [0, 24], sizes = [8, 8], strides = [1, 1]} : vector<8x32xbf16> to vector<8x8xbf16>
    %cst_55 = arith.constant dense<0.000000e+00> : vector<8x8xf32>
    %109 = tpu.matmul %107, %108, %cst_55 {dimension_numbers = #tpu.dot_dimension_numbers<[1], [1], [0], [0], [0, 0, 1, 0], [], []>} : vector<8x8xbf16>, vector<8x8xbf16>, vector<8x8xf32> -> vector<8x8xf32>
    %110 = arith.addf %109, %4 : vector<8x8xf32>
    %cst_56 = arith.constant 0.000000e+00 : f32
    %111 = vector.broadcast %cst_56 : f32 to vector<1x8xf32>
    %112 = arith.cmpf one, %6, %111 : vector<1x8xf32>
    %cst_57 = arith.constant -1.000000e+30 : f32
    %113 = vector.shape_cast %112 : vector<1x8xi1> to vector<1x8xi1>
    %114 = vector.broadcast %113 : vector<1x8xi1> to vector<8x8xi1>
    %115 = vector.broadcast %cst_57 : f32 to vector<8x8xf32>
    %116 = arith.select %114, %115, %110 : vector<8x8xi1>, vector<8x8xf32>
    %cst_58 = arith.constant dense<0xFF800000> : vector<8xf32>
    %117 = vector.multi_reduction <maximumf>, %116, %cst_58 [1] : vector<8x8xf32> to vector<8xf32>
    %118 = vector.shape_cast %117 : vector<8xf32> to vector<8x1xf32>
    %119 = vector.broadcast %118 : vector<8x1xf32> to vector<8x8xf32>
    %120 = arith.subf %116, %119 : vector<8x8xf32>
    %121 = math.exp %120 : vector<8x8xf32>
    %cst_59 = arith.constant dense<0.000000e+00> : vector<8xf32>
    %122 = vector.multi_reduction <add>, %121, %cst_59 [1] : vector<8x8xf32> to vector<8xf32>
    %123 = vector.shape_cast %122 : vector<8xf32> to vector<8x1xf32>
    %124 = tpu.reciprocal %123 {approx = true} : vector<8x1xf32> -> vector<8x1xf32>
    %125 = vector.broadcast %124 : vector<8x1xf32> to vector<8x8xf32>
    %126 = arith.mulf %121, %125 : vector<8x8xf32>
    %127 = arith.truncf %126 : vector<8x8xf32> to vector<8x8xbf16>
    %128 = vector.extract_strided_slice %34 {offsets = [0, 24], sizes = [8, 8], strides = [1, 1]} : vector<8x32xbf16> to vector<8x8xbf16>
    %cst_60 = arith.constant dense<0.000000e+00> : vector<8x8xf32>
    %129 = tpu.matmul %127, %128, %cst_60 {dimension_numbers = #tpu.dot_dimension_numbers<[1], [0], [0], [1], [0, 0, 1, 1], [], []>} : vector<8x8xbf16>, vector<8x8xbf16>, vector<8x8xf32> -> vector<8x8xf32>
    %130 = arith.truncf %129 : vector<8x8xf32> to vector<8x8xbf16>
    %131 = tpu.concatenate %58, %82, %106, %130 in 1 : vector<8x8xbf16>, vector<8x8xbf16>, vector<8x8xbf16>, vector<8x8xbf16> -> vector<8x32xbf16>
    %cst_61 = arith.constant dense<0.000000e+00> : vector<8x32xf32>
    %132 = tpu.matmul %131, %21, %cst_61 {dimension_numbers = #tpu.dot_dimension_numbers<[1], [0], [0], [1], [0, 0, 1, 1], [], []>} : vector<8x32xbf16>, vector<32x32xbf16>, vector<8x32xf32> -> vector<8x32xf32>
    %133 = vector.broadcast %22 : vector<1x32xf32> to vector<8x32xf32>
    %134 = arith.addf %132, %133 : vector<8x32xf32>
    %135 = arith.addf %1, %134 : vector<8x32xf32>
    %c0_62 = arith.constant 0 : index
    %c0_63 = arith.constant 0 : index
    %136 = vector.load %arg18[%c0_62, %c0_63] : memref<1x32xf32, #tpu.memory_space<vmem>>, vector<1x32xf32>
    %c0_64 = arith.constant 0 : index
    %c0_65 = arith.constant 0 : index
    %137 = vector.load %arg19[%c0_64, %c0_65] : memref<1x32xf32, #tpu.memory_space<vmem>>, vector<1x32xf32>
    %cst_66 = arith.constant dense<0.000000e+00> : vector<8xf32>
    %138 = vector.multi_reduction <add>, %135, %cst_66 [1] : vector<8x32xf32> to vector<8xf32>
    %139 = vector.shape_cast %138 : vector<8xf32> to vector<8x1xf32>
    %cst_67 = arith.constant 3.200000e+01 : f32
    %140 = vector.broadcast %cst_67 : f32 to vector<8x1xf32>
    %141 = arith.divf %139, %140 : vector<8x1xf32>
    %142 = vector.broadcast %141 : vector<8x1xf32> to vector<8x32xf32>
    %143 = arith.subf %135, %142 : vector<8x32xf32>
    %144 = arith.mulf %143, %143 : vector<8x32xf32>
    %cst_68 = arith.constant dense<0.000000e+00> : vector<8xf32>
    %145 = vector.multi_reduction <add>, %144, %cst_68 [1] : vector<8x32xf32> to vector<8xf32>
    %146 = vector.shape_cast %145 : vector<8xf32> to vector<8x1xf32>
    %cst_69 = arith.constant 3.200000e+01 : f32
    %147 = vector.broadcast %cst_69 : f32 to vector<8x1xf32>
    %148 = arith.divf %146, %147 : vector<8x1xf32>
    %149 = vector.broadcast %141 : vector<8x1xf32> to vector<8x32xf32>
    %150 = arith.subf %135, %149 : vector<8x32xf32>
    %cst_70 = arith.constant 9.99999974E-6 : f32
    %151 = vector.broadcast %cst_70 : f32 to vector<8x1xf32>
    %152 = arith.addf %148, %151 : vector<8x1xf32>
    %153 = math.rsqrt %152 : vector<8x1xf32>
    %154 = vector.broadcast %153 : vector<8x1xf32> to vector<8x32xf32>
    %155 = arith.mulf %150, %154 : vector<8x32xf32>
    %156 = vector.broadcast %136 : vector<1x32xf32> to vector<8x32xf32>
    %157 = arith.mulf %155, %156 : vector<8x32xf32>
    %158 = vector.broadcast %137 : vector<1x32xf32> to vector<8x32xf32>
    %159 = arith.addf %157, %158 : vector<8x32xf32>
    %160 = arith.truncf %159 : vector<8x32xf32> to vector<8x32xbf16>
    %c0_71 = arith.constant 0 : index
    %c0_72 = arith.constant 0 : index
    %161 = vector.load %arg20[%c0_71, %c0_72] : memref<32x32xbf16, #tpu.memory_space<vmem>>, vector<32x32xbf16>
    %c0_73 = arith.constant 0 : index
    %c0_74 = arith.constant 0 : index
    %162 = vector.load %arg21[%c0_73, %c0_74] : memref<1x32xf32, #tpu.memory_space<vmem>>, vector<1x32xf32>
    %c0_75 = arith.constant 0 : index
    %c0_76 = arith.constant 0 : index
    %163 = vector.load %arg22[%c0_75, %c0_76] : memref<32x32xbf16, #tpu.memory_space<vmem>>, vector<32x32xbf16>
    %c0_77 = arith.constant 0 : index
    %c0_78 = arith.constant 0 : index
    %164 = vector.load %arg23[%c0_77, %c0_78] : memref<1x32xf32, #tpu.memory_space<vmem>>, vector<1x32xf32>
    %c0_79 = arith.constant 0 : index
    %c0_80 = arith.constant 0 : index
    %165 = vector.load %arg24[%c0_79, %c0_80] : memref<32x32xbf16, #tpu.memory_space<vmem>>, vector<32x32xbf16>
    %c0_81 = arith.constant 0 : index
    %c0_82 = arith.constant 0 : index
    %166 = vector.load %arg25[%c0_81, %c0_82] : memref<1x32xf32, #tpu.memory_space<vmem>>, vector<1x32xf32>
    %c0_83 = arith.constant 0 : index
    %c0_84 = arith.constant 0 : index
    %167 = vector.load %arg26[%c0_83, %c0_84] : memref<32x32xbf16, #tpu.memory_space<vmem>>, vector<32x32xbf16>
    %c0_85 = arith.constant 0 : index
    %c0_86 = arith.constant 0 : index
    %168 = vector.load %arg27[%c0_85, %c0_86] : memref<1x32xf32, #tpu.memory_space<vmem>>, vector<1x32xf32>
    %cst_87 = arith.constant dense<0.000000e+00> : vector<8x32xf32>
    %169 = tpu.matmul %160, %161, %cst_87 {dimension_numbers = #tpu.dot_dimension_numbers<[1], [0], [0], [1], [0, 0, 1, 1], [], []>} : vector<8x32xbf16>, vector<32x32xbf16>, vector<8x32xf32> -> vector<8x32xf32>
    %170 = vector.broadcast %162 : vector<1x32xf32> to vector<8x32xf32>
    %171 = arith.addf %169, %170 : vector<8x32xf32>
    %172 = arith.truncf %171 : vector<8x32xf32> to vector<8x32xbf16>
    %cst_88 = arith.constant dense<0.000000e+00> : vector<8x32xf32>
    %173 = tpu.matmul %14, %163, %cst_88 {dimension_numbers = #tpu.dot_dimension_numbers<[1], [0], [0], [1], [0, 0, 1, 1], [], []>} : vector<8x32xbf16>, vector<32x32xbf16>, vector<8x32xf32> -> vector<8x32xf32>
    %174 = vector.broadcast %164 : vector<1x32xf32> to vector<8x32xf32>
    %175 = arith.addf %173, %174 : vector<8x32xf32>
    %176 = arith.truncf %175 : vector<8x32xf32> to vector<8x32xbf16>
    %cst_89 = arith.constant dense<0.000000e+00> : vector<8x32xf32>
    %177 = tpu.matmul %14, %165, %cst_89 {dimension_numbers = #tpu.dot_dimension_numbers<[1], [0], [0], [1], [0, 0, 1, 1], [], []>} : vector<8x32xbf16>, vector<32x32xbf16>, vector<8x32xf32> -> vector<8x32xf32>
    %178 = vector.broadcast %166 : vector<1x32xf32> to vector<8x32xf32>
    %179 = arith.addf %177, %178 : vector<8x32xf32>
    %180 = arith.truncf %179 : vector<8x32xf32> to vector<8x32xbf16>
    %181 = vector.extract_strided_slice %172 {offsets = [0, 0], sizes = [8, 8], strides = [1, 1]} : vector<8x32xbf16> to vector<8x8xbf16>
    %182 = vector.extract_strided_slice %176 {offsets = [0, 0], sizes = [8, 8], strides = [1, 1]} : vector<8x32xbf16> to vector<8x8xbf16>
    %cst_90 = arith.constant dense<0.000000e+00> : vector<8x8xf32>
    %183 = tpu.matmul %181, %182, %cst_90 {dimension_numbers = #tpu.dot_dimension_numbers<[1], [1], [0], [0], [0, 0, 1, 0], [], []>} : vector<8x8xbf16>, vector<8x8xbf16>, vector<8x8xf32> -> vector<8x8xf32>
    %cst_91 = arith.constant 0.000000e+00 : f32
    %184 = vector.broadcast %cst_91 : f32 to vector<1x8xf32>
    %185 = arith.cmpf one, %8, %184 : vector<1x8xf32>
    %cst_92 = arith.constant -1.000000e+30 : f32
    %186 = vector.shape_cast %185 : vector<1x8xi1> to vector<1x8xi1>
    %187 = vector.broadcast %186 : vector<1x8xi1> to vector<8x8xi1>
    %188 = vector.broadcast %cst_92 : f32 to vector<8x8xf32>
    %189 = arith.select %187, %188, %183 : vector<8x8xi1>, vector<8x8xf32>
    %cst_93 = arith.constant dense<0xFF800000> : vector<8xf32>
    %190 = vector.multi_reduction <maximumf>, %189, %cst_93 [1] : vector<8x8xf32> to vector<8xf32>
    %191 = vector.shape_cast %190 : vector<8xf32> to vector<8x1xf32>
    %192 = vector.broadcast %191 : vector<8x1xf32> to vector<8x8xf32>
    %193 = arith.subf %189, %192 : vector<8x8xf32>
    %194 = math.exp %193 : vector<8x8xf32>
    %cst_94 = arith.constant dense<0.000000e+00> : vector<8xf32>
    %195 = vector.multi_reduction <add>, %194, %cst_94 [1] : vector<8x8xf32> to vector<8xf32>
    %196 = vector.shape_cast %195 : vector<8xf32> to vector<8x1xf32>
    %197 = vector.broadcast %196 : vector<8x1xf32> to vector<8x8xf32>
    %198 = arith.divf %194, %197 : vector<8x8xf32>
    %199 = arith.truncf %198 : vector<8x8xf32> to vector<8x8xbf16>
    %200 = vector.extract_strided_slice %180 {offsets = [0, 0], sizes = [8, 8], strides = [1, 1]} : vector<8x32xbf16> to vector<8x8xbf16>
    %cst_95 = arith.constant dense<0.000000e+00> : vector<8x8xf32>
    %201 = tpu.matmul %199, %200, %cst_95 {dimension_numbers = #tpu.dot_dimension_numbers<[1], [0], [0], [1], [0, 0, 1, 1], [], []>} : vector<8x8xbf16>, vector<8x8xbf16>, vector<8x8xf32> -> vector<8x8xf32>
    %202 = arith.truncf %201 : vector<8x8xf32> to vector<8x8xbf16>
    %203 = vector.extract_strided_slice %172 {offsets = [0, 8], sizes = [8, 8], strides = [1, 1]} : vector<8x32xbf16> to vector<8x8xbf16>
    %204 = vector.extract_strided_slice %176 {offsets = [0, 8], sizes = [8, 8], strides = [1, 1]} : vector<8x32xbf16> to vector<8x8xbf16>
    %cst_96 = arith.constant dense<0.000000e+00> : vector<8x8xf32>
    %205 = tpu.matmul %203, %204, %cst_96 {dimension_numbers = #tpu.dot_dimension_numbers<[1], [1], [0], [0], [0, 0, 1, 0], [], []>} : vector<8x8xbf16>, vector<8x8xbf16>, vector<8x8xf32> -> vector<8x8xf32>
    %cst_97 = arith.constant 0.000000e+00 : f32
    %206 = vector.broadcast %cst_97 : f32 to vector<1x8xf32>
    %207 = arith.cmpf one, %8, %206 : vector<1x8xf32>
    %cst_98 = arith.constant -1.000000e+30 : f32
    %208 = vector.shape_cast %207 : vector<1x8xi1> to vector<1x8xi1>
    %209 = vector.broadcast %208 : vector<1x8xi1> to vector<8x8xi1>
    %210 = vector.broadcast %cst_98 : f32 to vector<8x8xf32>
    %211 = arith.select %209, %210, %205 : vector<8x8xi1>, vector<8x8xf32>
    %cst_99 = arith.constant dense<0xFF800000> : vector<8xf32>
    %212 = vector.multi_reduction <maximumf>, %211, %cst_99 [1] : vector<8x8xf32> to vector<8xf32>
    %213 = vector.shape_cast %212 : vector<8xf32> to vector<8x1xf32>
    %214 = vector.broadcast %213 : vector<8x1xf32> to vector<8x8xf32>
    %215 = arith.subf %211, %214 : vector<8x8xf32>
    %216 = math.exp %215 : vector<8x8xf32>
    %cst_100 = arith.constant dense<0.000000e+00> : vector<8xf32>
    %217 = vector.multi_reduction <add>, %216, %cst_100 [1] : vector<8x8xf32> to vector<8xf32>
    %218 = vector.shape_cast %217 : vector<8xf32> to vector<8x1xf32>
    %219 = vector.broadcast %218 : vector<8x1xf32> to vector<8x8xf32>
    %220 = arith.divf %216, %219 : vector<8x8xf32>
    %221 = arith.truncf %220 : vector<8x8xf32> to vector<8x8xbf16>
    %222 = vector.extract_strided_slice %180 {offsets = [0, 8], sizes = [8, 8], strides = [1, 1]} : vector<8x32xbf16> to vector<8x8xbf16>
    %cst_101 = arith.constant dense<0.000000e+00> : vector<8x8xf32>
    %223 = tpu.matmul %221, %222, %cst_101 {dimension_numbers = #tpu.dot_dimension_numbers<[1], [0], [0], [1], [0, 0, 1, 1], [], []>} : vector<8x8xbf16>, vector<8x8xbf16>, vector<8x8xf32> -> vector<8x8xf32>
    %224 = arith.truncf %223 : vector<8x8xf32> to vector<8x8xbf16>
    %225 = arith.addf %198, %220 : vector<8x8xf32>
    %226 = vector.extract_strided_slice %172 {offsets = [0, 16], sizes = [8, 8], strides = [1, 1]} : vector<8x32xbf16> to vector<8x8xbf16>
    %227 = vector.extract_strided_slice %176 {offsets = [0, 16], sizes = [8, 8], strides = [1, 1]} : vector<8x32xbf16> to vector<8x8xbf16>
    %cst_102 = arith.constant dense<0.000000e+00> : vector<8x8xf32>
    %228 = tpu.matmul %226, %227, %cst_102 {dimension_numbers = #tpu.dot_dimension_numbers<[1], [1], [0], [0], [0, 0, 1, 0], [], []>} : vector<8x8xbf16>, vector<8x8xbf16>, vector<8x8xf32> -> vector<8x8xf32>
    %cst_103 = arith.constant 0.000000e+00 : f32
    %229 = vector.broadcast %cst_103 : f32 to vector<1x8xf32>
    %230 = arith.cmpf one, %8, %229 : vector<1x8xf32>
    %cst_104 = arith.constant -1.000000e+30 : f32
    %231 = vector.shape_cast %230 : vector<1x8xi1> to vector<1x8xi1>
    %232 = vector.broadcast %231 : vector<1x8xi1> to vector<8x8xi1>
    %233 = vector.broadcast %cst_104 : f32 to vector<8x8xf32>
    %234 = arith.select %232, %233, %228 : vector<8x8xi1>, vector<8x8xf32>
    %cst_105 = arith.constant dense<0xFF800000> : vector<8xf32>
    %235 = vector.multi_reduction <maximumf>, %234, %cst_105 [1] : vector<8x8xf32> to vector<8xf32>
    %236 = vector.shape_cast %235 : vector<8xf32> to vector<8x1xf32>
    %237 = vector.broadcast %236 : vector<8x1xf32> to vector<8x8xf32>
    %238 = arith.subf %234, %237 : vector<8x8xf32>
    %239 = math.exp %238 : vector<8x8xf32>
    %cst_106 = arith.constant dense<0.000000e+00> : vector<8xf32>
    %240 = vector.multi_reduction <add>, %239, %cst_106 [1] : vector<8x8xf32> to vector<8xf32>
    %241 = vector.shape_cast %240 : vector<8xf32> to vector<8x1xf32>
    %242 = vector.broadcast %241 : vector<8x1xf32> to vector<8x8xf32>
    %243 = arith.divf %239, %242 : vector<8x8xf32>
    %244 = arith.truncf %243 : vector<8x8xf32> to vector<8x8xbf16>
    %245 = vector.extract_strided_slice %180 {offsets = [0, 16], sizes = [8, 8], strides = [1, 1]} : vector<8x32xbf16> to vector<8x8xbf16>
    %cst_107 = arith.constant dense<0.000000e+00> : vector<8x8xf32>
    %246 = tpu.matmul %244, %245, %cst_107 {dimension_numbers = #tpu.dot_dimension_numbers<[1], [0], [0], [1], [0, 0, 1, 1], [], []>} : vector<8x8xbf16>, vector<8x8xbf16>, vector<8x8xf32> -> vector<8x8xf32>
    %247 = arith.truncf %246 : vector<8x8xf32> to vector<8x8xbf16>
    %248 = arith.addf %225, %243 : vector<8x8xf32>
    %249 = vector.extract_strided_slice %172 {offsets = [0, 24], sizes = [8, 8], strides = [1, 1]} : vector<8x32xbf16> to vector<8x8xbf16>
    %250 = vector.extract_strided_slice %176 {offsets = [0, 24], sizes = [8, 8], strides = [1, 1]} : vector<8x32xbf16> to vector<8x8xbf16>
    %cst_108 = arith.constant dense<0.000000e+00> : vector<8x8xf32>
    %251 = tpu.matmul %249, %250, %cst_108 {dimension_numbers = #tpu.dot_dimension_numbers<[1], [1], [0], [0], [0, 0, 1, 0], [], []>} : vector<8x8xbf16>, vector<8x8xbf16>, vector<8x8xf32> -> vector<8x8xf32>
    %cst_109 = arith.constant 0.000000e+00 : f32
    %252 = vector.broadcast %cst_109 : f32 to vector<1x8xf32>
    %253 = arith.cmpf one, %8, %252 : vector<1x8xf32>
    %cst_110 = arith.constant -1.000000e+30 : f32
    %254 = vector.shape_cast %253 : vector<1x8xi1> to vector<1x8xi1>
    %255 = vector.broadcast %254 : vector<1x8xi1> to vector<8x8xi1>
    %256 = vector.broadcast %cst_110 : f32 to vector<8x8xf32>
    %257 = arith.select %255, %256, %251 : vector<8x8xi1>, vector<8x8xf32>
    %cst_111 = arith.constant dense<0xFF800000> : vector<8xf32>
    %258 = vector.multi_reduction <maximumf>, %257, %cst_111 [1] : vector<8x8xf32> to vector<8xf32>
    %259 = vector.shape_cast %258 : vector<8xf32> to vector<8x1xf32>
    %260 = vector.broadcast %259 : vector<8x1xf32> to vector<8x8xf32>
    %261 = arith.subf %257, %260 : vector<8x8xf32>
    %262 = math.exp %261 : vector<8x8xf32>
    %cst_112 = arith.constant dense<0.000000e+00> : vector<8xf32>
    %263 = vector.multi_reduction <add>, %262, %cst_112 [1] : vector<8x8xf32> to vector<8xf32>
    %264 = vector.shape_cast %263 : vector<8xf32> to vector<8x1xf32>
    %265 = vector.broadcast %264 : vector<8x1xf32> to vector<8x8xf32>
    %266 = arith.divf %262, %265 : vector<8x8xf32>
    %267 = arith.truncf %266 : vector<8x8xf32> to vector<8x8xbf16>
    %268 = vector.extract_strided_slice %180 {offsets = [0, 24], sizes = [8, 8], strides = [1, 1]} : vector<8x32xbf16> to vector<8x8xbf16>
    %cst_113 = arith.constant dense<0.000000e+00> : vector<8x8xf32>
    %269 = tpu.matmul %267, %268, %cst_113 {dimension_numbers = #tpu.dot_dimension_numbers<[1], [0], [0], [1], [0, 0, 1, 1], [], []>} : vector<8x8xbf16>, vector<8x8xbf16>, vector<8x8xf32> -> vector<8x8xf32>
    %270 = arith.truncf %269 : vector<8x8xf32> to vector<8x8xbf16>
    %271 = arith.addf %248, %266 : vector<8x8xf32>
    %272 = tpu.concatenate %202, %224, %247, %270 in 1 : vector<8x8xbf16>, vector<8x8xbf16>, vector<8x8xbf16>, vector<8x8xbf16> -> vector<8x32xbf16>
    %cst_114 = arith.constant 2.500000e-01 : f32
    %273 = vector.broadcast %cst_114 : f32 to vector<8x8xf32>
    %274 = arith.mulf %271, %273 : vector<8x8xf32>
    %cst_115 = arith.constant dense<0.000000e+00> : vector<8x32xf32>
    %275 = tpu.matmul %272, %167, %cst_115 {dimension_numbers = #tpu.dot_dimension_numbers<[1], [0], [0], [1], [0, 0, 1, 1], [], []>} : vector<8x32xbf16>, vector<32x32xbf16>, vector<8x32xf32> -> vector<8x32xf32>
    %276 = vector.broadcast %168 : vector<1x32xf32> to vector<8x32xf32>
    %277 = arith.addf %275, %276 : vector<8x32xf32>
    %278 = arith.addf %159, %277 : vector<8x32xf32>
    %c0_116 = arith.constant 0 : index
    %c0_117 = arith.constant 0 : index
    %279 = vector.load %arg28[%c0_116, %c0_117] : memref<1x32xf32, #tpu.memory_space<vmem>>, vector<1x32xf32>
    %c0_118 = arith.constant 0 : index
    %c0_119 = arith.constant 0 : index
    %280 = vector.load %arg29[%c0_118, %c0_119] : memref<1x32xf32, #tpu.memory_space<vmem>>, vector<1x32xf32>
    %cst_120 = arith.constant dense<0.000000e+00> : vector<8xf32>
    %281 = vector.multi_reduction <add>, %278, %cst_120 [1] : vector<8x32xf32> to vector<8xf32>
    %282 = vector.shape_cast %281 : vector<8xf32> to vector<8x1xf32>
    %cst_121 = arith.constant 3.200000e+01 : f32
    %283 = vector.broadcast %cst_121 : f32 to vector<8x1xf32>
    %284 = arith.divf %282, %283 : vector<8x1xf32>
    %285 = vector.broadcast %284 : vector<8x1xf32> to vector<8x32xf32>
    %286 = arith.subf %278, %285 : vector<8x32xf32>
    %287 = arith.mulf %286, %286 : vector<8x32xf32>
    %cst_122 = arith.constant dense<0.000000e+00> : vector<8xf32>
    %288 = vector.multi_reduction <add>, %287, %cst_122 [1] : vector<8x32xf32> to vector<8xf32>
    %289 = vector.shape_cast %288 : vector<8xf32> to vector<8x1xf32>
    %cst_123 = arith.constant 3.200000e+01 : f32
    %290 = vector.broadcast %cst_123 : f32 to vector<8x1xf32>
    %291 = arith.divf %289, %290 : vector<8x1xf32>
    %292 = vector.broadcast %284 : vector<8x1xf32> to vector<8x32xf32>
    %293 = arith.subf %278, %292 : vector<8x32xf32>
    %cst_124 = arith.constant 9.99999974E-6 : f32
    %294 = vector.broadcast %cst_124 : f32 to vector<8x1xf32>
    %295 = arith.addf %291, %294 : vector<8x1xf32>
    %296 = math.rsqrt %295 : vector<8x1xf32>
    %297 = vector.broadcast %296 : vector<8x1xf32> to vector<8x32xf32>
    %298 = arith.mulf %293, %297 : vector<8x32xf32>
    %299 = vector.broadcast %279 : vector<1x32xf32> to vector<8x32xf32>
    %300 = arith.mulf %298, %299 : vector<8x32xf32>
    %301 = vector.broadcast %280 : vector<1x32xf32> to vector<8x32xf32>
    %302 = arith.addf %300, %301 : vector<8x32xf32>
    %303 = arith.truncf %302 : vector<8x32xf32> to vector<8x32xbf16>
    %c0_125 = arith.constant 0 : index
    %c0_126 = arith.constant 0 : index
    %c0_127 = arith.constant 0 : index
    %304 = vector.load %arg62[%c0_125, %c0_126, %c0_127] : memref<1x8x8xf32, #tpu.memory_space<vmem>>, vector<1x8x8xf32>
    %305 = vector.shape_cast %304 : vector<1x8x8xf32> to vector<8x8xf32>
    %306 = vector.shape_cast %274 : vector<8x8xf32> to vector<1x8x8xf32>
    tpu.vector_store %arg62[%c0_125, %c0_126, %c0_127], %306 {strides = array<i32>} : memref<1x8x8xf32, #tpu.memory_space<vmem>>, vector<1x8x8xf32>,
    %c0_128 = arith.constant 0 : index
    %c0_129 = arith.constant 0 : index
    %307 = vector.load %arg30[%c0_128, %c0_129] : memref<32x32xbf16, #tpu.memory_space<vmem>>, vector<32x32xbf16>
    %c0_130 = arith.constant 0 : index
    %c0_131 = arith.constant 0 : index
    %308 = vector.load %arg31[%c0_130, %c0_131] : memref<1x32xf32, #tpu.memory_space<vmem>>, vector<1x32xf32>
    %c0_132 = arith.constant 0 : index
    %c0_133 = arith.constant 0 : index
    %309 = vector.load %arg32[%c0_132, %c0_133] : memref<32x32xbf16, #tpu.memory_space<vmem>>, vector<32x32xbf16>
    %c0_134 = arith.constant 0 : index
    %c0_135 = arith.constant 0 : index
    %310 = vector.load %arg33[%c0_134, %c0_135] : memref<1x32xf32, #tpu.memory_space<vmem>>, vector<1x32xf32>
    %c0_136 = arith.constant 0 : index
    %c0_137 = arith.constant 0 : index
    %311 = vector.load %arg34[%c0_136, %c0_137] : memref<32x32xbf16, #tpu.memory_space<vmem>>, vector<32x32xbf16>
    %c0_138 = arith.constant 0 : index
    %c0_139 = arith.constant 0 : index
    %312 = vector.load %arg35[%c0_138, %c0_139] : memref<1x32xf32, #tpu.memory_space<vmem>>, vector<1x32xf32>
    %c0_140 = arith.constant 0 : index
    %c0_141 = arith.constant 0 : index
    %313 = vector.load %arg36[%c0_140, %c0_141] : memref<32x32xbf16, #tpu.memory_space<vmem>>, vector<32x32xbf16>
    %c0_142 = arith.constant 0 : index
    %c0_143 = arith.constant 0 : index
    %314 = vector.load %arg37[%c0_142, %c0_143] : memref<1x32xf32, #tpu.memory_space<vmem>>, vector<1x32xf32>
    %cst_144 = arith.constant dense<0.000000e+00> : vector<8x32xf32>
    %315 = tpu.matmul %14, %307, %cst_144 {dimension_numbers = #tpu.dot_dimension_numbers<[1], [0], [0], [1], [0, 0, 1, 1], [], []>} : vector<8x32xbf16>, vector<32x32xbf16>, vector<8x32xf32> -> vector<8x32xf32>
    %316 = vector.broadcast %308 : vector<1x32xf32> to vector<8x32xf32>
    %317 = arith.addf %315, %316 : vector<8x32xf32>
    %318 = arith.truncf %317 : vector<8x32xf32> to vector<8x32xbf16>
    %cst_145 = arith.constant dense<0.000000e+00> : vector<8x32xf32>
    %319 = tpu.matmul %303, %309, %cst_145 {dimension_numbers = #tpu.dot_dimension_numbers<[1], [0], [0], [1], [0, 0, 1, 1], [], []>} : vector<8x32xbf16>, vector<32x32xbf16>, vector<8x32xf32> -> vector<8x32xf32>
    %320 = vector.broadcast %310 : vector<1x32xf32> to vector<8x32xf32>
    %321 = arith.addf %319, %320 : vector<8x32xf32>
    %322 = arith.truncf %321 : vector<8x32xf32> to vector<8x32xbf16>
    %cst_146 = arith.constant dense<0.000000e+00> : vector<8x32xf32>
    %323 = tpu.matmul %303, %311, %cst_146 {dimension_numbers = #tpu.dot_dimension_numbers<[1], [0], [0], [1], [0, 0, 1, 1], [], []>} : vector<8x32xbf16>, vector<32x32xbf16>, vector<8x32xf32> -> vector<8x32xf32>
    %324 = vector.broadcast %312 : vector<1x32xf32> to vector<8x32xf32>
    %325 = arith.addf %323, %324 : vector<8x32xf32>
    %326 = arith.truncf %325 : vector<8x32xf32> to vector<8x32xbf16>
    %327 = vector.extract_strided_slice %318 {offsets = [0, 0], sizes = [8, 8], strides = [1, 1]} : vector<8x32xbf16> to vector<8x8xbf16>
    %328 = vector.extract_strided_slice %322 {offsets = [0, 0], sizes = [8, 8], strides = [1, 1]} : vector<8x32xbf16> to vector<8x8xbf16>
    %cst_147 = arith.constant dense<0.000000e+00> : vector<8x8xf32>
    %329 = tpu.matmul %327, %328, %cst_147 {dimension_numbers = #tpu.dot_dimension_numbers<[1], [1], [0], [0], [0, 0, 1, 0], [], []>} : vector<8x8xbf16>, vector<8x8xbf16>, vector<8x8xf32> -> vector<8x8xf32>
    %cst_148 = arith.constant 0.000000e+00 : f32
    %330 = vector.broadcast %cst_148 : f32 to vector<1x8xf32>
    %331 = arith.cmpf one, %6, %330 : vector<1x8xf32>
    %cst_149 = arith.constant -1.000000e+30 : f32
    %332 = vector.shape_cast %331 : vector<1x8xi1> to vector<1x8xi1>
    %333 = vector.broadcast %332 : vector<1x8xi1> to vector<8x8xi1>
    %334 = vector.broadcast %cst_149 : f32 to vector<8x8xf32>
    %335 = arith.select %333, %334, %329 : vector<8x8xi1>, vector<8x8xf32>
    %cst_150 = arith.constant dense<0xFF800000> : vector<8xf32>
    %336 = vector.multi_reduction <maximumf>, %335, %cst_150 [1] : vector<8x8xf32> to vector<8xf32>
    %337 = vector.shape_cast %336 : vector<8xf32> to vector<8x1xf32>
    %338 = vector.broadcast %337 : vector<8x1xf32> to vector<8x8xf32>
    %339 = arith.subf %335, %338 : vector<8x8xf32>
    %340 = math.exp %339 : vector<8x8xf32>
    %cst_151 = arith.constant dense<0.000000e+00> : vector<8xf32>
    %341 = vector.multi_reduction <add>, %340, %cst_151 [1] : vector<8x8xf32> to vector<8xf32>
    %342 = vector.shape_cast %341 : vector<8xf32> to vector<8x1xf32>
    %343 = tpu.reciprocal %342 {approx = true} : vector<8x1xf32> -> vector<8x1xf32>
    %344 = vector.broadcast %343 : vector<8x1xf32> to vector<8x8xf32>
    %345 = arith.mulf %340, %344 : vector<8x8xf32>
    %346 = arith.truncf %345 : vector<8x8xf32> to vector<8x8xbf16>
    %347 = vector.extract_strided_slice %326 {offsets = [0, 0], sizes = [8, 8], strides = [1, 1]} : vector<8x32xbf16> to vector<8x8xbf16>
    %cst_152 = arith.constant dense<0.000000e+00> : vector<8x8xf32>
    %348 = tpu.matmul %346, %347, %cst_152 {dimension_numbers = #tpu.dot_dimension_numbers<[1], [0], [0], [1], [0, 0, 1, 1], [], []>} : vector<8x8xbf16>, vector<8x8xbf16>, vector<8x8xf32> -> vector<8x8xf32>
    %349 = arith.truncf %348 : vector<8x8xf32> to vector<8x8xbf16>
    %350 = vector.extract_strided_slice %318 {offsets = [0, 8], sizes = [8, 8], strides = [1, 1]} : vector<8x32xbf16> to vector<8x8xbf16>
    %351 = vector.extract_strided_slice %322 {offsets = [0, 8], sizes = [8, 8], strides = [1, 1]} : vector<8x32xbf16> to vector<8x8xbf16>
    %cst_153 = arith.constant dense<0.000000e+00> : vector<8x8xf32>
    %352 = tpu.matmul %350, %351, %cst_153 {dimension_numbers = #tpu.dot_dimension_numbers<[1], [1], [0], [0], [0, 0, 1, 0], [], []>} : vector<8x8xbf16>, vector<8x8xbf16>, vector<8x8xf32> -> vector<8x8xf32>
    %cst_154 = arith.constant 0.000000e+00 : f32
    %353 = vector.broadcast %cst_154 : f32 to vector<1x8xf32>
    %354 = arith.cmpf one, %6, %353 : vector<1x8xf32>
    %cst_155 = arith.constant -1.000000e+30 : f32
    %355 = vector.shape_cast %354 : vector<1x8xi1> to vector<1x8xi1>
    %356 = vector.broadcast %355 : vector<1x8xi1> to vector<8x8xi1>
    %357 = vector.broadcast %cst_155 : f32 to vector<8x8xf32>
    %358 = arith.select %356, %357, %352 : vector<8x8xi1>, vector<8x8xf32>
    %cst_156 = arith.constant dense<0xFF800000> : vector<8xf32>
    %359 = vector.multi_reduction <maximumf>, %358, %cst_156 [1] : vector<8x8xf32> to vector<8xf32>
    %360 = vector.shape_cast %359 : vector<8xf32> to vector<8x1xf32>
    %361 = vector.broadcast %360 : vector<8x1xf32> to vector<8x8xf32>
    %362 = arith.subf %358, %361 : vector<8x8xf32>
    %363 = math.exp %362 : vector<8x8xf32>
    %cst_157 = arith.constant dense<0.000000e+00> : vector<8xf32>
    %364 = vector.multi_reduction <add>, %363, %cst_157 [1] : vector<8x8xf32> to vector<8xf32>
    %365 = vector.shape_cast %364 : vector<8xf32> to vector<8x1xf32>
    %366 = tpu.reciprocal %365 {approx = true} : vector<8x1xf32> -> vector<8x1xf32>
    %367 = vector.broadcast %366 : vector<8x1xf32> to vector<8x8xf32>
    %368 = arith.mulf %363, %367 : vector<8x8xf32>
    %369 = arith.truncf %368 : vector<8x8xf32> to vector<8x8xbf16>
    %370 = vector.extract_strided_slice %326 {offsets = [0, 8], sizes = [8, 8], strides = [1, 1]} : vector<8x32xbf16> to vector<8x8xbf16>
    %cst_158 = arith.constant dense<0.000000e+00> : vector<8x8xf32>
    %371 = tpu.matmul %369, %370, %cst_158 {dimension_numbers = #tpu.dot_dimension_numbers<[1], [0], [0], [1], [0, 0, 1, 1], [], []>} : vector<8x8xbf16>, vector<8x8xbf16>, vector<8x8xf32> -> vector<8x8xf32>
    %372 = arith.truncf %371 : vector<8x8xf32> to vector<8x8xbf16>
    %373 = vector.extract_strided_slice %318 {offsets = [0, 16], sizes = [8, 8], strides = [1, 1]} : vector<8x32xbf16> to vector<8x8xbf16>
    %374 = vector.extract_strided_slice %322 {offsets = [0, 16], sizes = [8, 8], strides = [1, 1]} : vector<8x32xbf16> to vector<8x8xbf16>
    %cst_159 = arith.constant dense<0.000000e+00> : vector<8x8xf32>
    %375 = tpu.matmul %373, %374, %cst_159 {dimension_numbers = #tpu.dot_dimension_numbers<[1], [1], [0], [0], [0, 0, 1, 0], [], []>} : vector<8x8xbf16>, vector<8x8xbf16>, vector<8x8xf32> -> vector<8x8xf32>
    %cst_160 = arith.constant 0.000000e+00 : f32
    %376 = vector.broadcast %cst_160 : f32 to vector<1x8xf32>
    %377 = arith.cmpf one, %6, %376 : vector<1x8xf32>
    %cst_161 = arith.constant -1.000000e+30 : f32
    %378 = vector.shape_cast %377 : vector<1x8xi1> to vector<1x8xi1>
    %379 = vector.broadcast %378 : vector<1x8xi1> to vector<8x8xi1>
    %380 = vector.broadcast %cst_161 : f32 to vector<8x8xf32>
    %381 = arith.select %379, %380, %375 : vector<8x8xi1>, vector<8x8xf32>
    %cst_162 = arith.constant dense<0xFF800000> : vector<8xf32>
    %382 = vector.multi_reduction <maximumf>, %381, %cst_162 [1] : vector<8x8xf32> to vector<8xf32>
    %383 = vector.shape_cast %382 : vector<8xf32> to vector<8x1xf32>
    %384 = vector.broadcast %383 : vector<8x1xf32> to vector<8x8xf32>
    %385 = arith.subf %381, %384 : vector<8x8xf32>
    %386 = math.exp %385 : vector<8x8xf32>
    %cst_163 = arith.constant dense<0.000000e+00> : vector<8xf32>
    %387 = vector.multi_reduction <add>, %386, %cst_163 [1] : vector<8x8xf32> to vector<8xf32>
    %388 = vector.shape_cast %387 : vector<8xf32> to vector<8x1xf32>
    %389 = tpu.reciprocal %388 {approx = true} : vector<8x1xf32> -> vector<8x1xf32>
    %390 = vector.broadcast %389 : vector<8x1xf32> to vector<8x8xf32>
    %391 = arith.mulf %386, %390 : vector<8x8xf32>
    %392 = arith.truncf %391 : vector<8x8xf32> to vector<8x8xbf16>
    %393 = vector.extract_strided_slice %326 {offsets = [0, 16], sizes = [8, 8], strides = [1, 1]} : vector<8x32xbf16> to vector<8x8xbf16>
    %cst_164 = arith.constant dense<0.000000e+00> : vector<8x8xf32>
    %394 = tpu.matmul %392, %393, %cst_164 {dimension_numbers = #tpu.dot_dimension_numbers<[1], [0], [0], [1], [0, 0, 1, 1], [], []>} : vector<8x8xbf16>, vector<8x8xbf16>, vector<8x8xf32> -> vector<8x8xf32>
    %395 = arith.truncf %394 : vector<8x8xf32> to vector<8x8xbf16>
    %396 = vector.extract_strided_slice %318 {offsets = [0, 24], sizes = [8, 8], strides = [1, 1]} : vector<8x32xbf16> to vector<8x8xbf16>
    %397 = vector.extract_strided_slice %322 {offsets = [0, 24], sizes = [8, 8], strides = [1, 1]} : vector<8x32xbf16> to vector<8x8xbf16>
    %cst_165 = arith.constant dense<0.000000e+00> : vector<8x8xf32>
    %398 = tpu.matmul %396, %397, %cst_165 {dimension_numbers = #tpu.dot_dimension_numbers<[1], [1], [0], [0], [0, 0, 1, 0], [], []>} : vector<8x8xbf16>, vector<8x8xbf16>, vector<8x8xf32> -> vector<8x8xf32>
    %cst_166 = arith.constant 0.000000e+00 : f32
    %399 = vector.broadcast %cst_166 : f32 to vector<1x8xf32>
    %400 = arith.cmpf one, %6, %399 : vector<1x8xf32>
    %cst_167 = arith.constant -1.000000e+30 : f32
    %401 = vector.shape_cast %400 : vector<1x8xi1> to vector<1x8xi1>
    %402 = vector.broadcast %401 : vector<1x8xi1> to vector<8x8xi1>
    %403 = vector.broadcast %cst_167 : f32 to vector<8x8xf32>
    %404 = arith.select %402, %403, %398 : vector<8x8xi1>, vector<8x8xf32>
    %cst_168 = arith.constant dense<0xFF800000> : vector<8xf32>
    %405 = vector.multi_reduction <maximumf>, %404, %cst_168 [1] : vector<8x8xf32> to vector<8xf32>
    %406 = vector.shape_cast %405 : vector<8xf32> to vector<8x1xf32>
    %407 = vector.broadcast %406 : vector<8x1xf32> to vector<8x8xf32>
    %408 = arith.subf %404, %407 : vector<8x8xf32>
    %409 = math.exp %408 : vector<8x8xf32>
    %cst_169 = arith.constant dense<0.000000e+00> : vector<8xf32>
    %410 = vector.multi_reduction <add>, %409, %cst_169 [1] : vector<8x8xf32> to vector<8xf32>
    %411 = vector.shape_cast %410 : vector<8xf32> to vector<8x1xf32>
    %412 = tpu.reciprocal %411 {approx = true} : vector<8x1xf32> -> vector<8x1xf32>
    %413 = vector.broadcast %412 : vector<8x1xf32> to vector<8x8xf32>
    %414 = arith.mulf %409, %413 : vector<8x8xf32>
    %415 = arith.truncf %414 : vector<8x8xf32> to vector<8x8xbf16>
    %416 = vector.extract_strided_slice %326 {offsets = [0, 24], sizes = [8, 8], strides = [1, 1]} : vector<8x32xbf16> to vector<8x8xbf16>
    %cst_170 = arith.constant dense<0.000000e+00> : vector<8x8xf32>
    %417 = tpu.matmul %415, %416, %cst_170 {dimension_numbers = #tpu.dot_dimension_numbers<[1], [0], [0], [1], [0, 0, 1, 1], [], []>} : vector<8x8xbf16>, vector<8x8xbf16>, vector<8x8xf32> -> vector<8x8xf32>
    %418 = arith.truncf %417 : vector<8x8xf32> to vector<8x8xbf16>
    %419 = tpu.concatenate %349, %372, %395, %418 in 1 : vector<8x8xbf16>, vector<8x8xbf16>, vector<8x8xbf16>, vector<8x8xbf16> -> vector<8x32xbf16>
    %cst_171 = arith.constant dense<0.000000e+00> : vector<8x32xf32>
    %420 = tpu.matmul %419, %313, %cst_171 {dimension_numbers = #tpu.dot_dimension_numbers<[1], [0], [0], [1], [0, 0, 1, 1], [], []>} : vector<8x32xbf16>, vector<32x32xbf16>, vector<8x32xf32> -> vector<8x32xf32>
    %421 = vector.broadcast %314 : vector<1x32xf32> to vector<8x32xf32>
    %422 = arith.addf %420, %421 : vector<8x32xf32>
    %c0_172 = arith.constant 0 : index
    %c0_173 = arith.constant 0 : index
    %423 = vector.load %arg38[%c0_172, %c0_173] : memref<1x32xf32, #tpu.memory_space<vmem>>, vector<1x32xf32>
    %c0_174 = arith.constant 0 : index
    %c0_175 = arith.constant 0 : index
    %424 = vector.load %arg39[%c0_174, %c0_175] : memref<1x32xf32, #tpu.memory_space<vmem>>, vector<1x32xf32>
    %cst_176 = arith.constant dense<0.000000e+00> : vector<8xf32>
    %425 = vector.multi_reduction <add>, %422, %cst_176 [1] : vector<8x32xf32> to vector<8xf32>
    %426 = vector.shape_cast %425 : vector<8xf32> to vector<8x1xf32>
    %cst_177 = arith.constant 3.200000e+01 : f32
    %427 = vector.broadcast %cst_177 : f32 to vector<8x1xf32>
    %428 = arith.divf %426, %427 : vector<8x1xf32>
    %429 = vector.broadcast %428 : vector<8x1xf32> to vector<8x32xf32>
    %430 = arith.subf %422, %429 : vector<8x32xf32>
    %431 = arith.mulf %430, %430 : vector<8x32xf32>
    %cst_178 = arith.constant dense<0.000000e+00> : vector<8xf32>
    %432 = vector.multi_reduction <add>, %431, %cst_178 [1] : vector<8x32xf32> to vector<8xf32>
    %433 = vector.shape_cast %432 : vector<8xf32> to vector<8x1xf32>
    %cst_179 = arith.constant 3.200000e+01 : f32
    %434 = vector.broadcast %cst_179 : f32 to vector<8x1xf32>
    %435 = arith.divf %433, %434 : vector<8x1xf32>
    %436 = vector.broadcast %428 : vector<8x1xf32> to vector<8x32xf32>
    %437 = arith.subf %422, %436 : vector<8x32xf32>
    %cst_180 = arith.constant 9.99999974E-6 : f32
    %438 = vector.broadcast %cst_180 : f32 to vector<8x1xf32>
    %439 = arith.addf %435, %438 : vector<8x1xf32>
    %440 = math.rsqrt %439 : vector<8x1xf32>
    %441 = vector.broadcast %440 : vector<8x1xf32> to vector<8x32xf32>
    %442 = arith.mulf %437, %441 : vector<8x32xf32>
    %443 = vector.broadcast %423 : vector<1x32xf32> to vector<8x32xf32>
    %444 = arith.mulf %442, %443 : vector<8x32xf32>
    %445 = vector.broadcast %424 : vector<1x32xf32> to vector<8x32xf32>
    %446 = arith.addf %444, %445 : vector<8x32xf32>
    %447 = arith.truncf %446 : vector<8x32xf32> to vector<8x32xbf16>
    %c0_181 = arith.constant 0 : index
    %c0_182 = arith.constant 0 : index
    %448 = vector.load %arg50[%c0_181, %c0_182] : memref<32x128xbf16, #tpu.memory_space<vmem>>, vector<32x128xbf16>
    %cst_183 = arith.constant dense<0.000000e+00> : vector<8x128xf32>
    %449 = tpu.matmul %447, %448, %cst_183 {dimension_numbers = #tpu.dot_dimension_numbers<[1], [0], [0], [1], [0, 0, 1, 1], [], []>} : vector<8x32xbf16>, vector<32x128xbf16>, vector<8x128xf32> -> vector<8x128xf32>
    %c0_184 = arith.constant 0 : index
    %c0_185 = arith.constant 0 : index
    %450 = vector.load %arg51[%c0_184, %c0_185] : memref<1x128xf32, #tpu.memory_space<vmem>>, vector<1x128xf32>
    %451 = vector.broadcast %450 : vector<1x128xf32> to vector<8x128xf32>
    %452 = arith.addf %449, %451 : vector<8x128xf32>
    %cst_186 = arith.constant 0.000000e+00 : f32
    %453 = vector.broadcast %cst_186 : f32 to vector<8x128xf32>
    %454 = arith.maximumf %452, %453 : vector<8x128xf32>
    %c0_187 = arith.constant 0 : index
    %c0_188 = arith.constant 0 : index
    %455 = vector.load %arg52[%c0_187, %c0_188] : memref<1x128xf32, #tpu.memory_space<vmem>>, vector<1x128xf32>
    %456 = vector.broadcast %455 : vector<1x128xf32> to vector<8x128xf32>
    %457 = arith.mulf %454, %456 : vector<8x128xf32>
    %cst_189 = arith.constant dense<0.000000e+00> : vector<8xf32>
    %458 = vector.multi_reduction <add>, %457, %cst_189 [1] : vector<8x128xf32> to vector<8xf32>
    %459 = vector.shape_cast %458 : vector<8xf32> to vector<8x1xf32>
    %cst_190 = arith.constant 0.000000e+00 : f32
    %460 = vector.broadcast %cst_190 : f32 to vector<8x1xf32>
    %461 = arith.cmpf ogt, %459, %460 : vector<8x1xf32>
    %462 = arith.extui %461 : vector<8x1xi1> to vector<8x1xi32>
    %463 = arith.sitofp %462 : vector<8x1xi32> to vector<8x1xf32>
    %c0_191 = arith.constant 0 : index
    %c0_192 = arith.constant 0 : index
    %c0_193 = arith.constant 0 : index
    %464 = vector.load %arg3[%c0_191, %c0_192, %c0_193] : memref<1x8x32xf32, #tpu.memory_space<vmem>>, vector<1x8x32xf32>
    %465 = vector.shape_cast %464 : vector<1x8x32xf32> to vector<8x32xf32>
    %466 = arith.truncf %465 : vector<8x32xf32> to vector<8x32xbf16>
    %c0_194 = arith.constant 0 : index
    %c0_195 = arith.constant 0 : index
    %467 = vector.load %arg53[%c0_194, %c0_195] : memref<32x32xbf16, #tpu.memory_space<vmem>>, vector<32x32xbf16>
    %cst_196 = arith.constant dense<0.000000e+00> : vector<8x32xf32>
    %468 = tpu.matmul %466, %467, %cst_196 {dimension_numbers = #tpu.dot_dimension_numbers<[1], [0], [0], [1], [0, 0, 1, 1], [], []>} : vector<8x32xbf16>, vector<32x32xbf16>, vector<8x32xf32> -> vector<8x32xf32>
    %c0_197 = arith.constant 0 : index
    %c0_198 = arith.constant 0 : index
    %c0_199 = arith.constant 0 : index
    %469 = vector.load %arg4[%c0_197, %c0_198, %c0_199] : memref<1x8x32xf32, #tpu.memory_space<vmem>>, vector<1x8x32xf32>
    %470 = vector.shape_cast %469 : vector<1x8x32xf32> to vector<8x32xf32>
    %471 = arith.truncf %470 : vector<8x32xf32> to vector<8x32xbf16>
    %c0_200 = arith.constant 0 : index
    %c0_201 = arith.constant 0 : index
    %472 = vector.load %arg54[%c0_200, %c0_201] : memref<32x32xbf16, #tpu.memory_space<vmem>>, vector<32x32xbf16>
    %cst_202 = arith.constant dense<0.000000e+00> : vector<8x32xf32>
    %473 = tpu.matmul %471, %472, %cst_202 {dimension_numbers = #tpu.dot_dimension_numbers<[1], [0], [0], [1], [0, 0, 1, 1], [], []>} : vector<8x32xbf16>, vector<32x32xbf16>, vector<8x32xf32> -> vector<8x32xf32>
    %474 = vector.broadcast %463 : vector<8x1xf32> to vector<8x32xf32>
    %475 = arith.mulf %474, %468 : vector<8x32xf32>
    %cst_203 = arith.constant 1.000000e+00 : f32
    %476 = vector.broadcast %cst_203 : f32 to vector<8x1xf32>
    %477 = arith.subf %476, %463 : vector<8x1xf32>
    %478 = vector.broadcast %477 : vector<8x1xf32> to vector<8x32xf32>
    %479 = arith.mulf %478, %473 : vector<8x32xf32>
    %480 = arith.addf %475, %479 : vector<8x32xf32>
    %cst_204 = arith.constant dense<0.000000e+00> : vector<1x8xf32>
    %481 = tpu.matmul %455, %454, %cst_204 {dimension_numbers = #tpu.dot_dimension_numbers<[1], [1], [0], [0], [0, 0, 1, 0], [], []>} : vector<1x128xf32>, vector<8x128xf32>, vector<1x8xf32> -> vector<1x8xf32>
    %cst_205 = arith.constant 0.000000e+00 : f32
    %482 = vector.broadcast %cst_205 : f32 to vector<1x8xf32>
    %483 = arith.cmpf ogt, %481, %482 : vector<1x8xf32>
    %484 = arith.extui %483 : vector<1x8xi1> to vector<1x8xi32>
    %485 = arith.sitofp %484 : vector<1x8xi32> to vector<1x8xf32>
    %486 = arith.mulf %485, %10 : vector<1x8xf32>
    %cst_206 = arith.constant 1.000000e+00 : f32
    %487 = vector.broadcast %cst_206 : f32 to vector<1x8xf32>
    %488 = arith.subf %487, %485 : vector<1x8xf32>
    %489 = arith.mulf %488, %12 : vector<1x8xf32>
    %490 = arith.addf %486, %489 : vector<1x8xf32>
    %491 = arith.truncf %480 : vector<8x32xf32> to vector<8x32xbf16>
    %c0_207 = arith.constant 0 : index
    %c0_208 = arith.constant 0 : index
    %492 = vector.load %arg40[%c0_207, %c0_208] : memref<32x32xbf16, #tpu.memory_space<vmem>>, vector<32x32xbf16>
    %c0_209 = arith.constant 0 : index
    %c0_210 = arith.constant 0 : index
    %493 = vector.load %arg41[%c0_209, %c0_210] : memref<1x32xf32, #tpu.memory_space<vmem>>, vector<1x32xf32>
    %c0_211 = arith.constant 0 : index
    %c0_212 = arith.constant 0 : index
    %494 = vector.load %arg42[%c0_211, %c0_212] : memref<32x32xbf16, #tpu.memory_space<vmem>>, vector<32x32xbf16>
    %c0_213 = arith.constant 0 : index
    %c0_214 = arith.constant 0 : index
    %495 = vector.load %arg43[%c0_213, %c0_214] : memref<1x32xf32, #tpu.memory_space<vmem>>, vector<1x32xf32>
    %c0_215 = arith.constant 0 : index
    %c0_216 = arith.constant 0 : index
    %496 = vector.load %arg44[%c0_215, %c0_216] : memref<32x32xbf16, #tpu.memory_space<vmem>>, vector<32x32xbf16>
    %c0_217 = arith.constant 0 : index
    %c0_218 = arith.constant 0 : index
    %497 = vector.load %arg45[%c0_217, %c0_218] : memref<1x32xf32, #tpu.memory_space<vmem>>, vector<1x32xf32>
    %c0_219 = arith.constant 0 : index
    %c0_220 = arith.constant 0 : index
    %498 = vector.load %arg46[%c0_219, %c0_220] : memref<32x32xbf16, #tpu.memory_space<vmem>>, vector<32x32xbf16>
    %c0_221 = arith.constant 0 : index
    %c0_222 = arith.constant 0 : index
    %499 = vector.load %arg47[%c0_221, %c0_222] : memref<1x32xf32, #tpu.memory_space<vmem>>, vector<1x32xf32>
    %cst_223 = arith.constant dense<0.000000e+00> : vector<8x32xf32>
    %500 = tpu.matmul %303, %492, %cst_223 {dimension_numbers = #tpu.dot_dimension_numbers<[1], [0], [0], [1], [0, 0, 1, 1], [], []>} : vector<8x32xbf16>, vector<32x32xbf16>, vector<8x32xf32> -> vector<8x32xf32>
    %501 = vector.broadcast %493 : vector<1x32xf32> to vector<8x32xf32>
    %502 = arith.addf %500, %501 : vector<8x32xf32>
    %503 = arith.truncf %502 : vector<8x32xf32> to vector<8x32xbf16>
    %cst_224 = arith.constant dense<0.000000e+00> : vector<8x32xf32>
    %504 = tpu.matmul %491, %494, %cst_224 {dimension_numbers = #tpu.dot_dimension_numbers<[1], [0], [0], [1], [0, 0, 1, 1], [], []>} : vector<8x32xbf16>, vector<32x32xbf16>, vector<8x32xf32> -> vector<8x32xf32>
    %505 = vector.broadcast %495 : vector<1x32xf32> to vector<8x32xf32>
    %506 = arith.addf %504, %505 : vector<8x32xf32>
    %507 = arith.truncf %506 : vector<8x32xf32> to vector<8x32xbf16>
    %cst_225 = arith.constant dense<0.000000e+00> : vector<8x32xf32>
    %508 = tpu.matmul %491, %496, %cst_225 {dimension_numbers = #tpu.dot_dimension_numbers<[1], [0], [0], [1], [0, 0, 1, 1], [], []>} : vector<8x32xbf16>, vector<32x32xbf16>, vector<8x32xf32> -> vector<8x32xf32>
    %509 = vector.broadcast %497 : vector<1x32xf32> to vector<8x32xf32>
    %510 = arith.addf %508, %509 : vector<8x32xf32>
    %511 = arith.truncf %510 : vector<8x32xf32> to vector<8x32xbf16>
    %512 = vector.extract_strided_slice %503 {offsets = [0, 0], sizes = [8, 8], strides = [1, 1]} : vector<8x32xbf16> to vector<8x8xbf16>
    %513 = vector.extract_strided_slice %507 {offsets = [0, 0], sizes = [8, 8], strides = [1, 1]} : vector<8x32xbf16> to vector<8x8xbf16>
    %cst_226 = arith.constant dense<0.000000e+00> : vector<8x8xf32>
    %514 = tpu.matmul %512, %513, %cst_226 {dimension_numbers = #tpu.dot_dimension_numbers<[1], [1], [0], [0], [0, 0, 1, 0], [], []>} : vector<8x8xbf16>, vector<8x8xbf16>, vector<8x8xf32> -> vector<8x8xf32>
    %cst_227 = arith.constant 0.000000e+00 : f32
    %515 = vector.broadcast %cst_227 : f32 to vector<1x8xf32>
    %516 = arith.cmpf one, %490, %515 : vector<1x8xf32>
    %cst_228 = arith.constant -1.000000e+30 : f32
    %517 = vector.shape_cast %516 : vector<1x8xi1> to vector<1x8xi1>
    %518 = vector.broadcast %517 : vector<1x8xi1> to vector<8x8xi1>
    %519 = vector.broadcast %cst_228 : f32 to vector<8x8xf32>
    %520 = arith.select %518, %519, %514 : vector<8x8xi1>, vector<8x8xf32>
    %cst_229 = arith.constant dense<0xFF800000> : vector<8xf32>
    %521 = vector.multi_reduction <maximumf>, %520, %cst_229 [1] : vector<8x8xf32> to vector<8xf32>
    %522 = vector.shape_cast %521 : vector<8xf32> to vector<8x1xf32>
    %523 = vector.broadcast %522 : vector<8x1xf32> to vector<8x8xf32>
    %524 = arith.subf %520, %523 : vector<8x8xf32>
    %525 = math.exp %524 : vector<8x8xf32>
    %cst_230 = arith.constant dense<0.000000e+00> : vector<8xf32>
    %526 = vector.multi_reduction <add>, %525, %cst_230 [1] : vector<8x8xf32> to vector<8xf32>
    %527 = vector.shape_cast %526 : vector<8xf32> to vector<8x1xf32>
    %528 = tpu.reciprocal %527 {approx = true} : vector<8x1xf32> -> vector<8x1xf32>
    %529 = vector.broadcast %528 : vector<8x1xf32> to vector<8x8xf32>
    %530 = arith.mulf %525, %529 : vector<8x8xf32>
    %531 = arith.truncf %530 : vector<8x8xf32> to vector<8x8xbf16>
    %532 = vector.extract_strided_slice %511 {offsets = [0, 0], sizes = [8, 8], strides = [1, 1]} : vector<8x32xbf16> to vector<8x8xbf16>
    %cst_231 = arith.constant dense<0.000000e+00> : vector<8x8xf32>
    %533 = tpu.matmul %531, %532, %cst_231 {dimension_numbers = #tpu.dot_dimension_numbers<[1], [0], [0], [1], [0, 0, 1, 1], [], []>} : vector<8x8xbf16>, vector<8x8xbf16>, vector<8x8xf32> -> vector<8x8xf32>
    %534 = arith.truncf %533 : vector<8x8xf32> to vector<8x8xbf16>
    %535 = vector.extract_strided_slice %503 {offsets = [0, 8], sizes = [8, 8], strides = [1, 1]} : vector<8x32xbf16> to vector<8x8xbf16>
    %536 = vector.extract_strided_slice %507 {offsets = [0, 8], sizes = [8, 8], strides = [1, 1]} : vector<8x32xbf16> to vector<8x8xbf16>
    %cst_232 = arith.constant dense<0.000000e+00> : vector<8x8xf32>
    %537 = tpu.matmul %535, %536, %cst_232 {dimension_numbers = #tpu.dot_dimension_numbers<[1], [1], [0], [0], [0, 0, 1, 0], [], []>} : vector<8x8xbf16>, vector<8x8xbf16>, vector<8x8xf32> -> vector<8x8xf32>
    %cst_233 = arith.constant 0.000000e+00 : f32
    %538 = vector.broadcast %cst_233 : f32 to vector<1x8xf32>
    %539 = arith.cmpf one, %490, %538 : vector<1x8xf32>
    %cst_234 = arith.constant -1.000000e+30 : f32
    %540 = vector.shape_cast %539 : vector<1x8xi1> to vector<1x8xi1>
    %541 = vector.broadcast %540 : vector<1x8xi1> to vector<8x8xi1>
    %542 = vector.broadcast %cst_234 : f32 to vector<8x8xf32>
    %543 = arith.select %541, %542, %537 : vector<8x8xi1>, vector<8x8xf32>
    %cst_235 = arith.constant dense<0xFF800000> : vector<8xf32>
    %544 = vector.multi_reduction <maximumf>, %543, %cst_235 [1] : vector<8x8xf32> to vector<8xf32>
    %545 = vector.shape_cast %544 : vector<8xf32> to vector<8x1xf32>
    %546 = vector.broadcast %545 : vector<8x1xf32> to vector<8x8xf32>
    %547 = arith.subf %543, %546 : vector<8x8xf32>
    %548 = math.exp %547 : vector<8x8xf32>
    %cst_236 = arith.constant dense<0.000000e+00> : vector<8xf32>
    %549 = vector.multi_reduction <add>, %548, %cst_236 [1] : vector<8x8xf32> to vector<8xf32>
    %550 = vector.shape_cast %549 : vector<8xf32> to vector<8x1xf32>
    %551 = tpu.reciprocal %550 {approx = true} : vector<8x1xf32> -> vector<8x1xf32>
    %552 = vector.broadcast %551 : vector<8x1xf32> to vector<8x8xf32>
    %553 = arith.mulf %548, %552 : vector<8x8xf32>
    %554 = arith.truncf %553 : vector<8x8xf32> to vector<8x8xbf16>
    %555 = vector.extract_strided_slice %511 {offsets = [0, 8], sizes = [8, 8], strides = [1, 1]} : vector<8x32xbf16> to vector<8x8xbf16>
    %cst_237 = arith.constant dense<0.000000e+00> : vector<8x8xf32>
    %556 = tpu.matmul %554, %555, %cst_237 {dimension_numbers = #tpu.dot_dimension_numbers<[1], [0], [0], [1], [0, 0, 1, 1], [], []>} : vector<8x8xbf16>, vector<8x8xbf16>, vector<8x8xf32> -> vector<8x8xf32>
    %557 = arith.truncf %556 : vector<8x8xf32> to vector<8x8xbf16>
    %558 = vector.extract_strided_slice %503 {offsets = [0, 16], sizes = [8, 8], strides = [1, 1]} : vector<8x32xbf16> to vector<8x8xbf16>
    %559 = vector.extract_strided_slice %507 {offsets = [0, 16], sizes = [8, 8], strides = [1, 1]} : vector<8x32xbf16> to vector<8x8xbf16>
    %cst_238 = arith.constant dense<0.000000e+00> : vector<8x8xf32>
    %560 = tpu.matmul %558, %559, %cst_238 {dimension_numbers = #tpu.dot_dimension_numbers<[1], [1], [0], [0], [0, 0, 1, 0], [], []>} : vector<8x8xbf16>, vector<8x8xbf16>, vector<8x8xf32> -> vector<8x8xf32>
    %cst_239 = arith.constant 0.000000e+00 : f32
    %561 = vector.broadcast %cst_239 : f32 to vector<1x8xf32>
    %562 = arith.cmpf one, %490, %561 : vector<1x8xf32>
    %cst_240 = arith.constant -1.000000e+30 : f32
    %563 = vector.shape_cast %562 : vector<1x8xi1> to vector<1x8xi1>
    %564 = vector.broadcast %563 : vector<1x8xi1> to vector<8x8xi1>
    %565 = vector.broadcast %cst_240 : f32 to vector<8x8xf32>
    %566 = arith.select %564, %565, %560 : vector<8x8xi1>, vector<8x8xf32>
    %cst_241 = arith.constant dense<0xFF800000> : vector<8xf32>
    %567 = vector.multi_reduction <maximumf>, %566, %cst_241 [1] : vector<8x8xf32> to vector<8xf32>
    %568 = vector.shape_cast %567 : vector<8xf32> to vector<8x1xf32>
    %569 = vector.broadcast %568 : vector<8x1xf32> to vector<8x8xf32>
    %570 = arith.subf %566, %569 : vector<8x8xf32>
    %571 = math.exp %570 : vector<8x8xf32>
    %cst_242 = arith.constant dense<0.000000e+00> : vector<8xf32>
    %572 = vector.multi_reduction <add>, %571, %cst_242 [1] : vector<8x8xf32> to vector<8xf32>
    %573 = vector.shape_cast %572 : vector<8xf32> to vector<8x1xf32>
    %574 = tpu.reciprocal %573 {approx = true} : vector<8x1xf32> -> vector<8x1xf32>
    %575 = vector.broadcast %574 : vector<8x1xf32> to vector<8x8xf32>
    %576 = arith.mulf %571, %575 : vector<8x8xf32>
    %577 = arith.truncf %576 : vector<8x8xf32> to vector<8x8xbf16>
    %578 = vector.extract_strided_slice %511 {offsets = [0, 16], sizes = [8, 8], strides = [1, 1]} : vector<8x32xbf16> to vector<8x8xbf16>
    %cst_243 = arith.constant dense<0.000000e+00> : vector<8x8xf32>
    %579 = tpu.matmul %577, %578, %cst_243 {dimension_numbers = #tpu.dot_dimension_numbers<[1], [0], [0], [1], [0, 0, 1, 1], [], []>} : vector<8x8xbf16>, vector<8x8xbf16>, vector<8x8xf32> -> vector<8x8xf32>
    %580 = arith.truncf %579 : vector<8x8xf32> to vector<8x8xbf16>
    %581 = vector.extract_strided_slice %503 {offsets = [0, 24], sizes = [8, 8], strides = [1, 1]} : vector<8x32xbf16> to vector<8x8xbf16>
    %582 = vector.extract_strided_slice %507 {offsets = [0, 24], sizes = [8, 8], strides = [1, 1]} : vector<8x32xbf16> to vector<8x8xbf16>
    %cst_244 = arith.constant dense<0.000000e+00> : vector<8x8xf32>
    %583 = tpu.matmul %581, %582, %cst_244 {dimension_numbers = #tpu.dot_dimension_numbers<[1], [1], [0], [0], [0, 0, 1, 0], [], []>} : vector<8x8xbf16>, vector<8x8xbf16>, vector<8x8xf32> -> vector<8x8xf32>
    %cst_245 = arith.constant 0.000000e+00 : f32
    %584 = vector.broadcast %cst_245 : f32 to vector<1x8xf32>
    %585 = arith.cmpf one, %490, %584 : vector<1x8xf32>
    %cst_246 = arith.constant -1.000000e+30 : f32
    %586 = vector.shape_cast %585 : vector<1x8xi1> to vector<1x8xi1>
    %587 = vector.broadcast %586 : vector<1x8xi1> to vector<8x8xi1>
    %588 = vector.broadcast %cst_246 : f32 to vector<8x8xf32>
    %589 = arith.select %587, %588, %583 : vector<8x8xi1>, vector<8x8xf32>
    %cst_247 = arith.constant dense<0xFF800000> : vector<8xf32>
    %590 = vector.multi_reduction <maximumf>, %589, %cst_247 [1] : vector<8x8xf32> to vector<8xf32>
    %591 = vector.shape_cast %590 : vector<8xf32> to vector<8x1xf32>
    %592 = vector.broadcast %591 : vector<8x1xf32> to vector<8x8xf32>
    %593 = arith.subf %589, %592 : vector<8x8xf32>
    %594 = math.exp %593 : vector<8x8xf32>
    %cst_248 = arith.constant dense<0.000000e+00> : vector<8xf32>
    %595 = vector.multi_reduction <add>, %594, %cst_248 [1] : vector<8x8xf32> to vector<8xf32>
    %596 = vector.shape_cast %595 : vector<8xf32> to vector<8x1xf32>
    %597 = tpu.reciprocal %596 {approx = true} : vector<8x1xf32> -> vector<8x1xf32>
    %598 = vector.broadcast %597 : vector<8x1xf32> to vector<8x8xf32>
    %599 = arith.mulf %594, %598 : vector<8x8xf32>
    %600 = arith.truncf %599 : vector<8x8xf32> to vector<8x8xbf16>
    %601 = vector.extract_strided_slice %511 {offsets = [0, 24], sizes = [8, 8], strides = [1, 1]} : vector<8x32xbf16> to vector<8x8xbf16>
    %cst_249 = arith.constant dense<0.000000e+00> : vector<8x8xf32>
    %602 = tpu.matmul %600, %601, %cst_249 {dimension_numbers = #tpu.dot_dimension_numbers<[1], [0], [0], [1], [0, 0, 1, 1], [], []>} : vector<8x8xbf16>, vector<8x8xbf16>, vector<8x8xf32> -> vector<8x8xf32>
    %603 = arith.truncf %602 : vector<8x8xf32> to vector<8x8xbf16>
    %604 = tpu.concatenate %534, %557, %580, %603 in 1 : vector<8x8xbf16>, vector<8x8xbf16>, vector<8x8xbf16>, vector<8x8xbf16> -> vector<8x32xbf16>
    %cst_250 = arith.constant dense<0.000000e+00> : vector<8x32xf32>
    %605 = tpu.matmul %604, %498, %cst_250 {dimension_numbers = #tpu.dot_dimension_numbers<[1], [0], [0], [1], [0, 0, 1, 1], [], []>} : vector<8x32xbf16>, vector<32x32xbf16>, vector<8x32xf32> -> vector<8x32xf32>
    %606 = vector.broadcast %499 : vector<1x32xf32> to vector<8x32xf32>
    %607 = arith.addf %605, %606 : vector<8x32xf32>
    %608 = arith.addf %302, %607 : vector<8x32xf32>
    %c0_251 = arith.constant 0 : index
    %c0_252 = arith.constant 0 : index
    %609 = vector.load %arg48[%c0_251, %c0_252] : memref<1x32xf32, #tpu.memory_space<vmem>>, vector<1x32xf32>
    %c0_253 = arith.constant 0 : index
    %c0_254 = arith.constant 0 : index
    %610 = vector.load %arg49[%c0_253, %c0_254] : memref<1x32xf32, #tpu.memory_space<vmem>>, vector<1x32xf32>
    %cst_255 = arith.constant dense<0.000000e+00> : vector<8xf32>
    %611 = vector.multi_reduction <add>, %608, %cst_255 [1] : vector<8x32xf32> to vector<8xf32>
    %612 = vector.shape_cast %611 : vector<8xf32> to vector<8x1xf32>
    %cst_256 = arith.constant 3.200000e+01 : f32
    %613 = vector.broadcast %cst_256 : f32 to vector<8x1xf32>
    %614 = arith.divf %612, %613 : vector<8x1xf32>
    %615 = vector.broadcast %614 : vector<8x1xf32> to vector<8x32xf32>
    %616 = arith.subf %608, %615 : vector<8x32xf32>
    %617 = arith.mulf %616, %616 : vector<8x32xf32>
    %cst_257 = arith.constant dense<0.000000e+00> : vector<8xf32>
    %618 = vector.multi_reduction <add>, %617, %cst_257 [1] : vector<8x32xf32> to vector<8xf32>
    %619 = vector.shape_cast %618 : vector<8xf32> to vector<8x1xf32>
    %cst_258 = arith.constant 3.200000e+01 : f32
    %620 = vector.broadcast %cst_258 : f32 to vector<8x1xf32>
    %621 = arith.divf %619, %620 : vector<8x1xf32>
    %622 = vector.broadcast %614 : vector<8x1xf32> to vector<8x32xf32>
    %623 = arith.subf %608, %622 : vector<8x32xf32>
    %cst_259 = arith.constant 9.99999974E-6 : f32
    %624 = vector.broadcast %cst_259 : f32 to vector<8x1xf32>
    %625 = arith.addf %621, %624 : vector<8x1xf32>
    %626 = math.rsqrt %625 : vector<8x1xf32>
    %627 = vector.broadcast %626 : vector<8x1xf32> to vector<8x32xf32>
    %628 = arith.mulf %623, %627 : vector<8x32xf32>
    %629 = vector.broadcast %609 : vector<1x32xf32> to vector<8x32xf32>
    %630 = arith.mulf %628, %629 : vector<8x32xf32>
    %631 = vector.broadcast %610 : vector<1x32xf32> to vector<8x32xf32>
    %632 = arith.addf %630, %631 : vector<8x32xf32>
    %633 = arith.truncf %632 : vector<8x32xf32> to vector<8x32xbf16>
    %c0_260 = arith.constant 0 : index
    %c0_261 = arith.constant 0 : index
    %634 = vector.load %arg55[%c0_260, %c0_261] : memref<32x64xbf16, #tpu.memory_space<vmem>>, vector<32x64xbf16>
    %cst_262 = arith.constant dense<0.000000e+00> : vector<8x64xf32>
    %635 = tpu.matmul %633, %634, %cst_262 {dimension_numbers = #tpu.dot_dimension_numbers<[1], [0], [0], [1], [0, 0, 1, 1], [], []>} : vector<8x32xbf16>, vector<32x64xbf16>, vector<8x64xf32> -> vector<8x64xf32>
    %c0_263 = arith.constant 0 : index
    %c0_264 = arith.constant 0 : index
    %636 = vector.load %arg56[%c0_263, %c0_264] : memref<1x64xf32, #tpu.memory_space<vmem>>, vector<1x64xf32>
    %637 = vector.broadcast %636 : vector<1x64xf32> to vector<8x64xf32>
    %638 = arith.addf %635, %637 : vector<8x64xf32>
    %cst_265 = arith.constant 0.000000e+00 : f32
    %639 = vector.broadcast %cst_265 : f32 to vector<8x64xf32>
    %640 = arith.maximumf %638, %639 : vector<8x64xf32>
    %641 = arith.truncf %640 : vector<8x64xf32> to vector<8x64xbf16>
    %c0_266 = arith.constant 0 : index
    %c0_267 = arith.constant 0 : index
    %642 = vector.load %arg57[%c0_266, %c0_267] : memref<64x32xbf16, #tpu.memory_space<vmem>>, vector<64x32xbf16>
    %cst_268 = arith.constant dense<0.000000e+00> : vector<8x32xf32>
    %643 = tpu.matmul %641, %642, %cst_268 {dimension_numbers = #tpu.dot_dimension_numbers<[1], [0], [0], [1], [0, 0, 1, 1], [], []>} : vector<8x64xbf16>, vector<64x32xbf16>, vector<8x32xf32> -> vector<8x32xf32>
    %c0_269 = arith.constant 0 : index
    %c0_270 = arith.constant 0 : index
    %644 = vector.load %arg58[%c0_269, %c0_270] : memref<1x32xf32, #tpu.memory_space<vmem>>, vector<1x32xf32>
    %645 = vector.broadcast %644 : vector<1x32xf32> to vector<8x32xf32>
    %646 = arith.addf %643, %645 : vector<8x32xf32>
    %647 = arith.addf %632, %646 : vector<8x32xf32>
    %c0_271 = arith.constant 0 : index
    %c0_272 = arith.constant 0 : index
    %648 = vector.load %arg59[%c0_271, %c0_272] : memref<1x32xf32, #tpu.memory_space<vmem>>, vector<1x32xf32>
    %c0_273 = arith.constant 0 : index
    %c0_274 = arith.constant 0 : index
    %649 = vector.load %arg60[%c0_273, %c0_274] : memref<1x32xf32, #tpu.memory_space<vmem>>, vector<1x32xf32>
    %cst_275 = arith.constant dense<0.000000e+00> : vector<8xf32>
    %650 = vector.multi_reduction <add>, %647, %cst_275 [1] : vector<8x32xf32> to vector<8xf32>
    %651 = vector.shape_cast %650 : vector<8xf32> to vector<8x1xf32>
    %cst_276 = arith.constant 3.200000e+01 : f32
    %652 = vector.broadcast %cst_276 : f32 to vector<8x1xf32>
    %653 = arith.divf %651, %652 : vector<8x1xf32>
    %654 = vector.broadcast %653 : vector<8x1xf32> to vector<8x32xf32>
    %655 = arith.subf %647, %654 : vector<8x32xf32>
    %656 = arith.mulf %655, %655 : vector<8x32xf32>
    %cst_277 = arith.constant dense<0.000000e+00> : vector<8xf32>
    %657 = vector.multi_reduction <add>, %656, %cst_277 [1] : vector<8x32xf32> to vector<8xf32>
    %658 = vector.shape_cast %657 : vector<8xf32> to vector<8x1xf32>
    %cst_278 = arith.constant 3.200000e+01 : f32
    %659 = vector.broadcast %cst_278 : f32 to vector<8x1xf32>
    %660 = arith.divf %658, %659 : vector<8x1xf32>
    %661 = vector.broadcast %653 : vector<8x1xf32> to vector<8x32xf32>
    %662 = arith.subf %647, %661 : vector<8x32xf32>
    %cst_279 = arith.constant 9.99999974E-6 : f32
    %663 = vector.broadcast %cst_279 : f32 to vector<8x1xf32>
    %664 = arith.addf %660, %663 : vector<8x1xf32>
    %665 = math.rsqrt %664 : vector<8x1xf32>
    %666 = vector.broadcast %665 : vector<8x1xf32> to vector<8x32xf32>
    %667 = arith.mulf %662, %666 : vector<8x32xf32>
    %668 = vector.broadcast %648 : vector<1x32xf32> to vector<8x32xf32>
    %669 = arith.mulf %667, %668 : vector<8x32xf32>
    %670 = vector.broadcast %649 : vector<1x32xf32> to vector<8x32xf32>
    %671 = arith.addf %669, %670 : vector<8x32xf32>
    %672 = vector.shape_cast %671 : vector<8x32xf32> to vector<1x8x32xf32>
    %c0_280 = arith.constant 0 : index
    %c0_281 = arith.constant 0 : index
    %c0_282 = arith.constant 0 : index
    %673 = vector.load %arg61[%c0_280, %c0_281, %c0_282] : memref<1x8x32xf32, #tpu.memory_space<vmem>>, vector<1x8x32xf32>
    tpu.vector_store %arg61[%c0_280, %c0_281, %c0_282], %672 {strides = array<i32>} : memref<1x8x32xf32, #tpu.memory_space<vmem>>, vector<1x8x32xf32>,
    return
  }
  func.func @transform_0(%arg0: i32) -> (i32, i32, i32) {
    %c0_i32 = arith.constant 0 : i32
    %c0_i32_0 = arith.constant 0 : i32
    %c0_i32_1 = arith.constant 0 : i32
    return %arg0, %c0_i32, %c0_i32_0 : i32, i32, i32
  }
  func.func @transform_1(%arg0: i32) -> (i32, i32, i32) {
    %c0_i32 = arith.constant 0 : i32
    %c0_i32_0 = arith.constant 0 : i32
    %c0_i32_1 = arith.constant 0 : i32
    return %arg0, %c0_i32, %c0_i32_0 : i32, i32, i32
  }
  func.func @transform_2(%arg0: i32) -> (i32, i32, i32) {
    %c0_i32 = arith.constant 0 : i32
    %c0_i32_0 = arith.constant 0 : i32
    %c0_i32_1 = arith.constant 0 : i32
    return %arg0, %c0_i32, %c0_i32_0 : i32, i32, i32
  }
  func.func @transform_3(%arg0: i32) -> (i32, i32, i32) {
    %c0_i32 = arith.constant 0 : i32
    %c0_i32_0 = arith.constant 0 : i32
    %c0_i32_1 = arith.constant 0 : i32
    return %arg0, %c0_i32, %c0_i32_0 : i32, i32, i32
  }
  func.func @transform_4(%arg0: i32) -> (i32, i32, i32) {
    %c0_i32 = arith.constant 0 : i32
    %c0_i32_0 = arith.constant 0 : i32
    %c0_i32_1 = arith.constant 0 : i32
    return %arg0, %c0_i32, %c0_i32_0 : i32, i32, i32
  }
  func.func @transform_5(%arg0: i32) -> (i32, i32, i32) {
    %c0_i32 = arith.constant 0 : i32
    %c0_i32_0 = arith.constant 0 : i32
    %c0_i32_1 = arith.constant 0 : i32
    return %arg0, %c0_i32, %c0_i32_0 : i32, i32, i32
  }
  func.func @transform_6(%arg0: i32) -> (i32, i32, i32) {
    %c0_i32 = arith.constant 0 : i32
    %c0_i32_0 = arith.constant 0 : i32
    %c0_i32_1 = arith.constant 0 : i32
    return %arg0, %c0_i32, %c0_i32_0 : i32, i32, i32
  }
  func.func @transform_7(%arg0: i32) -> (i32, i32, i32) {
    %c0_i32 = arith.constant 0 : i32
    %c0_i32_0 = arith.constant 0 : i32
    %c0_i32_1 = arith.constant 0 : i32
    return %arg0, %c0_i32, %c0_i32_0 : i32, i32, i32
  }
  func.func @transform_8(%arg0: i32) -> (i32, i32) {
    %c0_i32 = arith.constant 0 : i32
    %c0_i32_0 = arith.constant 0 : i32
    %c0_i32_1 = arith.constant 0 : i32
    return %c0_i32, %c0_i32_0 : i32, i32
  }
  func.func @transform_9(%arg0: i32) -> (i32, i32) {
    %c0_i32 = arith.constant 0 : i32
    %c0_i32_0 = arith.constant 0 : i32
    %c0_i32_1 = arith.constant 0 : i32
    return %c0_i32, %c0_i32_0 : i32, i32
  }
  func.func @transform_10(%arg0: i32) -> (i32, i32) {
    %c0_i32 = arith.constant 0 : i32
    %c0_i32_0 = arith.constant 0 : i32
    %c0_i32_1 = arith.constant 0 : i32
    return %c0_i32, %c0_i32_0 : i32, i32
  }
  func.func @transform_11(%arg0: i32) -> (i32, i32) {
    %c0_i32 = arith.constant 0 : i32
    %c0_i32_0 = arith.constant 0 : i32
    %c0_i32_1 = arith.constant 0 : i32
    return %c0_i32, %c0_i32_0 : i32, i32
  }
  func.func @transform_12(%arg0: i32) -> (i32, i32) {
    %c0_i32 = arith.constant 0 : i32
    %c0_i32_0 = arith.constant 0 : i32
    %c0_i32_1 = arith.constant 0 : i32
    return %c0_i32, %c0_i32_0 : i32, i32
  }
  func.func @transform_13(%arg0: i32) -> (i32, i32) {
    %c0_i32 = arith.constant 0 : i32
    %c0_i32_0 = arith.constant 0 : i32
    %c0_i32_1 = arith.constant 0 : i32
    return %c0_i32, %c0_i32_0 : i32, i32
  }
  func.func @transform_14(%arg0: i32) -> (i32, i32) {
    %c0_i32 = arith.constant 0 : i32
    %c0_i32_0 = arith.constant 0 : i32
    %c0_i32_1 = arith.constant 0 : i32
    return %c0_i32, %c0_i32_0 : i32, i32
  }
  func.func @transform_15(%arg0: i32) -> (i32, i32) {
    %c0_i32 = arith.constant 0 : i32
    %c0_i32_0 = arith.constant 0 : i32
    %c0_i32_1 = arith.constant 0 : i32
    return %c0_i32, %c0_i32_0 : i32, i32
  }
  func.func @transform_16(%arg0: i32) -> (i32, i32) {
    %c0_i32 = arith.constant 0 : i32
    %c0_i32_0 = arith.constant 0 : i32
    %c0_i32_1 = arith.constant 0 : i32
    return %c0_i32, %c0_i32_0 : i32, i32
  }
  func.func @transform_17(%arg0: i32) -> (i32, i32) {
    %c0_i32 = arith.constant 0 : i32
    %c0_i32_0 = arith.constant 0 : i32
    %c0_i32_1 = arith.constant 0 : i32
    return %c0_i32, %c0_i32_0 : i32, i32
  }
  func.func @transform_18(%arg0: i32) -> (i32, i32) {
    %c0_i32 = arith.constant 0 : i32
    %c0_i32_0 = arith.constant 0 : i32
    %c0_i32_1 = arith.constant 0 : i32
    return %c0_i32, %c0_i32_0 : i32, i32
  }
  func.func @transform_19(%arg0: i32) -> (i32, i32) {
    %c0_i32 = arith.constant 0 : i32
    %c0_i32_0 = arith.constant 0 : i32
    %c0_i32_1 = arith.constant 0 : i32
    return %c0_i32, %c0_i32_0 : i32, i32
  }
  func.func @transform_20(%arg0: i32) -> (i32, i32) {
    %c0_i32 = arith.constant 0 : i32
    %c0_i32_0 = arith.constant 0 : i32
    %c0_i32_1 = arith.constant 0 : i32
    return %c0_i32, %c0_i32_0 : i32, i32
  }
  func.func @transform_21(%arg0: i32) -> (i32, i32) {
    %c0_i32 = arith.constant 0 : i32
    %c0_i32_0 = arith.constant 0 : i32
    %c0_i32_1 = arith.constant 0 : i32
    return %c0_i32, %c0_i32_0 : i32, i32
  }
  func.func @transform_22(%arg0: i32) -> (i32, i32) {
    %c0_i32 = arith.constant 0 : i32
    %c0_i32_0 = arith.constant 0 : i32
    %c0_i32_1 = arith.constant 0 : i32
    return %c0_i32, %c0_i32_0 : i32, i32
  }
  func.func @transform_23(%arg0: i32) -> (i32, i32) {
    %c0_i32 = arith.constant 0 : i32
    %c0_i32_0 = arith.constant 0 : i32
    %c0_i32_1 = arith.constant 0 : i32
    return %c0_i32, %c0_i32_0 : i32, i32
  }
  func.func @transform_24(%arg0: i32) -> (i32, i32) {
    %c0_i32 = arith.constant 0 : i32
    %c0_i32_0 = arith.constant 0 : i32
    %c0_i32_1 = arith.constant 0 : i32
    return %c0_i32, %c0_i32_0 : i32, i32
  }
  func.func @transform_25(%arg0: i32) -> (i32, i32) {
    %c0_i32 = arith.constant 0 : i32
    %c0_i32_0 = arith.constant 0 : i32
    %c0_i32_1 = arith.constant 0 : i32
    return %c0_i32, %c0_i32_0 : i32, i32
  }
  func.func @transform_26(%arg0: i32) -> (i32, i32) {
    %c0_i32 = arith.constant 0 : i32
    %c0_i32_0 = arith.constant 0 : i32
    %c0_i32_1 = arith.constant 0 : i32
    return %c0_i32, %c0_i32_0 : i32, i32
  }
  func.func @transform_27(%arg0: i32) -> (i32, i32) {
    %c0_i32 = arith.constant 0 : i32
    %c0_i32_0 = arith.constant 0 : i32
    %c0_i32_1 = arith.constant 0 : i32
    return %c0_i32, %c0_i32_0 : i32, i32
  }
  func.func @transform_28(%arg0: i32) -> (i32, i32) {
    %c0_i32 = arith.constant 0 : i32
    %c0_i32_0 = arith.constant 0 : i32
    %c0_i32_1 = arith.constant 0 : i32
    return %c0_i32, %c0_i32_0 : i32, i32
  }
  func.func @transform_29(%arg0: i32) -> (i32, i32) {
    %c0_i32 = arith.constant 0 : i32
    %c0_i32_0 = arith.constant 0 : i32
    %c0_i32_1 = arith.constant 0 : i32
    return %c0_i32, %c0_i32_0 : i32, i32
  }
  func.func @transform_30(%arg0: i32) -> (i32, i32) {
    %c0_i32 = arith.constant 0 : i32
    %c0_i32_0 = arith.constant 0 : i32
    %c0_i32_1 = arith.constant 0 : i32
    return %c0_i32, %c0_i32_0 : i32, i32
  }
  func.func @transform_31(%arg0: i32) -> (i32, i32) {
    %c0_i32 = arith.constant 0 : i32
    %c0_i32_0 = arith.constant 0 : i32
    %c0_i32_1 = arith.constant 0 : i32
    return %c0_i32, %c0_i32_0 : i32, i32
  }
  func.func @transform_32(%arg0: i32) -> (i32, i32) {
    %c0_i32 = arith.constant 0 : i32
    %c0_i32_0 = arith.constant 0 : i32
    %c0_i32_1 = arith.constant 0 : i32
    return %c0_i32, %c0_i32_0 : i32, i32
  }
  func.func @transform_33(%arg0: i32) -> (i32, i32) {
    %c0_i32 = arith.constant 0 : i32
    %c0_i32_0 = arith.constant 0 : i32
    %c0_i32_1 = arith.constant 0 : i32
    return %c0_i32, %c0_i32_0 : i32, i32
  }
  func.func @transform_34(%arg0: i32) -> (i32, i32) {
    %c0_i32 = arith.constant 0 : i32
    %c0_i32_0 = arith.constant 0 : i32
    %c0_i32_1 = arith.constant 0 : i32
    return %c0_i32, %c0_i32_0 : i32, i32
  }
  func.func @transform_35(%arg0: i32) -> (i32, i32) {
    %c0_i32 = arith.constant 0 : i32
    %c0_i32_0 = arith.constant 0 : i32
    %c0_i32_1 = arith.constant 0 : i32
    return %c0_i32, %c0_i32_0 : i32, i32
  }
  func.func @transform_36(%arg0: i32) -> (i32, i32) {
    %c0_i32 = arith.constant 0 : i32
    %c0_i32_0 = arith.constant 0 : i32
    %c0_i32_1 = arith.constant 0 : i32
    return %c0_i32, %c0_i32_0 : i32, i32
  }
  func.func @transform_37(%arg0: i32) -> (i32, i32) {
    %c0_i32 = arith.constant 0 : i32
    %c0_i32_0 = arith.constant 0 : i32
    %c0_i32_1 = arith.constant 0 : i32
    return %c0_i32, %c0_i32_0 : i32, i32
  }
  func.func @transform_38(%arg0: i32) -> (i32, i32) {
    %c0_i32 = arith.constant 0 : i32
    %c0_i32_0 = arith.constant 0 : i32
    %c0_i32_1 = arith.constant 0 : i32
    return %c0_i32, %c0_i32_0 : i32, i32
  }
  func.func @transform_39(%arg0: i32) -> (i32, i32) {
    %c0_i32 = arith.constant 0 : i32
    %c0_i32_0 = arith.constant 0 : i32
    %c0_i32_1 = arith.constant 0 : i32
    return %c0_i32, %c0_i32_0 : i32, i32
  }
  func.func @transform_40(%arg0: i32) -> (i32, i32) {
    %c0_i32 = arith.constant 0 : i32
    %c0_i32_0 = arith.constant 0 : i32
    %c0_i32_1 = arith.constant 0 : i32
    return %c0_i32, %c0_i32_0 : i32, i32
  }
  func.func @transform_41(%arg0: i32) -> (i32, i32) {
    %c0_i32 = arith.constant 0 : i32
    %c0_i32_0 = arith.constant 0 : i32
    %c0_i32_1 = arith.constant 0 : i32
    return %c0_i32, %c0_i32_0 : i32, i32
  }
  func.func @transform_42(%arg0: i32) -> (i32, i32) {
    %c0_i32 = arith.constant 0 : i32
    %c0_i32_0 = arith.constant 0 : i32
    %c0_i32_1 = arith.constant 0 : i32
    return %c0_i32, %c0_i32_0 : i32, i32
  }
  func.func @transform_43(%arg0: i32) -> (i32, i32) {
    %c0_i32 = arith.constant 0 : i32
    %c0_i32_0 = arith.constant 0 : i32
    %c0_i32_1 = arith.constant 0 : i32
    return %c0_i32, %c0_i32_0 : i32, i32
  }
  func.func @transform_44(%arg0: i32) -> (i32, i32) {
    %c0_i32 = arith.constant 0 : i32
    %c0_i32_0 = arith.constant 0 : i32
    %c0_i32_1 = arith.constant 0 : i32
    return %c0_i32, %c0_i32_0 : i32, i32
  }
  func.func @transform_45(%arg0: i32) -> (i32, i32) {
    %c0_i32 = arith.constant 0 : i32
    %c0_i32_0 = arith.constant 0 : i32
    %c0_i32_1 = arith.constant 0 : i32
    return %c0_i32, %c0_i32_0 : i32, i32
  }
  func.func @transform_46(%arg0: i32) -> (i32, i32) {
    %c0_i32 = arith.constant 0 : i32
    %c0_i32_0 = arith.constant 0 : i32
    %c0_i32_1 = arith.constant 0 : i32
    return %c0_i32, %c0_i32_0 : i32, i32
  }
  func.func @transform_47(%arg0: i32) -> (i32, i32) {
    %c0_i32 = arith.constant 0 : i32
    %c0_i32_0 = arith.constant 0 : i32
    %c0_i32_1 = arith.constant 0 : i32
    return %c0_i32, %c0_i32_0 : i32, i32
  }
  func.func @transform_48(%arg0: i32) -> (i32, i32) {
    %c0_i32 = arith.constant 0 : i32
    %c0_i32_0 = arith.constant 0 : i32
    %c0_i32_1 = arith.constant 0 : i32
    return %c0_i32, %c0_i32_0 : i32, i32
  }
  func.func @transform_49(%arg0: i32) -> (i32, i32) {
    %c0_i32 = arith.constant 0 : i32
    %c0_i32_0 = arith.constant 0 : i32
    %c0_i32_1 = arith.constant 0 : i32
    return %c0_i32, %c0_i32_0 : i32, i32
  }
  func.func @transform_50(%arg0: i32) -> (i32, i32) {
    %c0_i32 = arith.constant 0 : i32
    %c0_i32_0 = arith.constant 0 : i32
    %c0_i32_1 = arith.constant 0 : i32
    return %c0_i32, %c0_i32_0 : i32, i32
  }
  func.func @transform_51(%arg0: i32) -> (i32, i32) {
    %c0_i32 = arith.constant 0 : i32
    %c0_i32_0 = arith.constant 0 : i32
    %c0_i32_1 = arith.constant 0 : i32
    return %c0_i32, %c0_i32_0 : i32, i32
  }
  func.func @transform_52(%arg0: i32) -> (i32, i32) {
    %c0_i32 = arith.constant 0 : i32
    %c0_i32_0 = arith.constant 0 : i32
    %c0_i32_1 = arith.constant 0 : i32
    return %c0_i32, %c0_i32_0 : i32, i32
  }
  func.func @transform_53(%arg0: i32) -> (i32, i32) {
    %c0_i32 = arith.constant 0 : i32
    %c0_i32_0 = arith.constant 0 : i32
    %c0_i32_1 = arith.constant 0 : i32
    return %c0_i32, %c0_i32_0 : i32, i32
  }
  func.func @transform_54(%arg0: i32) -> (i32, i32) {
    %c0_i32 = arith.constant 0 : i32
    %c0_i32_0 = arith.constant 0 : i32
    %c0_i32_1 = arith.constant 0 : i32
    return %c0_i32, %c0_i32_0 : i32, i32
  }
  func.func @transform_55(%arg0: i32) -> (i32, i32) {
    %c0_i32 = arith.constant 0 : i32
    %c0_i32_0 = arith.constant 0 : i32
    %c0_i32_1 = arith.constant 0 : i32
    return %c0_i32, %c0_i32_0 : i32, i32
  }
  func.func @transform_56(%arg0: i32) -> (i32, i32) {
    %c0_i32 = arith.constant 0 : i32
    %c0_i32_0 = arith.constant 0 : i32
    %c0_i32_1 = arith.constant 0 : i32
    return %c0_i32, %c0_i32_0 : i32, i32
  }
  func.func @transform_57(%arg0: i32) -> (i32, i32) {
    %c0_i32 = arith.constant 0 : i32
    %c0_i32_0 = arith.constant 0 : i32
    %c0_i32_1 = arith.constant 0 : i32
    return %c0_i32, %c0_i32_0 : i32, i32
  }
  func.func @transform_58(%arg0: i32) -> (i32, i32) {
    %c0_i32 = arith.constant 0 : i32
    %c0_i32_0 = arith.constant 0 : i32
    %c0_i32_1 = arith.constant 0 : i32
    return %c0_i32, %c0_i32_0 : i32, i32
  }
  func.func @transform_59(%arg0: i32) -> (i32, i32) {
    %c0_i32 = arith.constant 0 : i32
    %c0_i32_0 = arith.constant 0 : i32
    %c0_i32_1 = arith.constant 0 : i32
    return %c0_i32, %c0_i32_0 : i32, i32
  }
  func.func @transform_60(%arg0: i32) -> (i32, i32, i32) {
    %c0_i32 = arith.constant 0 : i32
    %c0_i32_0 = arith.constant 0 : i32
    %c0_i32_1 = arith.constant 0 : i32
    return %arg0, %c0_i32, %c0_i32_0 : i32, i32, i32
  }
  func.func @transform_61(%arg0: i32) -> (i32, i32, i32) {
    %c0_i32 = arith.constant 0 : i32
    %c0_i32_0 = arith.constant 0 : i32
    %c0_i32_1 = arith.constant 0 : i32
    return %arg0, %c0_i32, %c0_i32_0 : i32, i32, i32
  }
}

</mosaic_0001>

<bundles_post_ra>
// kernel: tpu_custom_call.1
= control target key start
LH: loop header
LB: loop body
LE: loop exit
PB: predicated region body
PF: predicated region fallthrough
CT: control target
= control target key end

     0   :  { %s9408_s6 = smov 1   ;;  %s9409_s10 = smov 2   ;;  %s10947_s0 = inlined_call_operand.smem [shape: u32[62], index: -1, kind: input, shape index: {}] }
   0x1   :  { %s9537_s5 = sld [smem:[%s10947_s0]]   ;;  %s9410_s14 = smov 3  }
   0x2   :  { %s9542_s9 = sld [smem:[%s10947_s0 + %s9408_s6]]   ;;  %s9411_s18 = smov 4  }
   0x3   :  { %s9547_s13 = sld [smem:[%s10947_s0 + %s9409_s10]]   ;;  %s9412_s22 = smov 5  }
   0x4   :  { %s9552_s17 = sld [smem:[%s10947_s0 + %s9410_s14]]   ;;  %s9413_s26 = smov 6  }
   0x5   :  { %s9557_s21 = sld [smem:[%s10947_s0 + %s9411_s18]]   ;;  %s9414_s30 = smov 7  }
   0x6   :  { %s9562_s25 = sld [smem:[%s10947_s0 + %s9412_s22]]   ;;  %s9415_s4 = smov 8  }
   0x7   :  { %10975 = sst [smem:[#allocation103_spill]] %s9537_s5  ;;  %s9416_s10 = smov 9  }
   0x8   :  { %10976 = sst [smem:[#allocation104_spill]] %s9542_s9  ;;  %s9417_s15 = smov 10  }
   0x9   :  { %10977 = sst [smem:[#allocation105_spill]] %s9547_s13  ;;  %s9418_s20 = smov 11  }
   0xa   :  { %10978 = sst [smem:[#allocation106_spill]] %s9552_s17  ;;  %s9420_s1 = smov 13  }
   0xb   :  { %10979 = sst [smem:[#allocation107_spill]] %s9557_s21  ;;  %s9421_s7 = smov 14  }
   0xc   :  { %10980 = sst [smem:[#allocation108_spill]] %s9562_s25  ;;  %s9423_s22 = smov 16  }
   0xd   :  { %s9567_s29 = sld [smem:[%s10947_s0 + %s9413_s26]]   ;;  %s9419_s26 = smov 12  }
   0xe   :  { %s9572_s3 = sld [smem:[%s10947_s0 + %s9414_s30]]   ;;  %s9424_s28 = smov 17  }
   0xf   :  { %s9577_s8 = sld [smem:[%s10947_s0 + %s9415_s4]]  }
  0x10   :  { %s9582_s14 = sld [smem:[%s10947_s0 + %s9416_s10]]  }
  0x11   :  { %s9587_s19 = sld [smem:[%s10947_s0 + %s9417_s15]]   ;;  %s9422_s15 = smov 15  }
  0x12   :  { %s9592_s24 = sld [smem:[%s10947_s0 + %s9418_s20]]  }
  0x13   :  { %10981 = sst [smem:[#allocation109_spill]] %s9567_s29 }
  0x14   :  { %10982 = sst [smem:[#allocation110_spill]] %s9572_s3 }
  0x15   :  { %10983 = sst [smem:[#allocation111_spill]] %s9577_s8 }
  0x16   :  { %10984 = sst [smem:[#allocation112_spill]] %s9582_s14 }
  0x17   :  { %10985 = sst [smem:[#allocation113_spill]] %s9587_s19 }
  0x18   :  { %10986 = sst [smem:[#allocation114_spill]] %s9592_s24 }
  0x19   :  { %s9597_s30 = sld [smem:[%s10947_s0 + %s9419_s26]]  }
  0x1a   :  { %s9602_s6 = sld [smem:[%s10947_s0 + %s9420_s1]]  }
  0x1b   :  { %s9607_s12 = sld [smem:[%s10947_s0 + %s9421_s7]]   ;;  %s9425_s7 = smov 18  }
  0x1c   :  { %s9612_s20 = sld [smem:[%s10947_s0 + %s9422_s15]]   ;;  %s9426_s15 = smov 19  }
  0x1d   :  { %s9617_s27 = sld [smem:[%s10947_s0 + %s9423_s22]]   ;;  %s9427_s22 = smov 20  }
  0x1e   :  { %s9622_s4 = sld [smem:[%s10947_s0 + %s9424_s28]]   ;;  %s9428_s28 = smov 21  }
  0x1f   :  { %10987 = sst [smem:[#allocation115_spill]] %s9597_s30 }
  0x20   :  { %10988 = sst [smem:[#allocation116_spill]] %s9602_s6 }
  0x21   :  { %10989 = sst [smem:[#allocation117_spill]] %s9607_s12 }
  0x22   :  { %10990 = sst [smem:[#allocation118_spill]] %s9612_s20 }
  0x23   :  { %10991 = sst [smem:[#allocation119_spill]] %s9617_s27 }
  0x24   :  { %10992 = sst [smem:[#allocation120_spill]] %s9622_s4 }
  0x25   :  { %s9627_s13 = sld [smem:[%s10947_s0 + %s9425_s7]]   ;;  %s9429_s7 = smov 22  }
  0x26   :  { %s9632_s9 = sld [smem:[%s10947_s0 + %s9426_s15]]   ;;  %s9430_s15 = smov 23  }
  0x27   :  { %s9637_s5 = sld [smem:[%s10947_s0 + %s9427_s22]]   ;;  %s9431_s22 = smov 24  }
  0x28   :  { %s9642_s14 = sld [smem:[%s10947_s0 + %s9428_s28]]   ;;  %s9432_s28 = smov 25  }
  0x29   :  { %s9647_s3 = sld [smem:[%s10947_s0 + %s9429_s7]]   ;;  %s9433_s7 = smov 26  }
  0x2a   :  { %s9652_s25 = sld [smem:[%s10947_s0 + %s9430_s15]]   ;;  %s9434_s15 = smov 27  }
  0x2b   :  { %10993 = sst [smem:[#allocation121_spill]] %s9627_s13 }
  0x2c   :  { %10994 = sst [smem:[#allocation122_spill]] %s9632_s9 }
  0x2d   :  { %10995 = sst [smem:[#allocation123_spill]] %s9637_s5 }
  0x2e   :  { %10996 = sst [smem:[#allocation124_spill]] %s9642_s14 }
  0x2f   :  { %10997 = sst [smem:[#allocation125_spill]] %s9647_s3 }
  0x30   :  { %s9657_s17 = sld [smem:[%s10947_s0 + %s9431_s22]]   ;;  %s9435_s22 = smov 28  }
  0x31   :  { %s9662_s29 = sld [smem:[%s10947_s0 + %s9432_s28]]   ;;  %s9436_s28 = smov 29  }
  0x32   :  { %s9667_s21 = sld [smem:[%s10947_s0 + %s9433_s7]]   ;;  %s9437_s7 = smov 30  }
  0x33   :  { %s9672_s3 = sld [smem:[%s10947_s0 + %s9434_s15]]   ;;  %s9438_s15 = smov 31  }
  0x34   :  { %s9682_s5 = sld [smem:[%s10947_s0 + %s9436_s28]]   ;;  %s9440_s28 = smov 33  }
  0x35   :  { %s9692_s13 = sld [smem:[%s10947_s0 + %s9438_s15]]   ;;  %s9442_s15 = smov 35  }
  0x36   :  { %10998 = sst [smem:[#allocation126_spill]] %s9657_s17 }
  0x37   :  { %s9677_s17 = sld [smem:[%s10947_s0 + %s9435_s22]]   ;;  %s9439_s22 = smov 32  }
  0x38   :  { %10999 = sst [smem:[#allocation127_spill]] %s9667_s21 }
  0x39   :  { %11000 = sst [smem:[#allocation128_spill]] %s9672_s3 }
  0x3a   :  { %11002 = sst [smem:[#allocation130_spill]] %s9682_s5 }
  0x3b   :  { %s9687_s21 = sld [smem:[%s10947_s0 + %s9437_s7]]   ;;  %s9441_s7 = smov 34  }
  0x3c   :  { %11004 = sst [smem:[#allocation132_spill]] %s9692_s13 }
  0x3d   :  { %11001 = sst [smem:[#allocation129_spill]] %s9677_s17 }
  0x3e   :  { %s9697_s17 = sld [smem:[%s10947_s0 + %s9439_s22]]   ;;  %s9443_s22 = smov 36  }
  0x3f   :  { %s9702_s5 = sld [smem:[%s10947_s0 + %s9440_s28]]   ;;  %s9444_s28 = smov 37  }
  0x40   :  { %s9707_s27 = sld [smem:[%s10947_s0 + %s9441_s7]]   ;;  %s9445_s7 = smov 38  }
  0x41   :  { %11003 = sst [smem:[#allocation131_spill]] %s9687_s21 }
  0x42   :  { %s9712_s13 = sld [smem:[%s10947_s0 + %s9442_s15]]   ;;  %s9446_s15 = smov 39  }
  0x43   :  { %s9717_s12 = sld [smem:[%s10947_s0 + %s9443_s22]]   ;;  %s9447_s22 = smov 40  }
  0x44   :  { %11005 = sst [smem:[#allocation133_spill]] %s9697_s17 }
  0x45   :  { %11006 = sst [smem:[#allocation134_spill]] %s9702_s5 }
  0x46   :  { %s9722_s5 = sld [smem:[%s10947_s0 + %s9444_s28]]   ;;  %s9448_s28 = smov 41  }
  0x47   :  { %s9727_s30 = sld [smem:[%s10947_s0 + %s9445_s7]]   ;;  %s9449_s7 = smov 42  }
  0x48   :  { %11007 = sst [smem:[#allocation135_spill]] %s9712_s13 }
  0x49   :  { %11008 = sst [smem:[#allocation136_spill]] %s9717_s12 }
  0x4a   :  { %s9732_s13 = sld [smem:[%s10947_s0 + %s9446_s15]]   ;;  %s9450_s15 = smov 43  }
  0x4b   :  { %s9737_s19 = sld [smem:[%s10947_s0 + %s9447_s22]]   ;;  %s9451_s22 = smov 44  }
  0x4c   :  { %11009 = sst [smem:[#allocation137_spill]] %s9722_s5 }
  0x4d   :  { %11010 = sst [smem:[#allocation138_spill]] %s9727_s30 }
  0x4e   :  { %s9742_s5 = sld [smem:[%s10947_s0 + %s9448_s28]]   ;;  %s9452_s28 = smov 45  }
  0x4f   :  { %s9747_s30 = sld [smem:[%s10947_s0 + %s9449_s7]]   ;;  %s9453_s7 = smov 46  }
  0x50   :  { %11011 = sst [smem:[#allocation139_spill]] %s9732_s13 }
  0x51   :  { %11012 = sst [smem:[#allocation140_spill]] %s9737_s19 }
  0x52   :  { %s9752_s13 = sld [smem:[%s10947_s0 + %s9450_s15]]   ;;  %s9454_s15 = smov 47  }
  0x53   :  { %s9757_s19 = sld [smem:[%s10947_s0 + %s9451_s22]]   ;;  %s9455_s22 = smov 48  }
  0x54   :  { %11013 = sst [smem:[#allocation141_spill]] %s9742_s5 }
  0x55   :  { %11014 = sst [smem:[#allocation142_spill]] %s9747_s30 }
  0x56   :  { %s9762_s5 = sld [smem:[%s10947_s0 + %s9452_s28]]   ;;  %s9456_s28 = smov 49  }
  0x57   :  { %s9767_s30 = sld [smem:[%s10947_s0 + %s9453_s7]]   ;;  %s9457_s7 = smov 50  }
  0x58   :  { %11015 = sst [smem:[#allocation143_spill]] %s9752_s13 }
  0x59   :  { %11016 = sst [smem:[#allocation144_spill]] %s9757_s19 }
  0x5a   :  { %s9772_s13 = sld [smem:[%s10947_s0 + %s9454_s15]]   ;;  %s9458_s15 = smov 51  }
  0x5b   :  { %s9777_s19 = sld [smem:[%s10947_s0 + %s9455_s22]]   ;;  %s9459_s22 = smov 52  }
  0x5c   :  { %11017 = sst [smem:[#allocation145_spill]] %s9762_s5 }
  0x5d   :  { %11018 = sst [smem:[#allocation146_spill]] %s9767_s30 }
  0x5e   :  { %s9782_s5 = sld [smem:[%s10947_s0 + %s9456_s28]]   ;;  %s9460_s28 = smov 53  }
  0x5f   :  { %s9787_s30 = sld [smem:[%s10947_s0 + %s9457_s7]]   ;;  %s9461_s7 = smov 54  }
  0x60   :  { %11019 = sst [smem:[#allocation147_spill]] %s9772_s13 }
  0x61   :  { %11020 = sst [smem:[#allocation148_spill]] %s9777_s19 }
  0x62   :  { %s9792_s13 = sld [smem:[%s10947_s0 + %s9458_s15]]   ;;  %s9462_s15 = smov 55  }
  0x63   :  { %s9797_s19 = sld [smem:[%s10947_s0 + %s9459_s22]]   ;;  %s9463_s22 = smov 56  }
  0x64   :  { %11021 = sst [smem:[#allocation149_spill]] %s9782_s5 }
  0x65   :  { %11022 = sst [smem:[#allocation150_spill]] %s9787_s30 }
  0x66   :  { %s9802_s5 = sld [smem:[%s10947_s0 + %s9460_s28]]   ;;  %s9464_s28 = smov 57  }
  0x67   :  { %s9807_s30 = sld [smem:[%s10947_s0 + %s9461_s7]]   ;;  %s9465_s7 = smov 58  }
  0x68   :  { %11023 = sst [smem:[#allocation151_spill]] %s9792_s13 }
  0x69   :  { %11024 = sst [smem:[#allocation152_spill]] %s9797_s19 }
  0x6a   :  { %s9812_s13 = sld [smem:[%s10947_s0 + %s9462_s15]]   ;;  %s9466_s15 = smov 59  }
  0x6b   :  { %s9817_s19 = sld [smem:[%s10947_s0 + %s9463_s22]]   ;;  %s9467_s22 = smov 60  }
  0x6c   :  { %11025 = sst [smem:[#allocation153_spill]] %s9802_s5 }
  0x6d   :  { %11026 = sst [smem:[#allocation154_spill]] %s9807_s30 }
  0x6e   :  { %s9822_s5 = sld [smem:[%s10947_s0 + %s9464_s28]]   ;;  %s9468_s28 = smov 61  }
  0x6f   :  { %s9827_s30 = sld [smem:[%s10947_s0 + %s9465_s7]]  }
  0x70   :  { %11027 = sst [smem:[#allocation155_spill]] %s9812_s13 }
  0x71   :  { %11028 = sst [smem:[#allocation156_spill]] %s9817_s19 }
  0x72   :  { %s9832_s13 = sld [smem:[%s10947_s0 + %s9466_s15]]  }
  0x73   :  { %s9837_s19 = sld [smem:[%s10947_s0 + %s9467_s22]]  }
  0x74   :  { %11029 = sst [smem:[#allocation157_spill]] %s9822_s5 }
  0x75   :  { %11030 = sst [smem:[#allocation158_spill]] %s9827_s30 }
  0x76   :  { %s9842_s5 = sld [smem:[%s10947_s0 + %s9468_s28]]  }
  0x78   :  { %11031 = sst [smem:[#allocation159_spill]] %s9832_s13 }
  0x79   :  { %11032 = sst [smem:[#allocation160_spill]] %s9837_s19 }
  0x7a   :  { %129 = vsyncpa [#allocation3], 0 }
  0x7b   :  { %131 = vsyncpa [#allocation3 + $0x1], 0 }
  0x7c   :  { %132 = vsyncpa [#allocation6], 0 }
  0x7d   :  { %134 = vsyncpa [#allocation6 + $0x1], 0 }
  0x7e   :  { %135 = vsyncpa [#allocation9], 0 }
  0x7f   :  { %137 = vsyncpa [#allocation9 + $0x1], 0 }
  0x80   :  { %138 = vsyncpa [#allocation12], 0 }
  0x81   :  { %139 = vsyncpa [#allocation15], 0 }
  0x82   :  { %140 = vsyncpa [#allocation18], 0 }
  0x83   :  { %141 = vsyncpa [#allocation21], 0 }
  0x84   :  { %142 = vsyncpa [#allocation24], 0 }
  0x85   :  { %143 = vsyncpa [#allocation27], 0 }
  0x86   :  { %144 = vsyncpa [#allocation30], 0 }
  0x87   :  { %145 = vsyncpa [#allocation33], 0 }
  0x88   :  { %146 = vsyncpa [#allocation36], 0 }
  0x89   :  { %147 = vsyncpa [#allocation39], 0 }
  0x8a   :  { %148 = vsyncpa [#allocation42], 0 }
  0x8b   :  { %149 = vsyncpa [#allocation45], 0 }
  0x8c   :  { %150 = vsyncpa [#allocation48], 0 }
  0x8d   :  { %151 = vsyncpa [#allocation51], 0 }
  0x8e   :  { %152 = vsyncpa [#allocation54], 0 }
  0x8f   :  { %153 = vsyncpa [#allocation57], 0 }
  0x90   :  { %154 = vsyncpa [#allocation60], 0 }
  0x91   :  { %155 = vsyncpa [#allocation63], 0 }
  0x92   :  { %156 = vsyncpa [#allocation66], 0 }
  0x93   :  { %157 = vsyncpa [#allocation69], 0 }
  0x94   :  { %158 = vsyncpa [#allocation72], 0 }
  0x95   :  { %159 = vsyncpa [#allocation4], 0 }
  0x96   :  { %161 = vsyncpa [#allocation4 + $0x1], 0 }
  0x97   :  { %162 = vsyncpa [#allocation76], 0 }
  0x98   :  { %164 = vsyncpa [#allocation76 + $0x1], 0  ;;  %s9844_s0 = smov 0   ;;  %s9846_s7 = smov 0  }
  0x99   :  { %s9848_s10 = smov 0   ;;  %s9850_s11 = smov 0  }
  0x9a LB: > { %11033 = sst [smem:[#allocation161_spill]] %s9394_s0  ;;  %s9865_s15 = sadd.s32 4294967295, %s9406_s11   ;;  %s9406_s11 = sphi %s9850_s11, %s11158_s11   ;;  %s9402_s10 = sphi %s9848_s10, %s11162_s10   ;;  %s9398_s7 = sphi %s9846_s7, %s11161_s7   ;;  %s9394_s0 = sphi %s9844_s0, %s11160_s0  }
  0x9b   : > { %s6783_s16 = sadd.s32 4294967294, %s9406_s11   ;;  %s9869_s18 = sadd.s32 1, %s9406_s11  }
  0x9c   : > { %11034 = sst [smem:[#allocation162_spill]] %s9869_s18  ;;  %s255_s22 = sadd.s32 1, %s9402_s10 }
  0x9d   : > { %s252_s23 = ssub.s32 %s9406_s11, %s9869_s18  ;;  %p262_p0 = scmp.ne.s32.totalorder %s9402_s10, %s9398_s7 }
  0x9e   : > { %p253_p1 = scmp.eq.s32.totalorder %s252_s23, 0  ;;  %p263_p2 = scmp.eq.s32.totalorder %s9406_s11, 0 }
  0x9f   : > { %p268_p3 = scmp.ne.s32.totalorder %s9398_s7, %s9394_s0  ;;  %p10972_p4 = scmp.eq.s32.totalorder %s9865_s15, 0 }
  0xa0   : > { %s9881_s26 = scalar_select %p253_p1, %s9402_s10, %s255_s22  }
  0xa1   : > { %p9883_p5 = por %p263_p2, %p262_p0  ;;  %p9889_p6 = por %p10972_p4, %p268_p3 }
  0xa2   : > { %11035 = sst [smem:[#allocation163_spill]] %s9881_s26  ;;  %p1488_p7 = scmp.eq.s32.totalorder %s9865_s15, 1 }
  0xa3   : > { %s11037_s1 = scalar_select %p9889_p6, 1, 0 }
  0xa4   : > { %p1494_p8 = scmp.eq.s32.totalorder %s6783_s16, 1  ;;  %p6784_p9 = scmp.ge.s32.totalorder %s9406_s11, 1 }
  0xa5   : > { %p1527_p10 = scmp.lt.s32.totalorder %s9406_s11, 3  ;;  %p9896_p11 = por %p1488_p7, %p262_p0 }
  0xa6   : > { %p9900_p12 = por %p1494_p8, %p268_p3 }
  0xa7   : > { %s11038_s2 = scalar_select %p9896_p11, 1, 0 }
  0xa8   : > { %s11039_s22 = scalar_select %p9900_p12, 1, 0 }
  0xa9   : > { %p9904_p13 = pnand %p6784_p9, %p1527_p10 }
  0xaa   : > { %11040 = sst [smem:[#allocation164_spill]] %s11039_s22  ;;  %s9469_s26 = smov (!%p9904_p13), [#allocation11]  }
  0xab   : > { %s11041_s23 = scalar_select %p9904_p13, 1, 0 }
  0xac   : > { %1531 = sbr.rel (%p9904_p13) target bundleno = 646 (0x286), region = 12  ;;  %s1540_s16 = sshll.u32 (!%p9904_p13), %s9469_s26, 4  ;;  %s1541_s16 = int_to_ptr.vmem [resolvable:$true] %s1540_s16 }
  0xad   : > { %s9470_s18 = smov (!%p9904_p13), [#allocation14]   ;;  %s8082_s19 = scalar_lea.vmem (!%p9904_p13), %s1541_s16, 128 }
  0xae   : > { %s1564_s0 = sshll.u32 (!%p9904_p13), %s9470_s18, 4  ;;  %p8083_p0 = scmp.ne.s32.totalorder (!%p9904_p13), %s1541_s16, %s8082_s19  ;;  %s1565_s0 = int_to_ptr.vmem [resolvable:$true] %s1564_s0 }
  0xaf   : > { %p8089_p3 = scmp.lt.s32.totalorder (!%p9904_p13), %s1541_s16, %s1541_s16  ;;  %p8090_p7 = scmp.lt.s32.totalorder (!%p9904_p13), %s8082_s19, %s8082_s19 }
  0xb0   : > { %p8084_p1 = pnand (!%p9904_p13), %p8083_p0, %p10972_p4 }
  0xb1   : > { %p8091_p8 = por %p8090_p7, %p8089_p3 }
  0xb2   : > { %p8085_p2 = pneg %p8084_p1 }
  0xb4   : > { %p8092_p9 = pnand %p8091_p8, %p8085_p2 }
  0xb6   : > { %8095 = shalt.err (!%p8092_p9)
}
  0xb7   : > { %s11042_s8 = sld [smem:[#allocation111_spill]]  ;;  %s8106_s26 = scalar_lea.vmem %s1565_s0, 256 }
  0xb8   : > { %p8107_p10 = scmp.ne.s32.totalorder %s1565_s0, %s8106_s26  ;;  %p8113_p6 = scmp.lt.s32.totalorder %s1565_s0, %s1565_s0 }
  0xb9   : > { %p8114_p13 = scmp.lt.s32.totalorder %s8106_s26, %s8106_s26 }
  0xba   : > { %p8108_p12 = pnand %p8107_p10, %p10972_p4 }
  0xbb   : > { %p8115_p0 = por %p8114_p13, %p8113_p6 }
  0xbc   : > { %p8109_p11 = pneg %p8108_p12 }
  0xbd   : > { %7518 = dma.hbm_to_vmem [thread:$0]  (%p10972_p4), %s11042_s8, 128, %s1541_s16, [#allocation12]  }
  0xbe   : > { %p8116_p1 = pnand %p8115_p0, %p8109_p11 }
  0xc0   : > { %8119 = shalt.err (!%p8116_p1)
}
  0xc1   : > { %s10967_s19 = smov 64   ;;  %s11043_s24 = sld [smem:[#allocation114_spill]] }
  0xc2   : > { %s10969_s18 = smov 4   ;;  %s9473_s16 = smov [#allocation17]  }
  0xc3   : > { %s1588_s8 = sshll.u32 %s9473_s16, 4  ;;  %s9474_s22 = smov [#allocation20]   ;;  %s1589_s8 = int_to_ptr.vmem [resolvable:$true] %s1588_s8 }
  0xc4   : > { %s1612_s13 = sshll.u32 %s9474_s22, 4  ;;  %s8130_s30 = scalar_lea.vmem %s1589_s8, 256  ;;  %s1613_s13 = int_to_ptr.vmem [resolvable:$true] %s1612_s13 }
  0xc5   : > { %p8131_p12 = scmp.ne.s32.totalorder %s1589_s8, %s8130_s30  ;;  %p8137_p13 = scmp.lt.s32.totalorder %s1589_s8, %s1589_s8 }
  0xc6   : > { %p8138_p2 = scmp.lt.s32.totalorder %s8130_s30, %s8130_s30 }
  0xc7   : > { %7522 = dma.hbm_to_vmem [thread:$0]  (%p10972_p4), %s11043_s24, 256, %s1565_s0, [#allocation15], %s10967_s19, %s10967_s19, %s10969_s18  }
  0xc8   : > { %p8132_p6 = pnand %p8131_p12, %p10972_p4  ;;  %p8139_p3 = por %p8138_p2, %p8137_p13 }
  0xca   : > { %p8133_p11 = pneg %p8132_p6 }
  0xcc   : > { %p8140_p7 = pnand %p8139_p3, %p8133_p11 }
  0xce   : > { %8143 = shalt.err (!%p8140_p7)
}
  0xcf   : > { %s11044_s6 = sld [smem:[#allocation116_spill]]  ;;  %s8154_s0 = scalar_lea.vmem %s1613_s13, 256 }
  0xd0   : > { %p8155_p8 = scmp.ne.s32.totalorder %s1613_s13, %s8154_s0  ;;  %p8161_p0 = scmp.lt.s32.totalorder %s1613_s13, %s1613_s13 }
  0xd1   : > { %p8162_p1 = scmp.lt.s32.totalorder %s8154_s0, %s8154_s0 }
  0xd2   : > { %p8156_p9 = pnand %p8155_p8, %p10972_p4 }
  0xd3   : > { %p8163_p12 = por %p8162_p1, %p8161_p0 }
  0xd4   : > { %p8157_p10 = pneg %p8156_p9 }
  0xd5   : > { %7526 = dma.hbm_to_vmem [thread:$0]  (%p10972_p4), %s11044_s6, 256, %s1589_s8, [#allocation18], %s10967_s19, %s10967_s19, %s10969_s18  }
  0xd6   : > { %p8164_p6 = pnand %p8163_p12, %p8157_p10 }
  0xd8   : > { %8167 = shalt.err (!%p8164_p6)
}
  0xd9   : > { %s11045_s20 = sld [smem:[#allocation118_spill]]  ;;  %s9475_s8 = smov [#allocation23]  }
  0xda   : > { %s1637_s30 = sshll.u32 %s9475_s8, 4  ;;  %s9476_s22 = smov [#allocation26]   ;;  %s1638_s30 = int_to_ptr.vmem [resolvable:$true] %s1637_s30 }
  0xdb   : > { %s1658_s26 = sshll.u32 %s9476_s22, 4  ;;  %s8178_s16 = scalar_lea.vmem %s1638_s30, 16  ;;  %s1659_s26 = int_to_ptr.vmem [resolvable:$true] %s1658_s26 }
  0xdc   : > { %p8179_p11 = scmp.ne.s32.totalorder %s1638_s30, %s8178_s16  ;;  %s8184_s0 = scalar_lea.vmem %s1638_s30, 32 }
  0xdd   : > { %p8185_p3 = scmp.lt.s32.totalorder %s1638_s30, %s1638_s30  ;;  %p8186_p7 = scmp.lt.s32.totalorder %s8184_s0, %s8178_s16 }
  0xde   : > { %p8180_p13 = pnand %p8179_p11, %p10972_p4 }
  0xdf   : > { %7530 = dma.hbm_to_vmem [thread:$0]  (%p10972_p4), %s11045_s20, 256, %s1613_s13, [#allocation21], %s10967_s19, %s10967_s19, %s10969_s18  }
  0xe0   : > { %p8181_p2 = pneg %p8180_p13  ;;  %p8187_p8 = por %p8186_p7, %p8185_p3 }
  0xe2   : > { %p8188_p9 = pnand %p8187_p8, %p8181_p2 }
  0xe4   : > { %8191 = shalt.err (!%p8188_p9)
}
  0xe5   : > { %s11046_s4 = sld [smem:[#allocation120_spill]]  ;;  %s8202_s13 = scalar_lea.vmem %s1659_s26, 256 }
  0xe6   : > { %p8203_p10 = scmp.ne.s32.totalorder %s1659_s26, %s8202_s13  ;;  %p8209_p12 = scmp.lt.s32.totalorder %s1659_s26, %s1659_s26 }
  0xe7   : > { %p8210_p6 = scmp.lt.s32.totalorder %s8202_s13, %s8202_s13 }
  0xe8   : > { %p8204_p0 = pnand %p8203_p10, %p10972_p4 }
  0xe9   : > { %p8211_p11 = por %p8210_p6, %p8209_p12 }
  0xea   : > { %p8205_p1 = pneg %p8204_p0 }
  0xeb   : > { %7534 = dma.hbm_to_vmem [thread:$0]  (%p10972_p4), %s11046_s4, 16, %s1638_s30, [#allocation24]  }
  0xec   : > { %p8212_p13 = pnand %p8211_p11, %p8205_p1 }
  0xee   : > { %8215 = shalt.err (!%p8212_p13)
}
  0xef   : > { %s11047_s9 = sld [smem:[#allocation122_spill]]  ;;  %s9477_s8 = smov [#allocation29]  }
  0xf0   : > { %s1682_s30 = sshll.u32 %s9477_s8, 4  ;;  %s9478_s22 = smov [#allocation32]   ;;  %s1683_s30 = int_to_ptr.vmem [resolvable:$true] %s1682_s30 }
  0xf1   : > { %s1706_s16 = sshll.u32 %s9478_s22, 4  ;;  %s8226_s0 = scalar_lea.vmem %s1683_s30, 256  ;;  %s1707_s16 = int_to_ptr.vmem [resolvable:$true] %s1706_s16 }
  0xf2   : > { %p8227_p2 = scmp.ne.s32.totalorder %s1683_s30, %s8226_s0  ;;  %p8233_p8 = scmp.lt.s32.totalorder %s1683_s30, %s1683_s30 }
  0xf3   : > { %p8234_p9 = scmp.lt.s32.totalorder %s8226_s0, %s8226_s0 }
  0xf4   : > { %p8228_p3 = pnand %p8227_p2, %p10972_p4 }
  0xf5   : > { %7538 = dma.hbm_to_vmem [thread:$0]  (%p10972_p4), %s11047_s9, 256, %s1659_s26, [#allocation27], %s10967_s19, %s10967_s19, %s10969_s18  }
  0xf6   : > { %p8229_p7 = pneg %p8228_p3  ;;  %p8235_p10 = por %p8234_p9, %p8233_p8 }
  0xf8   : > { %p8236_p0 = pnand %p8235_p10, %p8229_p7 }
  0xfa   : > { %8239 = shalt.err (!%p8236_p0)
}
  0xfb   : > { %s11048_s14 = sld [smem:[#allocation124_spill]]  ;;  %s8250_s26 = scalar_lea.vmem %s1707_s16, 256 }
  0xfc   : > { %p8251_p1 = scmp.ne.s32.totalorder %s1707_s16, %s8250_s26  ;;  %p8257_p11 = scmp.lt.s32.totalorder %s1707_s16, %s1707_s16 }
  0xfd   : > { %p8258_p13 = scmp.lt.s32.totalorder %s8250_s26, %s8250_s26 }
  0xfe   : > { %p8252_p12 = pnand %p8251_p1, %p10972_p4 }
  0xff   : > { %p8259_p2 = por %p8258_p13, %p8257_p11 }
 0x100   : > { %p8253_p6 = pneg %p8252_p12 }
 0x101   : > { %7542 = dma.hbm_to_vmem [thread:$0]  (%p10972_p4), %s11048_s14, 256, %s1683_s30, [#allocation30], %s10967_s19, %s10967_s19, %s10969_s18  }
 0x102   : > { %p8260_p3 = pnand %p8259_p2, %p8253_p6 }
 0x104   : > { %8263 = shalt.err (!%p8260_p3)
}
 0x105   : > { %7546 = dma.hbm_to_vmem [thread:$0]  (%p10972_p4), %s9652_s25, 256, %s1707_s16, [#allocation33], %s10967_s19, %s10967_s19, %s10969_s18  }
 0x106   : > { %s9479_s13 = smov [#allocation35]   ;;  %s9480_s30 = smov [#allocation38]  }
 0x107   : > { %s1730_s8 = sshll.u32 %s9479_s13, 4  ;;  %s1755_s22 = sshll.u32 %s9480_s30, 4  ;;  %s1731_s8 = int_to_ptr.vmem [resolvable:$true] %s1730_s8  ;;  %s1756_s22 = int_to_ptr.vmem [resolvable:$true] %s1755_s22 }
 0x108   : > { %s8274_s0 = scalar_lea.vmem %s1731_s8, 256  ;;  %p8281_p10 = scmp.lt.s32.totalorder %s1731_s8, %s1731_s8 }
 0x109   : > { %p8275_p7 = scmp.ne.s32.totalorder %s1731_s8, %s8274_s0  ;;  %p8282_p0 = scmp.lt.s32.totalorder %s8274_s0, %s8274_s0 }
 0x10b   : > { %p8276_p8 = pnand %p8275_p7, %p10972_p4  ;;  %p8283_p1 = por %p8282_p0, %p8281_p10 }
 0x10d   : > { %p8277_p9 = pneg %p8276_p8 }
 0x10f   : > { %p8284_p12 = pnand %p8283_p1, %p8277_p9 }
 0x111   : > { %8287 = shalt.err (!%p8284_p12)
}
 0x112   : > { %7550 = dma.hbm_to_vmem [thread:$0]  (%p10972_p4), %s9662_s29, 256, %s1731_s8, [#allocation36], %s10967_s19, %s10967_s19, %s10969_s18  }
 0x113   : > { %s8298_s16 = scalar_lea.vmem %s1756_s22, 16  ;;  %s8304_s26 = scalar_lea.vmem %s1756_s22, 32 }
 0x114   : > { %p8299_p6 = scmp.ne.s32.totalorder %s1756_s22, %s8298_s16  ;;  %p8305_p2 = scmp.lt.s32.totalorder %s1756_s22, %s1756_s22 }
 0x115   : > { %p8306_p3 = scmp.lt.s32.totalorder %s8304_s26, %s8298_s16 }
 0x116   : > { %p8300_p11 = pnand %p8299_p6, %p10972_p4 }
 0x117   : > { %p8307_p7 = por %p8306_p3, %p8305_p2 }
 0x118   : > { %p8301_p13 = pneg %p8300_p11 }
 0x11a   : > { %p8308_p8 = pnand %p8307_p7, %p8301_p13 }
 0x11c   : > { %8311 = shalt.err (!%p8308_p8)
}
 0x11d   : > { %s11049_s3 = sld [smem:[#allocation128_spill]]  ;;  %s9481_s13 = smov [#allocation41]  }
 0x11e   : > { %s1780_s30 = sshll.u32 %s9481_s13, 4  ;;  %s9482_s8 = smov [#allocation44]   ;;  %s1781_s30 = int_to_ptr.vmem [resolvable:$true] %s1780_s30 }
 0x11f   : > { %s1804_s0 = sshll.u32 %s9482_s8, 4  ;;  %s8322_s19 = scalar_lea.vmem %s1781_s30, 16  ;;  %s1805_s0 = int_to_ptr.vmem [resolvable:$true] %s1804_s0 }
 0x120   : > { %p8323_p9 = scmp.ne.s32.totalorder %s1781_s30, %s8322_s19  ;;  %s8328_s18 = scalar_lea.vmem %s1781_s30, 32 }
 0x121   : > { %p8329_p1 = scmp.lt.s32.totalorder %s1781_s30, %s1781_s30  ;;  %p8330_p12 = scmp.lt.s32.totalorder %s8328_s18, %s8322_s19 }
 0x122   : > { %p8324_p10 = pnand %p8323_p9, %p10972_p4 }
 0x123   : > { %7554 = dma.hbm_to_vmem [thread:$0]  (%p10972_p4), %s11049_s3, 16, %s1756_s22, [#allocation39]  }
 0x124   : > { %p8325_p0 = pneg %p8324_p10  ;;  %p8331_p6 = por %p8330_p12, %p8329_p1 }
 0x126   : > { %p8332_p11 = pnand %p8331_p6, %p8325_p0 }
 0x128   : > { %8335 = shalt.err (!%p8332_p11)
}
 0x129   : > { %s11050_s21 = sld [smem:[#allocation131_spill]]  ;;  %s8346_s22 = scalar_lea.vmem %s1805_s0, 16 }
 0x12a   : > { %p8347_p13 = scmp.ne.s32.totalorder %s1805_s0, %s8346_s22  ;;  %s8352_s16 = scalar_lea.vmem %s1805_s0, 32 }
 0x12b   : > { %p8353_p7 = scmp.lt.s32.totalorder %s1805_s0, %s1805_s0  ;;  %p8354_p8 = scmp.lt.s32.totalorder %s8352_s16, %s8346_s22 }
 0x12c   : > { %p8348_p2 = pnand %p8347_p13, %p10972_p4 }
 0x12d   : > { %p8355_p9 = por %p8354_p8, %p8353_p7 }
 0x12e   : > { %p8349_p3 = pneg %p8348_p2 }
 0x12f   : > { %7558 = dma.hbm_to_vmem [thread:$0]  (%p10972_p4), %s11050_s21, 16, %s1781_s30, [#allocation42]  }
 0x130   : > { %p8356_p10 = pnand %p8355_p9, %p8349_p3 }
 0x132   : > { %8359 = shalt.err (!%p8356_p10)
}
 0x133   : > { %s11051_s17 = sld [smem:[#allocation133_spill]]  ;;  %s9483_s19 = smov [#allocation47]  }
 0x134   : > { %s1828_s18 = sshll.u32 %s9483_s19, 4  ;;  %s9484_s26 = smov [#allocation50]   ;;  %s1829_s18 = int_to_ptr.vmem [resolvable:$true] %s1828_s18 }
 0x135   : > { %s1852_s13 = sshll.u32 %s9484_s26, 4  ;;  %s8370_s30 = scalar_lea.vmem %s1829_s18, 16  ;;  %s1853_s13 = int_to_ptr.vmem [resolvable:$true] %s1852_s13 }
 0x136   : > { %p8371_p0 = scmp.ne.s32.totalorder %s1829_s18, %s8370_s30  ;;  %s8376_s8 = scalar_lea.vmem %s1829_s18, 32 }
 0x137   : > { %p8377_p6 = scmp.lt.s32.totalorder %s1829_s18, %s1829_s18  ;;  %p8378_p11 = scmp.lt.s32.totalorder %s8376_s8, %s8370_s30 }
 0x138   : > { %p8372_p1 = pnand %p8371_p0, %p10972_p4 }
 0x139   : > { %7562 = dma.hbm_to_vmem [thread:$0]  (%p10972_p4), %s11051_s17, 16, %s1805_s0, [#allocation45]  }
 0x13a   : > { %p8373_p12 = pneg %p8372_p1  ;;  %p8379_p13 = por %p8378_p11, %p8377_p6 }
 0x13c   : > { %p8380_p2 = pnand %p8379_p13, %p8373_p12 }
 0x13e   : > { %8383 = shalt.err (!%p8380_p2)
}
 0x13f   : > { %7566 = dma.hbm_to_vmem [thread:$0]  (%p10972_p4), %s9707_s27, 16, %s1829_s18, [#allocation48]  }
 0x140   : > { %s8394_s0 = scalar_lea.vmem %s1853_s13, 16  ;;  %s8400_s22 = scalar_lea.vmem %s1853_s13, 32 }
 0x141   : > { %p8395_p3 = scmp.ne.s32.totalorder %s1853_s13, %s8394_s0  ;;  %p8401_p9 = scmp.lt.s32.totalorder %s1853_s13, %s1853_s13 }
 0x142   : > { %p8402_p10 = scmp.lt.s32.totalorder %s8400_s22, %s8394_s0 }
 0x143   : > { %p8396_p7 = pnand %p8395_p3, %p10972_p4 }
 0x144   : > { %p8403_p0 = por %p8402_p10, %p8401_p9 }
 0x145   : > { %p8397_p8 = pneg %p8396_p7 }
 0x147   : > { %p8404_p1 = pnand %p8403_p0, %p8397_p8 }
 0x149   : > { %8407 = shalt.err (!%p8404_p1)
}
 0x14a   : > { %s11052_s12 = sld [smem:[#allocation136_spill]]  ;;  %s9485_s16 = smov [#allocation53]  }
 0x14b   : > { %s1874_s19 = sshll.u32 %s9485_s16, 4  ;;  %s9486_s18 = smov [#allocation56]   ;;  %s1875_s19 = int_to_ptr.vmem [resolvable:$true] %s1874_s19 }
 0x14c   : > { %s1898_s26 = sshll.u32 %s9486_s18, 4  ;;  %s8418_s30 = scalar_lea.vmem %s1875_s19, 16  ;;  %s1899_s26 = int_to_ptr.vmem [resolvable:$true] %s1898_s26 }
 0x14d   : > { %p8419_p12 = scmp.ne.s32.totalorder %s1875_s19, %s8418_s30  ;;  %s8424_s8 = scalar_lea.vmem %s1875_s19, 32 }
 0x14e   : > { %p8425_p13 = scmp.lt.s32.totalorder %s1875_s19, %s1875_s19  ;;  %p8426_p2 = scmp.lt.s32.totalorder %s8424_s8, %s8418_s30 }
 0x14f   : > { %p8420_p6 = pnand %p8419_p12, %p10972_p4 }
 0x150   : > { %7570 = dma.hbm_to_vmem [thread:$0]  (%p10972_p4), %s11052_s12, 16, %s1853_s13, [#allocation51]  }
 0x151   : > { %p8421_p11 = pneg %p8420_p6  ;;  %p8427_p3 = por %p8426_p2, %p8425_p13 }
 0x153   : > { %p8428_p7 = pnand %p8427_p3, %p8421_p11 }
 0x155   : > { %8431 = shalt.err (!%p8428_p7)
}
 0x156   : > { %s11053_s0 = sld [smem:[#allocation138_spill]]  ;;  %s8442_s13 = scalar_lea.vmem %s1899_s26, 256 }
 0x157   : > { %p8443_p8 = scmp.ne.s32.totalorder %s1899_s26, %s8442_s13  ;;  %p8449_p0 = scmp.lt.s32.totalorder %s1899_s26, %s1899_s26 }
 0x158   : > { %p8450_p1 = scmp.lt.s32.totalorder %s8442_s13, %s8442_s13 }
 0x159   : > { %p8444_p9 = pnand %p8443_p8, %p10972_p4 }
 0x15a   : > { %p8451_p12 = por %p8450_p1, %p8449_p0 }
 0x15b   : > { %p8445_p10 = pneg %p8444_p9 }
 0x15c   : > { %7574 = dma.hbm_to_vmem [thread:$0]  (%p10972_p4), %s11053_s0, 16, %s1875_s19, [#allocation54]  }
 0x15d   : > { %p8452_p6 = pnand %p8451_p12, %p8445_p10 }
 0x15f   : > { %8455 = shalt.err (!%p8452_p6)
}
 0x160   : > { %s11054_s22 = smov 4   ;;  %s11055_s16 = smov 64  }
 0x161   : > { %s11056_s18 = sld [smem:[#allocation141_spill]]  ;;  %s9487_s19 = smov [#allocation59]  }
 0x162   : > { %s1922_s30 = sshll.u32 %s9487_s19, 4  ;;  %s9488_s8 = smov [#allocation62]   ;;  %s1923_s30 = int_to_ptr.vmem [resolvable:$true] %s1922_s30 }
 0x163   : > { %s1950_s0 = sshll.u32 %s9488_s8, 4  ;;  %s8466_s3 = scalar_lea.vmem %s1923_s30, 256  ;;  %s1951_s0 = int_to_ptr.vmem [resolvable:$true] %s1950_s0 }
 0x164   : > { %p8467_p11 = scmp.ne.s32.totalorder %s1923_s30, %s8466_s3  ;;  %p8473_p3 = scmp.lt.s32.totalorder %s1923_s30, %s1923_s30 }
 0x165   : > { %p8474_p7 = scmp.lt.s32.totalorder %s8466_s3, %s8466_s3 }
 0x166   : > { %p8468_p13 = pnand %p8467_p11, %p10972_p4 }
 0x167   : > { %7578 = dma.hbm_to_vmem [thread:$0]  (%p10972_p4), %s11056_s18, 256, %s1899_s26, [#allocation57], %s11055_s16, %s11055_s16, %s11054_s22  }
 0x168   : > { %p8469_p2 = pneg %p8468_p13  ;;  %p8475_p8 = por %p8474_p7, %p8473_p3 }
 0x16a   : > { %p8476_p9 = pnand %p8475_p8, %p8469_p2 }
 0x16c   : > { %8479 = shalt.err (!%p8476_p9)
}
 0x16d   : > { %s11057_s26 = sld [smem:[#allocation143_spill]]  ;;  %s8490_s13 = scalar_lea.vmem %s1951_s0, 16 }
 0x16e   : > { %p8491_p10 = scmp.ne.s32.totalorder %s1951_s0, %s8490_s13  ;;  %s8496_s18 = scalar_lea.vmem %s1951_s0, 32 }
 0x16f   : > { %p8497_p12 = scmp.lt.s32.totalorder %s1951_s0, %s1951_s0  ;;  %p8498_p6 = scmp.lt.s32.totalorder %s8496_s18, %s8490_s13 }
 0x170   : > { %p8492_p0 = pnand %p8491_p10, %p10972_p4 }
 0x171   : > { %p8499_p11 = por %p8498_p6, %p8497_p12 }
 0x172   : > { %p8493_p1 = pneg %p8492_p0 }
 0x173   : > { %7582 = dma.hbm_to_vmem [thread:$0]  (%p10972_p4), %s11057_s26, 256, %s1923_s30, [#allocation60], %s11055_s16, %s11055_s16, %s11054_s22  }
 0x174   : > { %p8500_p13 = pnand %p8499_p11, %p8493_p1 }
 0x176   : > { %8503 = shalt.err (!%p8500_p13)
}
 0x177   : > { %s11058_s3 = sld [smem:[#allocation146_spill]]  ;;  %s9489_s19 = smov [#allocation65]  }
 0x178   : > { %s1972_s8 = sshll.u32 %s9489_s19, 4  ;;  %s9490_s30 = smov [#allocation68]   ;;  %s1973_s8 = int_to_ptr.vmem [resolvable:$true] %s1972_s8 }
 0x179   : > { %s1996_s26 = sshll.u32 %s9490_s30, 4  ;;  %s8514_s4 = scalar_lea.vmem %s1973_s8, 16  ;;  %s1997_s26 = int_to_ptr.vmem [resolvable:$true] %s1996_s26 }
 0x17a   : > { %p8515_p2 = scmp.ne.s32.totalorder %s1973_s8, %s8514_s4  ;;  %s8520_s6 = scalar_lea.vmem %s1973_s8, 32 }
 0x17b   : > { %p8521_p8 = scmp.lt.s32.totalorder %s1973_s8, %s1973_s8  ;;  %p8522_p9 = scmp.lt.s32.totalorder %s8520_s6, %s8514_s4 }
 0x17c   : > { %p8516_p3 = pnand %p8515_p2, %p10972_p4 }
 0x17d   : > { %7586 = dma.hbm_to_vmem [thread:$0]  (%p10972_p4), %s11058_s3, 16, %s1951_s0, [#allocation63]  }
 0x17e   : > { %p8517_p7 = pneg %p8516_p3  ;;  %p8523_p10 = por %p8522_p9, %p8521_p8 }
 0x180   : > { %p8524_p0 = pnand %p8523_p10, %p8517_p7 }
 0x182   : > { %8527 = shalt.err (!%p8524_p0)
}
 0x183   : > { %s11059_s13 = sld [smem:[#allocation148_spill]]  ;;  %s8538_s0 = scalar_lea.vmem %s1997_s26, 16 }
 0x184   : > { %p8539_p1 = scmp.ne.s32.totalorder %s1997_s26, %s8538_s0  ;;  %s8544_s18 = scalar_lea.vmem %s1997_s26, 32 }
 0x185   : > { %p8545_p11 = scmp.lt.s32.totalorder %s1997_s26, %s1997_s26  ;;  %p8546_p13 = scmp.lt.s32.totalorder %s8544_s18, %s8538_s0 }
 0x186   : > { %p8540_p12 = pnand %p8539_p1, %p10972_p4 }
 0x187   : > { %p8547_p2 = por %p8546_p13, %p8545_p11 }
 0x188   : > { %p8541_p6 = pneg %p8540_p12 }
 0x189   : > { %7590 = dma.hbm_to_vmem [thread:$0]  (%p10972_p4), %s11059_s13, 16, %s1973_s8, [#allocation66]  }
 0x18a   : > { %p8548_p3 = pnand %p8547_p2, %p8541_p6 }
 0x18c   : > { %8551 = shalt.err (!%p8548_p3)
}
 0x18d   : > { %s11060_s6 = sld [smem:[#allocation150_spill]]  ;;  %s9491_s4 = smov [#allocation71]  }
 0x18e   : > { %s2017_s3 = sshll.u32 %s9491_s4, 4  ;;  %s9492_s19 = smov [#allocation13]   ;;  %s2018_s3 = int_to_ptr.vmem [resolvable:$true] %s2017_s3 }
 0x18f   : > { %s1554_s8 = sshll.u32 %s9492_s19, 4  ;;  %s8562_s30 = scalar_lea.vmem %s2018_s3, 256  ;;  %s1555_s8 = int_to_ptr.vmem [resolvable:$true] %s1554_s8 }
 0x190   : > { %p8563_p7 = scmp.ne.s32.totalorder %s2018_s3, %s8562_s30  ;;  %p8569_p10 = scmp.lt.s32.totalorder %s2018_s3, %s2018_s3 }
 0x191   : > { %p8570_p0 = scmp.lt.s32.totalorder %s8562_s30, %s8562_s30 }
 0x192   : > { %p8564_p8 = pnand %p8563_p7, %p10972_p4 }
 0x193   : > { %7594 = dma.hbm_to_vmem [thread:$0]  (%p10972_p4), %s11060_s6, 16, %s1997_s26, [#allocation69]  }
 0x194   : > { %p8565_p9 = pneg %p8564_p8  ;;  %p8571_p1 = por %p8570_p0, %p8569_p10 }
 0x196   : > { %p8572_p12 = pnand %p8571_p1, %p8565_p9 }
 0x198   : > { %8575 = shalt.err (!%p8572_p12)
}
 0x199   : > { %s11061_s26 = sld [smem:[#allocation152_spill]]  ;;  %s8586_s13 = scalar_lea.vmem %s1555_s8, 16 }
 0x19a   : > { %p8587_p6 = scmp.ne.s32.totalorder %s1555_s8, %s8586_s13  ;;  %s8592_s0 = scalar_lea.vmem %s1555_s8, 32 }
 0x19b   : > { %p8593_p2 = scmp.lt.s32.totalorder %s1555_s8, %s1555_s8  ;;  %p8594_p3 = scmp.lt.s32.totalorder %s8592_s0, %s8586_s13 }
 0x19c   : > { %p8588_p11 = pnand %p8587_p6, %p10972_p4 }
 0x19d   : > { %p8595_p7 = por %p8594_p3, %p8593_p2 }
 0x19e   : > { %p8589_p13 = pneg %p8588_p11 }
 0x19f   : > { %7598 = dma.hbm_to_vmem [thread:$0]  (%p10972_p4), %s11061_s26, 256, %s2018_s3, [#allocation72], %s11055_s16, %s11055_s16, %s11054_s22  }
 0x1a0   : > { %p8596_p8 = pnand %p8595_p7, %p8589_p13 }
 0x1a2   : > { %8599 = shalt.err (!%p8596_p8)
}
 0x1a3   : > { %s11062_s18 = sld [smem:[#allocation113_spill]]  ;;  %s9493_s6 = smov [#allocation16]  }
 0x1a4   : > { %s1578_s4 = sshll.u32 %s9493_s6, 4  ;;  %s9494_s3 = smov [#allocation19]   ;;  %s1579_s4 = int_to_ptr.vmem [resolvable:$true] %s1578_s4 }
 0x1a5   : > { %s1602_s19 = sshll.u32 %s9494_s3, 4  ;;  %s8610_s30 = scalar_lea.vmem %s1579_s4, 16  ;;  %s1603_s19 = int_to_ptr.vmem [resolvable:$true] %s1602_s19 }
 0x1a6   : > { %p8611_p9 = scmp.ne.s32.totalorder %s1579_s4, %s8610_s30  ;;  %s8616_s26 = scalar_lea.vmem %s1579_s4, 32 }
 0x1a7   : > { %p8617_p1 = scmp.lt.s32.totalorder %s1579_s4, %s1579_s4  ;;  %p8618_p12 = scmp.lt.s32.totalorder %s8616_s26, %s8610_s30 }
 0x1a8   : > { %p8612_p10 = pnand %p8611_p9, %p10972_p4 }
 0x1a9   : > { %7520 = dma.hbm_to_vmem [thread:$0]  (%p10972_p4), %s11062_s18, 16, %s1555_s8, [#allocation12]  }
 0x1aa   : > { %p8613_p0 = pneg %p8612_p10  ;;  %p8619_p6 = por %p8618_p12, %p8617_p1 }
 0x1ac   : > { %p8620_p11 = pnand %p8619_p6, %p8613_p0 }
 0x1ae   : > { %8623 = shalt.err (!%p8620_p11)
}
 0x1af   : > { %s11063_s13 = sld [smem:[#allocation115_spill]]  ;;  %s8634_s8 = scalar_lea.vmem %s1603_s19, 16 }
 0x1b0   : > { %p8635_p13 = scmp.ne.s32.totalorder %s1603_s19, %s8634_s8  ;;  %s8640_s0 = scalar_lea.vmem %s1603_s19, 32 }
 0x1b1   : > { %p8641_p7 = scmp.lt.s32.totalorder %s1603_s19, %s1603_s19  ;;  %p8642_p8 = scmp.lt.s32.totalorder %s8640_s0, %s8634_s8 }
 0x1b2   : > { %p8636_p2 = pnand %p8635_p13, %p10972_p4 }
 0x1b3   : > { %p8643_p9 = por %p8642_p8, %p8641_p7 }
 0x1b4   : > { %p8637_p3 = pneg %p8636_p2 }
 0x1b5   : > { %7524 = dma.hbm_to_vmem [thread:$0]  (%p10972_p4), %s11063_s13, 16, %s1579_s4, [#allocation15]  }
 0x1b6   : > { %p8644_p10 = pnand %p8643_p9, %p8637_p3 }
 0x1b8   : > { %8647 = shalt.err (!%p8644_p10)
}
 0x1b9   : > { %s11064_s18 = sld [smem:[#allocation117_spill]]  ;;  %s9495_s6 = smov [#allocation22]  }
 0x1ba   : > { %s1626_s3 = sshll.u32 %s9495_s6, 4  ;;  %s9496_s4 = smov [#allocation25]   ;;  %s1627_s3 = int_to_ptr.vmem [resolvable:$true] %s1626_s3 }
 0x1bb   : > { %s1648_s30 = sshll.u32 %s9496_s4, 4  ;;  %s8658_s26 = scalar_lea.vmem %s1627_s3, 16  ;;  %s1649_s30 = int_to_ptr.vmem [resolvable:$true] %s1648_s30 }
 0x1bc   : > { %p8659_p0 = scmp.ne.s32.totalorder %s1627_s3, %s8658_s26  ;;  %s8664_s13 = scalar_lea.vmem %s1627_s3, 32 }
 0x1bd   : > { %p8665_p6 = scmp.lt.s32.totalorder %s1627_s3, %s1627_s3  ;;  %p8666_p11 = scmp.lt.s32.totalorder %s8664_s13, %s8658_s26 }
 0x1be   : > { %p8660_p1 = pnand %p8659_p0, %p10972_p4 }
 0x1bf   : > { %7528 = dma.hbm_to_vmem [thread:$0]  (%p10972_p4), %s11064_s18, 16, %s1603_s19, [#allocation18]  }
 0x1c0   : > { %p8661_p12 = pneg %p8660_p1  ;;  %p8667_p13 = por %p8666_p11, %p8665_p6 }
 0x1c2   : > { %p8668_p2 = pnand %p8667_p13, %p8661_p12 }
 0x1c4   : > { %8671 = shalt.err (!%p8668_p2)
}
 0x1c5   : > { %s11065_s8 = sld [smem:[#allocation119_spill]]  ;;  %s8682_s19 = scalar_lea.vmem %s1649_s30, 16 }
 0x1c6   : > { %p8683_p3 = scmp.ne.s32.totalorder %s1649_s30, %s8682_s19  ;;  %s8688_s0 = scalar_lea.vmem %s1649_s30, 32 }
 0x1c7   : > { %p8689_p9 = scmp.lt.s32.totalorder %s1649_s30, %s1649_s30  ;;  %p8690_p10 = scmp.lt.s32.totalorder %s8688_s0, %s8682_s19 }
 0x1c8   : > { %p8684_p7 = pnand %p8683_p3, %p10972_p4 }
 0x1c9   : > { %p8691_p0 = por %p8690_p10, %p8689_p9 }
 0x1ca   : > { %p8685_p8 = pneg %p8684_p7 }
 0x1cb   : > { %7532 = dma.hbm_to_vmem [thread:$0]  (%p10972_p4), %s11065_s8, 16, %s1627_s3, [#allocation21]  }
 0x1cc   : > { %p8692_p1 = pnand %p8691_p0, %p8685_p8 }
 0x1ce   : > { %8695 = shalt.err (!%p8692_p1)
}
 0x1cf   : > { %s11066_s18 = sld [smem:[#allocation121_spill]]  ;;  %s9497_s6 = smov [#allocation28]  }
 0x1d0   : > { %s1672_s4 = sshll.u32 %s9497_s6, 4  ;;  %s9498_s3 = smov [#allocation31]   ;;  %s1673_s4 = int_to_ptr.vmem [resolvable:$true] %s1672_s4 }
 0x1d1   : > { %s1696_s26 = sshll.u32 %s9498_s3, 4  ;;  %s8706_s13 = scalar_lea.vmem %s1673_s4, 16  ;;  %s1697_s26 = int_to_ptr.vmem [resolvable:$true] %s1696_s26 }
 0x1d2   : > { %p8707_p12 = scmp.ne.s32.totalorder %s1673_s4, %s8706_s13  ;;  %s8712_s8 = scalar_lea.vmem %s1673_s4, 32 }
 0x1d3   : > { %p8713_p13 = scmp.lt.s32.totalorder %s1673_s4, %s1673_s4  ;;  %p8714_p2 = scmp.lt.s32.totalorder %s8712_s8, %s8706_s13 }
 0x1d4   : > { %p8708_p6 = pnand %p8707_p12, %p10972_p4 }
 0x1d5   : > { %7536 = dma.hbm_to_vmem [thread:$0]  (%p10972_p4), %s11066_s18, 16, %s1649_s30, [#allocation24]  }
 0x1d6   : > { %p8709_p11 = pneg %p8708_p6  ;;  %p8715_p3 = por %p8714_p2, %p8713_p13 }
 0x1d8   : > { %p8716_p7 = pnand %p8715_p3, %p8709_p11 }
 0x1da   : > { %8719 = shalt.err (!%p8716_p7)
}
 0x1db   : > { %s11067_s19 = sld [smem:[#allocation123_spill]]  ;;  %s8730_s30 = scalar_lea.vmem %s1697_s26, 16 }
 0x1dc   : > { %p8731_p8 = scmp.ne.s32.totalorder %s1697_s26, %s8730_s30  ;;  %s8736_s0 = scalar_lea.vmem %s1697_s26, 32 }
 0x1dd   : > { %p8737_p0 = scmp.lt.s32.totalorder %s1697_s26, %s1697_s26  ;;  %p8738_p1 = scmp.lt.s32.totalorder %s8736_s0, %s8730_s30 }
 0x1de   : > { %p8732_p9 = pnand %p8731_p8, %p10972_p4 }
 0x1df   : > { %p8739_p12 = por %p8738_p1, %p8737_p0 }
 0x1e0   : > { %p8733_p10 = pneg %p8732_p9 }
 0x1e1   : > { %7540 = dma.hbm_to_vmem [thread:$0]  (%p10972_p4), %s11067_s19, 16, %s1673_s4, [#allocation27]  }
 0x1e2   : > { %p8740_p6 = pnand %p8739_p12, %p8733_p10 }
 0x1e4   : > { %8743 = shalt.err (!%p8740_p6)
}
 0x1e5   : > { %s11068_s18 = sld [smem:[#allocation125_spill]]  ;;  %s9499_s6 = smov [#allocation34]  }
 0x1e6   : > { %s1720_s3 = sshll.u32 %s9499_s6, 4  ;;  %s9500_s4 = smov [#allocation37]   ;;  %s1721_s3 = int_to_ptr.vmem [resolvable:$true] %s1720_s3 }
 0x1e7   : > { %s1744_s13 = sshll.u32 %s9500_s4, 4  ;;  %s8754_s8 = scalar_lea.vmem %s1721_s3, 16  ;;  %s1745_s13 = int_to_ptr.vmem [resolvable:$true] %s1744_s13 }
 0x1e8   : > { %p8755_p11 = scmp.ne.s32.totalorder %s1721_s3, %s8754_s8  ;;  %s8760_s19 = scalar_lea.vmem %s1721_s3, 32 }
 0x1e9   : > { %p8761_p3 = scmp.lt.s32.totalorder %s1721_s3, %s1721_s3  ;;  %p8762_p7 = scmp.lt.s32.totalorder %s8760_s19, %s8754_s8 }
 0x1ea   : > { %p8756_p13 = pnand %p8755_p11, %p10972_p4 }
 0x1eb   : > { %7544 = dma.hbm_to_vmem [thread:$0]  (%p10972_p4), %s11068_s18, 16, %s1697_s26, [#allocation30]  }
 0x1ec   : > { %p8757_p2 = pneg %p8756_p13  ;;  %p8763_p8 = por %p8762_p7, %p8761_p3 }
 0x1ee   : > { %p8764_p9 = pnand %p8763_p8, %p8757_p2 }
 0x1f0   : > { %8767 = shalt.err (!%p8764_p9)
}
 0x1f1   : > { %s11069_s30 = sld [smem:[#allocation126_spill]]  ;;  %s8778_s26 = scalar_lea.vmem %s1745_s13, 16 }
 0x1f2   : > { %p8779_p10 = scmp.ne.s32.totalorder %s1745_s13, %s8778_s26  ;;  %s8784_s0 = scalar_lea.vmem %s1745_s13, 32 }
 0x1f3   : > { %p8785_p12 = scmp.lt.s32.totalorder %s1745_s13, %s1745_s13  ;;  %p8786_p6 = scmp.lt.s32.totalorder %s8784_s0, %s8778_s26 }
 0x1f4   : > { %p8780_p0 = pnand %p8779_p10, %p10972_p4 }
 0x1f5   : > { %p8787_p11 = por %p8786_p6, %p8785_p12 }
 0x1f6   : > { %p8781_p1 = pneg %p8780_p0 }
 0x1f7   : > { %7548 = dma.hbm_to_vmem [thread:$0]  (%p10972_p4), %s11069_s30, 16, %s1721_s3, [#allocation33]  }
 0x1f8   : > { %p8788_p13 = pnand %p8787_p11, %p8781_p1 }
 0x1fa   : > { %8791 = shalt.err (!%p8788_p13)
}
 0x1fb   : > { %s11070_s18 = sld [smem:[#allocation127_spill]]  ;;  %s9501_s6 = smov [#allocation40]  }
 0x1fc   : > { %s1766_s4 = sshll.u32 %s9501_s6, 4  ;;  %s9502_s3 = smov [#allocation43]   ;;  %s1767_s4 = int_to_ptr.vmem [resolvable:$true] %s1766_s4 }
 0x1fd   : > { %s1790_s8 = sshll.u32 %s9502_s3, 4  ;;  %s8802_s19 = scalar_lea.vmem %s1767_s4, 16  ;;  %s1791_s8 = int_to_ptr.vmem [resolvable:$true] %s1790_s8 }
 0x1fe   : > { %p8803_p2 = scmp.ne.s32.totalorder %s1767_s4, %s8802_s19  ;;  %s8808_s30 = scalar_lea.vmem %s1767_s4, 32 }
 0x1ff   : > { %p8809_p8 = scmp.lt.s32.totalorder %s1767_s4, %s1767_s4  ;;  %p8810_p9 = scmp.lt.s32.totalorder %s8808_s30, %s8802_s19 }
 0x200   : > { %p8804_p3 = pnand %p8803_p2, %p10972_p4 }
 0x201   : > { %7552 = dma.hbm_to_vmem [thread:$0]  (%p10972_p4), %s11070_s18, 16, %s1745_s13, [#allocation36]  }
 0x202   : > { %p8805_p7 = pneg %p8804_p3  ;;  %p8811_p10 = por %p8810_p9, %p8809_p8 }
 0x204   : > { %p8812_p0 = pnand %p8811_p10, %p8805_p7 }
 0x206   : > { %8815 = shalt.err (!%p8812_p0)
}
 0x207   : > { %s11071_s26 = sld [smem:[#allocation129_spill]]  ;;  %s8826_s13 = scalar_lea.vmem %s1791_s8, 256 }
 0x208   : > { %p8827_p1 = scmp.ne.s32.totalorder %s1791_s8, %s8826_s13  ;;  %p8833_p11 = scmp.lt.s32.totalorder %s1791_s8, %s1791_s8 }
 0x209   : > { %p8834_p13 = scmp.lt.s32.totalorder %s8826_s13, %s8826_s13 }
 0x20a   : > { %p8828_p12 = pnand %p8827_p1, %p10972_p4 }
 0x20b   : > { %p8835_p2 = por %p8834_p13, %p8833_p11 }
 0x20c   : > { %p8829_p6 = pneg %p8828_p12 }
 0x20d   : > { %7556 = dma.hbm_to_vmem [thread:$0]  (%p10972_p4), %s11071_s26, 16, %s1767_s4, [#allocation39]  }
 0x20e   : > { %p8836_p3 = pnand %p8835_p2, %p8829_p6 }
 0x210   : > { %8839 = shalt.err (!%p8836_p3)
}
 0x211   : > { %s11072_s0 = sld [smem:[#allocation132_spill]]  ;;  %s9503_s18 = smov [#allocation46]  }
 0x212   : > { %s1814_s6 = sshll.u32 %s9503_s18, 4  ;;  %s9504_s4 = smov [#allocation49]   ;;  %s1815_s6 = int_to_ptr.vmem [resolvable:$true] %s1814_s6 }
 0x213   : > { %s1838_s3 = sshll.u32 %s9504_s4, 4  ;;  %s8850_s19 = scalar_lea.vmem %s1815_s6, 256  ;;  %s1839_s3 = int_to_ptr.vmem [resolvable:$true] %s1838_s3 }
 0x214   : > { %p8851_p7 = scmp.ne.s32.totalorder %s1815_s6, %s8850_s19  ;;  %p8857_p10 = scmp.lt.s32.totalorder %s1815_s6, %s1815_s6 }
 0x215   : > { %p8858_p0 = scmp.lt.s32.totalorder %s8850_s19, %s8850_s19 }
 0x216   : > { %p8852_p8 = pnand %p8851_p7, %p10972_p4 }
 0x217   : > { %7560 = dma.hbm_to_vmem [thread:$0]  (%p10972_p4), %s11072_s0, 256, %s1791_s8, [#allocation42], %s11055_s16, %s11055_s16, %s11054_s22  }
 0x218   : > { %p8853_p9 = pneg %p8852_p8  ;;  %p8859_p1 = por %p8858_p0, %p8857_p10 }
 0x21a   : > { %p8860_p12 = pnand %p8859_p1, %p8853_p9 }
 0x21c   : > { %8863 = shalt.err (!%p8860_p12)
}
 0x21d   : > { %s11073_s8 = sld [smem:[#allocation134_spill]]  ;;  %s8874_s30 = scalar_lea.vmem %s1839_s3, 256 }
 0x21e   : > { %p8875_p6 = scmp.ne.s32.totalorder %s1839_s3, %s8874_s30  ;;  %p8881_p2 = scmp.lt.s32.totalorder %s1839_s3, %s1839_s3 }
 0x21f   : > { %p8882_p3 = scmp.lt.s32.totalorder %s8874_s30, %s8874_s30 }
 0x220   : > { %p8876_p11 = pnand %p8875_p6, %p10972_p4 }
 0x221   : > { %p8883_p7 = por %p8882_p3, %p8881_p2 }
 0x222   : > { %p8877_p13 = pneg %p8876_p11 }
 0x223   : > { %7564 = dma.hbm_to_vmem [thread:$0]  (%p10972_p4), %s11073_s8, 256, %s1815_s6, [#allocation45], %s11055_s16, %s11055_s16, %s11054_s22  }
 0x224   : > { %p8884_p8 = pnand %p8883_p7, %p8877_p13 }
 0x226   : > { %8887 = shalt.err (!%p8884_p8)
}
 0x227   : > { %s11074_s26 = sld [smem:[#allocation135_spill]]  ;;  %s9505_s13 = smov [#allocation52]  }
 0x228   : > { %s1863_s0 = sshll.u32 %s9505_s13, 4  ;;  %s9506_s18 = smov [#allocation55]   ;;  %s1864_s0 = int_to_ptr.vmem [resolvable:$true] %s1863_s0 }
 0x229   : > { %s1888_s6 = sshll.u32 %s9506_s18, 4  ;;  %s8898_s4 = scalar_lea.vmem %s1864_s0, 16  ;;  %s1889_s6 = int_to_ptr.vmem [resolvable:$true] %s1888_s6 }
 0x22a   : > { %p8899_p9 = scmp.ne.s32.totalorder %s1864_s0, %s8898_s4  ;;  %s8904_s19 = scalar_lea.vmem %s1864_s0, 32 }
 0x22b   : > { %p8905_p1 = scmp.lt.s32.totalorder %s1864_s0, %s1864_s0  ;;  %p8906_p12 = scmp.lt.s32.totalorder %s8904_s19, %s8898_s4 }
 0x22c   : > { %p8900_p10 = pnand %p8899_p9, %p10972_p4 }
 0x22d   : > { %7568 = dma.hbm_to_vmem [thread:$0]  (%p10972_p4), %s11074_s26, 256, %s1839_s3, [#allocation48], %s11055_s16, %s11055_s16, %s11054_s22  }
 0x22e   : > { %p8901_p0 = pneg %p8900_p10  ;;  %p8907_p6 = por %p8906_p12, %p8905_p1 }
 0x230   : > { %p8908_p11 = pnand %p8907_p6, %p8901_p0 }
 0x232   : > { %8911 = shalt.err (!%p8908_p11)
}
 0x233   : > { %s11075_s8 = sld [smem:[#allocation137_spill]]  ;;  %s8922_s3 = scalar_lea.vmem %s1889_s6, 16 }
 0x234   : > { %p8923_p13 = scmp.ne.s32.totalorder %s1889_s6, %s8922_s3  ;;  %s8928_s30 = scalar_lea.vmem %s1889_s6, 32 }
 0x235   : > { %p8929_p7 = scmp.lt.s32.totalorder %s1889_s6, %s1889_s6  ;;  %p8930_p8 = scmp.lt.s32.totalorder %s8928_s30, %s8922_s3 }
 0x236   : > { %p8924_p2 = pnand %p8923_p13, %p10972_p4 }
 0x237   : > { %p8931_p9 = por %p8930_p8, %p8929_p7 }
 0x238   : > { %p8925_p3 = pneg %p8924_p2 }
 0x239   : > { %7572 = dma.hbm_to_vmem [thread:$0]  (%p10972_p4), %s11075_s8, 16, %s1864_s0, [#allocation51]  }
 0x23a   : > { %p8932_p10 = pnand %p8931_p9, %p8925_p3 }
 0x23c   : > { %8935 = shalt.err (!%p8932_p10)
}
 0x23d   : > { %s11076_s26 = sld [smem:[#allocation140_spill]]  ;;  %s9507_s13 = smov [#allocation58]  }
 0x23e   : > { %s1912_s18 = sshll.u32 %s9507_s13, 4  ;;  %s9508_s0 = smov [#allocation61]   ;;  %s1913_s18 = int_to_ptr.vmem [resolvable:$true] %s1912_s18 }
 0x23f   : > { %s1936_s4 = sshll.u32 %s9508_s0, 4  ;;  %s8946_s19 = scalar_lea.vmem %s1913_s18, 16  ;;  %s1937_s4 = int_to_ptr.vmem [resolvable:$true] %s1936_s4 }
 0x240   : > { %p8947_p0 = scmp.ne.s32.totalorder %s1913_s18, %s8946_s19  ;;  %s8952_s8 = scalar_lea.vmem %s1913_s18, 32 }
 0x241   : > { %p8953_p6 = scmp.lt.s32.totalorder %s1913_s18, %s1913_s18  ;;  %p8954_p11 = scmp.lt.s32.totalorder %s8952_s8, %s8946_s19 }
 0x242   : > { %p8948_p1 = pnand %p8947_p0, %p10972_p4 }
 0x243   : > { %7576 = dma.hbm_to_vmem [thread:$0]  (%p10972_p4), %s11076_s26, 16, %s1889_s6, [#allocation54]  }
 0x244   : > { %p8949_p12 = pneg %p8948_p1  ;;  %p8955_p13 = por %p8954_p11, %p8953_p6 }
 0x246   : > { %p8956_p2 = pnand %p8955_p13, %p8949_p12 }
 0x248   : > { %8959 = shalt.err (!%p8956_p2)
}
 0x249   : > { %s11077_s3 = sld [smem:[#allocation142_spill]]  ;;  %s8970_s6 = scalar_lea.vmem %s1937_s4, 16 }
 0x24a   : > { %p8971_p3 = scmp.ne.s32.totalorder %s1937_s4, %s8970_s6  ;;  %s8976_s30 = scalar_lea.vmem %s1937_s4, 32 }
 0x24b   : > { %p8977_p9 = scmp.lt.s32.totalorder %s1937_s4, %s1937_s4  ;;  %p8978_p10 = scmp.lt.s32.totalorder %s8976_s30, %s8970_s6 }
 0x24c   : > { %p8972_p7 = pnand %p8971_p3, %p10972_p4 }
 0x24d   : > { %p8979_p0 = por %p8978_p10, %p8977_p9 }
 0x24e   : > { %p8973_p8 = pneg %p8972_p7 }
 0x24f   : > { %7580 = dma.hbm_to_vmem [thread:$0]  (%p10972_p4), %s11077_s3, 16, %s1913_s18, [#allocation57]  }
 0x250   : > { %p8980_p1 = pnand %p8979_p0, %p8973_p8 }
 0x252   : > { %8983 = shalt.err (!%p8980_p1)
}
 0x253   : > { %s11078_s26 = sld [smem:[#allocation144_spill]]  ;;  %s9509_s13 = smov [#allocation64]  }
 0x254   : > { %s1961_s0 = sshll.u32 %s9509_s13, 4  ;;  %s9510_s18 = smov [#allocation67]   ;;  %s1962_s0 = int_to_ptr.vmem [resolvable:$true] %s1961_s0 }
 0x255   : > { %s1982_s19 = sshll.u32 %s9510_s18, 4  ;;  %s8994_s8 = scalar_lea.vmem %s1962_s0, 16  ;;  %s1983_s19 = int_to_ptr.vmem [resolvable:$true] %s1982_s19 }
 0x256   : > { %p8995_p12 = scmp.ne.s32.totalorder %s1962_s0, %s8994_s8  ;;  %s9000_s3 = scalar_lea.vmem %s1962_s0, 32 }
 0x257   : > { %p9001_p13 = scmp.lt.s32.totalorder %s1962_s0, %s1962_s0  ;;  %p9002_p2 = scmp.lt.s32.totalorder %s9000_s3, %s8994_s8 }
 0x258   : > { %p8996_p6 = pnand %p8995_p12, %p10972_p4 }
 0x259   : > { %7584 = dma.hbm_to_vmem [thread:$0]  (%p10972_p4), %s11078_s26, 16, %s1937_s4, [#allocation60]  }
 0x25a   : > { %p8997_p11 = pneg %p8996_p6  ;;  %p9003_p3 = por %p9002_p2, %p9001_p13 }
 0x25c   : > { %p9004_p7 = pnand %p9003_p3, %p8997_p11 }
 0x25e   : > { %9007 = shalt.err (!%p9004_p7)
}
 0x25f   : > { %s11079_s6 = sld [smem:[#allocation147_spill]]  ;;  %s9018_s4 = scalar_lea.vmem %s1983_s19, 256 }
 0x260   : > { %p9019_p8 = scmp.ne.s32.totalorder %s1983_s19, %s9018_s4  ;;  %p9025_p0 = scmp.lt.s32.totalorder %s1983_s19, %s1983_s19 }
 0x261   : > { %p9026_p1 = scmp.lt.s32.totalorder %s9018_s4, %s9018_s4 }
 0x262   : > { %p9020_p9 = pnand %p9019_p8, %p10972_p4 }
 0x263   : > { %p9027_p12 = por %p9026_p1, %p9025_p0 }
 0x264   : > { %p9021_p10 = pneg %p9020_p9 }
 0x265   : > { %7588 = dma.hbm_to_vmem [thread:$0]  (%p10972_p4), %s11079_s6, 16, %s1962_s0, [#allocation63]  }
 0x266   : > { %p9028_p6 = pnand %p9027_p12, %p9021_p10 }
 0x268   : > { %9031 = shalt.err (!%p9028_p6)
}
 0x269   : > { %s11080_s30 = sld [smem:[#allocation149_spill]]  ;;  %s9511_s26 = smov [#allocation70]  }
 0x26a   : > { %s2007_s13 = sshll.u32 %s9511_s26, 4  ;;  %s9512_s0 = smov [#allocation73]   ;;  %s2008_s13 = int_to_ptr.vmem [resolvable:$true] %s2007_s13 }
 0x26b   : > { %s2033_s18 = sshll.u32 %s9512_s0, 4  ;;  %s9042_s8 = scalar_lea.vmem %s2008_s13, 16  ;;  %s2034_s18 = int_to_ptr.vmem [resolvable:$true] %s2033_s18 }
 0x26c   : > { %p9043_p11 = scmp.ne.s32.totalorder %s2008_s13, %s9042_s8  ;;  %s9048_s3 = scalar_lea.vmem %s2008_s13, 32 }
 0x26d   : > { %p9049_p3 = scmp.lt.s32.totalorder %s2008_s13, %s2008_s13  ;;  %p9050_p7 = scmp.lt.s32.totalorder %s9048_s3, %s9042_s8 }
 0x26e   : > { %p9044_p13 = pnand %p9043_p11, %p10972_p4 }
 0x26f   : > { %7592 = dma.hbm_to_vmem [thread:$0]  (%p10972_p4), %s11080_s30, 256, %s1983_s19, [#allocation66], %s11055_s16, %s11055_s16, %s11054_s22  }
 0x270   : > { %p9045_p2 = pneg %p9044_p13  ;;  %p9051_p8 = por %p9050_p7, %p9049_p3 }
 0x272   : > { %p9052_p9 = pnand %p9051_p8, %p9045_p2 }
 0x274   : > { %9055 = shalt.err (!%p9052_p9)
}
 0x275   : > { %s11081_s6 = sld [smem:[#allocation151_spill]]  ;;  %s9066_s19 = scalar_lea.vmem %s2034_s18, 256 }
 0x276   : > { %p9067_p10 = scmp.ne.s32.totalorder %s2034_s18, %s9066_s19  ;;  %p9073_p12 = scmp.lt.s32.totalorder %s2034_s18, %s2034_s18 }
 0x277   : > { %p9074_p6 = scmp.lt.s32.totalorder %s9066_s19, %s9066_s19 }
 0x278   : > { %p9068_p0 = pnand %p9067_p10, %p10972_p4 }
 0x279   : > { %p9075_p11 = por %p9074_p6, %p9073_p12 }
 0x27a   : > { %p9069_p1 = pneg %p9068_p0 }
 0x27b   : > { %7596 = dma.hbm_to_vmem [thread:$0]  (%p10972_p4), %s11081_s6, 16, %s2008_s13, [#allocation69]  }
 0x27c   : > { %p9076_p13 = pnand %p9075_p11, %p9069_p1 }
 0x27e   : > { %9079 = shalt.err (!%p9076_p13)
}
 0x27f   : > { %s11082_s4 = sld [smem:[#allocation154_spill]] }
 0x285   : > { %7600 = dma.hbm_to_vmem [thread:$0]  (%p10972_p4), %s11082_s4, 256, %s2034_s18, [#allocation72], %s11055_s16, %s11055_s16, %s11054_s22  }
 0x286 PF: > { %s11083_s30 = sld [smem:[#allocation107_spill]]  ;;  %p7764_p2 = scmp.lt.s32.totalorder %s9406_s11, 2 }
 0x287   : > { %s10167_s26 = sand.u32 1, %s9402_s10   ;;  %s10971_s13 = sand.u32 1, %s9406_s11  }
 0x288   : > { %p10172_p3 = pnand %p7764_p2, %p9883_p5  ;;  %s10177_s22 = sshll.u32 %s9406_s11, 4 }
 0x289   : > { %s2104_s16 = scalar_lea.vmem [#allocation5], %s10167_s26  ;;  %s10184_s3 = scalar_lea.sflag [#allocation6], %s10971_s13 }
 0x28a   : > { %s2111_s18 = sshll.u32 %s2104_s16, 4  ;;  %p10188_p8 = pneg %p10172_p3  ;;  %s2112_s18 = int_to_ptr.vmem [resolvable:$true] %s2111_s18 }
 0x28c   : > { %s2109_s8 = scalar_lea.hbm %s11083_s30, %s10177_s22  ;;  %s9085_s19 = scalar_lea.hbm %s11083_s30, 32 }
 0x28d   : > { %s9080_s6 = scalar_lea.hbm %s2109_s8, 16  ;;  %p9086_p10 = scmp.lt.s32.totalorder %s2109_s8, %s11083_s30 }
 0x28e   : > { %p9081_p7 = scmp.ne.s32.totalorder %s2109_s8, %s9080_s6  ;;  %p9087_p0 = scmp.lt.s32.totalorder %s9085_s19, %s9080_s6 }
 0x290   : > { %p9083_p5 = pnand %p10188_p8, %p9081_p7  ;;  %p9088_p1 = por %p9087_p0, %p9086_p10 }
 0x292   : > { %p9084_p9 = pneg %p9083_p5 }
 0x294   : > { %p9089_p12 = pnand %p9088_p1, %p9084_p9 }
 0x296   : > { %9092 = shalt.err (!%p9089_p12)
}
 0x297   : > { %s9093_s4 = scalar_lea.vmem %s2112_s18, 16  ;;  %s9513_s16 = smov [#allocation5]  }
 0x298   : > { %p9094_p6 = scmp.ne.s32.totalorder %s2112_s18, %s9093_s4  ;;  %s9098_s13 = sshll.u32 %s9513_s16, 4  ;;  %s9099_s13 = int_to_ptr.vmem [resolvable:$false] %s9098_s13 }
 0x299   : > { %s9100_s9 = scalar_lea.vmem %s9099_s13, 32  ;;  %p9101_p2 = scmp.lt.s32.totalorder %s2112_s18, %s9099_s13 }
 0x29a   : > { %p9096_p11 = pnand %p9094_p6, %p10188_p8  ;;  %p9102_p4 = scmp.lt.s32.totalorder %s9100_s9, %s9093_s4 }
 0x29c   : > { %p9097_p13 = pneg %p9096_p11  ;;  %p9103_p7 = por %p9102_p4, %p9101_p2 }
 0x29e   : > { %p9104_p5 = pnand %p9103_p7, %p9097_p13 }
 0x2a0   : > { %9107 = shalt.err (!%p9104_p5)
}
 0x2a1   : > { %s11086_s6 = sld [smem:[#allocation109_spill]]  ;;  %s2138_s9 = scalar_lea.vmem [#allocation8], %s10167_s26 }
 0x2a2   : > { %7705 = dma.hbm_to_vmem [thread:$0]  (!%p10172_p3), %s2109_s8, 16, %s2112_s18, %s10184_s3  }
 0x2a3   : > { %s2145_s13 = sshll.u32 %s2138_s9, 4  ;;  %s11087_s4 = sand.u32 1, %s9406_s11   ;;  %s2146_s13 = int_to_ptr.vmem [resolvable:$true] %s2145_s13 }
 0x2a4   : > { %s10209_s16 = scalar_lea.sflag [#allocation9], %s11087_s4 }
 0x2a7   : > { %s10203_s19 = scalar_lea.hbm %s11086_s6, %s10177_s22  ;;  %s9113_s14 = scalar_lea.hbm %s11086_s6, 32 }
 0x2a8   : > { %s9108_s12 = scalar_lea.hbm %s10203_s19, 16  ;;  %p9114_p1 = scmp.lt.s32.totalorder %s10203_s19, %s11086_s6 }
 0x2a9   : > { %p9109_p9 = scmp.ne.s32.totalorder %s10203_s19, %s9108_s12  ;;  %p9115_p12 = scmp.lt.s32.totalorder %s9113_s14, %s9108_s12 }
 0x2ab   : > { %p9111_p10 = pnand %p9109_p9, %p10188_p8  ;;  %p9116_p6 = por %p9115_p12, %p9114_p1 }
 0x2ad   : > { %p9112_p0 = pneg %p9111_p10 }
 0x2af   : > { %p9117_p11 = pnand %p9116_p6, %p9112_p0 }
 0x2b1   : > { %9120 = shalt.err (!%p9117_p11)
}
 0x2b2   : > { %s9121_s18 = scalar_lea.vmem %s2146_s13, 16  ;;  %s9514_s8 = smov [#allocation8]  }
 0x2b3   : > { %p9122_p13 = scmp.ne.s32.totalorder %s2146_s13, %s9121_s18  ;;  %s9126_s9 = sshll.u32 %s9514_s8, 4  ;;  %s9127_s9 = int_to_ptr.vmem [resolvable:$false] %s9126_s9 }
 0x2b4   : > { %s9128_s4 = scalar_lea.vmem %s9127_s9, 32  ;;  %p9129_p5 = scmp.lt.s32.totalorder %s2146_s13, %s9127_s9 }
 0x2b5   : > { %p9124_p2 = pnand %p9122_p13, %p10188_p8  ;;  %p9130_p4 = scmp.lt.s32.totalorder %s9128_s4, %s9121_s18 }
 0x2b7   : > { %p9125_p7 = pneg %p9124_p2  ;;  %p9131_p9 = por %p9130_p4, %p9129_p5 }
 0x2b9   : > { %p9132_p10 = pnand %p9131_p9, %p9125_p7 }
 0x2bb   : > { %9135 = shalt.err (!%p9132_p10)
}
 0x2bc   : > { %s11088_s14 = sld [smem:[#allocation106_spill]]  ;;  %s6828_s8 = sshll.u32 %s10167_s26, 3 }
 0x2bd   : > { %s11089_s12 = sld [smem:[#allocation108_spill]]  ;;  %s6829_s9 = sshll.u32 %s9406_s11, 7 }
 0x2be   : > { %7711 = dma.hbm_to_vmem [thread:$0]  (!%p10172_p3), %s10203_s19, 16, %s2146_s13, %s10209_s16  }
 0x2bf   : > { %s2087_s4 = scalar_lea.vmem [#allocation2], %s6828_s8  ;;  %s2084_s20 = scalar_lea.sflag [#allocation3], %s10167_s26 }
 0x2c0   : > { %s2094_s6 = sshll.u32 %s2087_s4, 4  ;;  %s2095_s6 = int_to_ptr.vmem [resolvable:$true] %s2094_s6 }
 0x2c2   : > { %s10227_s18 = scalar_lea.hbm %s11088_s14, %s6829_s9  ;;  %s9141_s24 = scalar_lea.hbm %s11088_s14, 256 }
 0x2c3   : > { %s10231_s17 = scalar_lea.hbm %s11089_s12, %s10177_s22  ;;  %s9136_s21 = scalar_lea.hbm %s10227_s18, 128 }
 0x2c4   : > { %p9137_p4 = scmp.ne.s32.totalorder %s10227_s18, %s9136_s21  ;;  %p9142_p12 = scmp.lt.s32.totalorder %s10227_s18, %s11088_s14 }
 0x2c5   : > { %p9143_p6 = scmp.lt.s32.totalorder %s9141_s24, %s9136_s21 }
 0x2c6   : > { %p9139_p0 = pnand %p9137_p4, %p10188_p8 }
 0x2c7   : > { %p9144_p11 = por %p9143_p6, %p9142_p12 }
 0x2c8   : > { %p9140_p1 = pneg %p9139_p0 }
 0x2ca   : > { %p9145_p13 = pnand %p9144_p11, %p9140_p1 }
 0x2cc   : > { %9148 = shalt.err (!%p9145_p13)
}
 0x2cd   : > { %s9149_s19 = scalar_lea.vmem %s2095_s6, 128  ;;  %s9515_s13 = smov [#allocation2]  }
 0x2ce   : > { %p9150_p2 = scmp.ne.s32.totalorder %s2095_s6, %s9149_s19  ;;  %s9154_s8 = sshll.u32 %s9515_s13, 4  ;;  %s9155_s8 = int_to_ptr.vmem [resolvable:$false] %s9154_s8 }
 0x2cf   : > { %s9156_s9 = scalar_lea.vmem %s9155_s8, 256  ;;  %p9157_p9 = scmp.lt.s32.totalorder %s2095_s6, %s9155_s8 }
 0x2d0   : > { %p9152_p7 = pnand %p9150_p2, %p10188_p8  ;;  %p9158_p10 = scmp.lt.s32.totalorder %s9156_s9, %s9149_s19 }
 0x2d2   : > { %p9153_p5 = pneg %p9152_p7  ;;  %p9159_p4 = por %p9158_p10, %p9157_p9 }
 0x2d4   : > { %p9160_p0 = pnand %p9159_p4, %p9153_p5 }
 0x2d6   : > { %9163 = shalt.err (!%p9160_p0)
}
 0x2d7   : > { %s11090_s21 = sld [smem:[#allocation110_spill]]  ;;  %s2121_s24 = scalar_lea.vmem [#allocation7], %s10167_s26 }
 0x2d8   : > { %7702 = dma.hbm_to_vmem [thread:$0]  (!%p10172_p3), %s10227_s18, 128, %s2095_s6, %s2084_s20  }
 0x2d9   : > { %s2128_s4 = sshll.u32 %s2121_s24, 4  ;;  %s9164_s13 = scalar_lea.hbm %s10231_s17, 16  ;;  %s2129_s4 = int_to_ptr.vmem [resolvable:$true] %s2128_s4 }
 0x2da   : > { %p9165_p1 = scmp.ne.s32.totalorder %s10231_s17, %s9164_s13  ;;  %s9169_s8 = scalar_lea.hbm %s11089_s12, 32 }
 0x2db   : > { %p9170_p11 = scmp.lt.s32.totalorder %s10231_s17, %s11089_s12  ;;  %p9171_p13 = scmp.lt.s32.totalorder %s9169_s8, %s9164_s13 }
 0x2dc   : > { %p9167_p12 = pnand %p9165_p1, %p10188_p8 }
 0x2dd   : > { %s10249_s19 = scalar_lea.hbm %s11090_s21, %s10177_s22  ;;  %p9172_p2 = por %p9171_p13, %p9170_p11 }
 0x2de   : > { %p9168_p6 = pneg %p9167_p12 }
 0x2e0   : > { %p9173_p7 = pnand %p9172_p2, %p9168_p6 }
 0x2e2   : > { %9176 = shalt.err (!%p9173_p7)
}
 0x2e3   : > { %s9177_s9 = scalar_lea.vmem %s2129_s4, 16  ;;  %s9516_s20 = smov [#allocation7]  }
 0x2e4   : > { %p9178_p5 = scmp.ne.s32.totalorder %s2129_s4, %s9177_s9  ;;  %s9182_s22 = sshll.u32 %s9516_s20, 4  ;;  %s9183_s22 = int_to_ptr.vmem [resolvable:$false] %s9182_s22 }
 0x2e5   : > { %s9184_s6 = scalar_lea.vmem %s9183_s22, 32  ;;  %p9185_p4 = scmp.lt.s32.totalorder %s2129_s4, %s9183_s22 }
 0x2e6   : > { %p9180_p9 = pnand %p9178_p5, %p10188_p8  ;;  %p9186_p0 = scmp.lt.s32.totalorder %s9184_s6, %s9177_s9 }
 0x2e8   : > { %p9181_p10 = pneg %p9180_p9  ;;  %p9187_p1 = por %p9186_p0, %p9185_p4 }
 0x2ea   : > { %p9188_p12 = pnand %p9187_p1, %p9181_p10 }
 0x2ec   : > { %9191 = shalt.err (!%p9188_p12)
}
 0x2ed   : > { %7708 = dma.hbm_to_vmem [thread:$0]  (!%p10172_p3), %s10231_s17, 16, %s2129_s4, %s10184_s3  }
 0x2ee   : > { %s2155_s18 = scalar_lea.vmem [#allocation10], %s10167_s26  ;;  %s9192_s13 = scalar_lea.hbm %s10249_s19, 16 }
 0x2ef   : > { %s2162_s24 = sshll.u32 %s2155_s18, 4  ;;  %p9193_p6 = scmp.ne.s32.totalorder %s10249_s19, %s9192_s13  ;;  %s2163_s24 = int_to_ptr.vmem [resolvable:$true] %s2162_s24 }
 0x2f0   : > { %s9197_s8 = scalar_lea.hbm %s11090_s21, 32  ;;  %p9198_p2 = scmp.lt.s32.totalorder %s10249_s19, %s11090_s21 }
 0x2f1   : > { %p9195_p11 = pnand %p9193_p6, %p10188_p8  ;;  %p9199_p7 = scmp.lt.s32.totalorder %s9197_s8, %s9192_s13 }
 0x2f3   : > { %p9196_p13 = pneg %p9195_p11  ;;  %p9200_p5 = por %p9199_p7, %p9198_p2 }
 0x2f5   : > { %p9201_p9 = pnand %p9200_p5, %p9196_p13 }
 0x2f7   : > { %9204 = shalt.err (!%p9201_p9)
}
 0x2f8   : > { %s9205_s9 = scalar_lea.vmem %s2163_s24, 16  ;;  %s9517_s17 = smov [#allocation10]  }
 0x2f9   : > { %p9206_p10 = scmp.ne.s32.totalorder %s2163_s24, %s9205_s9  ;;  %s9210_s26 = sshll.u32 %s9517_s17, 4  ;;  %s9211_s26 = int_to_ptr.vmem [resolvable:$false] %s9210_s26 }
 0x2fa   : > { %s9212_s3 = scalar_lea.vmem %s9211_s26, 32  ;;  %p9213_p1 = scmp.lt.s32.totalorder %s2163_s24, %s9211_s26 }
 0x2fb   : > { %p9208_p4 = pnand %p9206_p10, %p10188_p8  ;;  %p9214_p12 = scmp.lt.s32.totalorder %s9212_s3, %s9205_s9 }
 0x2fd   : > { %p9209_p0 = pneg %p9208_p4  ;;  %p9215_p6 = por %p9214_p12, %p9213_p1 }
 0x2ff   : > { %p9216_p11 = pnand %p9215_p6, %p9209_p0 }
 0x301   : > { %9219 = shalt.err (!%p9216_p11)
}
 0x302   : > { %7714 = dma.hbm_to_vmem [thread:$0]  (!%p10172_p3), %s10249_s19, 16, %s2163_s24, %s10209_s16  }
 0x303   : > { %p11091_p13 = scmp.ne.s32.totalorder %s11041_s23, 0 }
 0x304   : > { %s10281_s28 = sand.u32 (!%p11091_p13), 1, %s9398_s7   ;;  %p11092_p8 = scmp.ne.s32.totalorder (!%p11091_p13), %s11037_s1, 0 }
 0x305   : > { %2171 = sbr.rel (%p11091_p13) target bundleno = 8601 (0x2199), region = 260  ;;  %s10284_s4 = sshll.u32 (!%p11091_p13), %s10281_s28, 3 }
 0x306   : > { %s2174_s20 = scalar_lea.sflag (!%p11091_p13), [#allocation3], %s10281_s28  ;;  %s2177_s22 = scalar_lea.vmem (!%p11091_p13), [#allocation2], %s10284_s4 }
 0x30a   : > { %9289 = dma.done.wait (%p11092_p8), %s2174_s20, 128  }
 0x30b   : > { %9291 = vsyncadd (%p11092_p8), %s2174_s20, 4294967168  ;;  %s2182_s23 = sand.u32 1, %s9865_s15   ;;  %s2185_s16 = scalar_lea.vmem [#allocation5], %s10281_s28 }
 0x30c   : > { %s2183_s0 = scalar_lea.sflag [#allocation6], %s2182_s23 }
 0x30d   : > { %9293 = dma.done.wait (%p11092_p8), %s2183_s0, 32  }
 0x30e   : > { %9295 = vsyncadd (%p11092_p8), %s2183_s0, 4294967264  ;;  %s2193_s19 = scalar_lea.vmem [#allocation7], %s10281_s28  ;;  %s2199_s6 = scalar_lea.sflag [#allocation9], %s2182_s23 }
 0x30f   : > { %s2201_s18 = scalar_lea.vmem [#allocation8], %s10281_s28 }
 0x310   : > { %9297 = dma.done.wait (%p11092_p8), %s2199_s6, 32  }
 0x311   : > { %9299 = vsyncadd (%p11092_p8), %s2199_s6, 4294967264  ;;  %s2209_s24 = scalar_lea.vmem [#allocation10], %s10281_s28  ;;  %p11093_p3 = scmp.eq.s32.totalorder %s9865_s15, 0 }
 0x313   : > { %9301 = dma.done.wait (%p11093_p3), [#allocation12], 144   ;;  %p11094_p2 = pmov %p11093_p3 }
 0x315   : > { %9303 = vsyncadd (%p11094_p2), [#allocation12], 4294967152  ;;  %p11095_p7 = pmov %p11094_p2 }
 0x316   : > { %p11096_p5 = pmov %p11094_p2 }
 0x317   : > { %9305 = dma.done.wait (%p11095_p7), [#allocation15], 272  }
 0x318   : > { %9307 = vsyncadd (%p11096_p5), [#allocation15], 4294967024  ;;  %p11097_p9 = pmov %p11094_p2 }
 0x319   : > { %p11098_p10 = pmov %p11094_p2 }
 0x31a   : > { %9309 = dma.done.wait (%p11097_p9), [#allocation18], 272  }
 0x31b   : > { %9311 = vsyncadd (%p11098_p10), [#allocation18], 4294967024  ;;  %p11099_p4 = pmov %p11094_p2 }
 0x31c   : > { %p11100_p0 = pmov %p11094_p2 }
 0x31d   : > { %9313 = dma.done.wait (%p11099_p4), [#allocation21], 272  }
 0x31e   : > { %9315 = vsyncadd (%p11100_p0), [#allocation21], 4294967024  ;;  %p11101_p1 = pmov %p11100_p0 }
 0x31f   : > { %p11102_p12 = pmov %p11100_p0 }
 0x320   : > { %9317 = dma.done.wait (%p11101_p1), [#allocation24], 32  }
 0x321   : > { %9319 = vsyncadd (%p11102_p12), [#allocation24], 4294967264  ;;  %p11103_p6 = pmov %p11100_p0 }
 0x322   : > { %p11104_p11 = pmov %p11100_p0 }
 0x323   : > { %9321 = dma.done.wait (%p11103_p6), [#allocation27], 272  }
 0x324   : > { %9323 = vsyncadd (%p11104_p11), [#allocation27], 4294967024  ;;  %p11105_p13 = pmov %p11100_p0 }
 0x325   : > { %p11106_p8 = pmov %p11100_p0 }
 0x326   : > { %9325 = dma.done.wait (%p11105_p13), [#allocation30], 272  }
 0x327   : > { %9327 = vsyncadd (%p11106_p8), [#allocation30], 4294967024  ;;  %p11107_p3 = pmov %p11100_p0 }
 0x328   : > { %p11108_p2 = pmov %p11100_p0 }
 0x329   : > { %9329 = dma.done.wait (%p11107_p3), [#allocation33], 272  }
 0x32a   : > { %9331 = vsyncadd (%p11108_p2), [#allocation33], 4294967024  ;;  %p11109_p7 = pmov %p11100_p0 }
 0x32b   : > { %p11110_p5 = pmov %p11100_p0 }
 0x32c   : > { %9333 = dma.done.wait (%p11109_p7), [#allocation36], 272  }
 0x32d   : > { %9335 = vsyncadd (%p11110_p5), [#allocation36], 4294967024  ;;  %p11111_p9 = pmov %p11100_p0 }
 0x32e   : > { %p11112_p10 = pmov %p11100_p0 }
 0x32f   : > { %9337 = dma.done.wait (%p11111_p9), [#allocation39], 32  }
 0x330   : > { %9339 = vsyncadd (%p11112_p10), [#allocation39], 4294967264  ;;  %p11113_p4 = pmov %p11100_p0 }
 0x332   : > { %9341 = dma.done.wait (%p11113_p4), [#allocation42], 272  }
 0x333   : > { %9343 = vsyncadd (%p11100_p0), [#allocation42], 4294967024  ;;  %p11114_p1 = pmov %p11100_p0 }
 0x334   : > { %p11115_p12 = pmov %p11100_p0 }
 0x335   : > { %9345 = dma.done.wait (%p11114_p1), [#allocation45], 272  }
 0x336   : > { %9347 = vsyncadd (%p11115_p12), [#allocation45], 4294967024  ;;  %p11116_p6 = pmov %p11100_p0 }
 0x337   : > { %p11117_p11 = pmov %p11100_p0 }
 0x338   : > { %9349 = dma.done.wait (%p11116_p6), [#allocation48], 272  }
 0x339   : > { %9351 = vsyncadd (%p11117_p11), [#allocation48], 4294967024  ;;  %p11118_p13 = pmov %p11100_p0 }
 0x33a   : > { %p11119_p8 = pmov %p11100_p0 }
 0x33b   : > { %9353 = dma.done.wait (%p11118_p13), [#allocation51], 32  }
 0x33c   : > { %9355 = vsyncadd (%p11119_p8), [#allocation51], 4294967264  ;;  %p11120_p3 = pmov %p11100_p0 }
 0x33d   : > { %p11121_p2 = pmov %p11100_p0 }
 0x33e   : > { %9357 = dma.done.wait (%p11120_p3), [#allocation54], 32  }
 0x33f   : > { %9359 = vsyncadd (%p11121_p2), [#allocation54], 4294967264  ;;  %p11122_p7 = pmov %p11100_p0 }
 0x340   : > { %p11123_p5 = pmov %p11100_p0 }
 0x341   : > { %9361 = dma.done.wait (%p11122_p7), [#allocation57], 272  }
 0x342   : > { %9363 = vsyncadd (%p11123_p5), [#allocation57], 4294967024  ;;  %p11124_p9 = pmov %p11100_p0 }
 0x343   : > { %p11125_p10 = pmov %p11100_p0 }
 0x344   : > { %9365 = dma.done.wait (%p11124_p9), [#allocation60], 272  }
 0x345   : > { %9367 = vsyncadd (%p11125_p10), [#allocation60], 4294967024  ;;  %p11126_p4 = pmov %p11100_p0 }
 0x347   : > { %9369 = dma.done.wait (%p11126_p4), [#allocation63], 32  }
 0x348   : > { %9371 = vsyncadd (%p11100_p0), [#allocation63], 4294967264  ;;  %p11127_p1 = pmov %p11100_p0 }
 0x349   : > { %p11128_p12 = pmov %p11100_p0 }
 0x34a   : > { %9373 = dma.done.wait (%p11127_p1), [#allocation66], 272  }
 0x34b   : > { %9375 = vsyncadd (%p11128_p12), [#allocation66], 4294967024  ;;  %p11129_p6 = pmov %p11100_p0 }
 0x34c   : > { %p11130_p11 = pmov %p11100_p0 }
 0x34d   : > { %9377 = dma.done.wait (%p11129_p6), [#allocation69], 32  }
 0x34e   : > { %9379 = vsyncadd (%p11130_p11), [#allocation69], 4294967264  ;;  %p11131_p13 = pmov %p11100_p0 }
 0x34f   : > { %p11132_p8 = pmov %p11100_p0 }
 0x350   : > { %9381 = dma.done.wait (%p11131_p13), [#allocation72], 512  }
 0x351   : > { %9383 = vsyncadd (%p11132_p8), [#allocation72], 4294966784  ;;  %s11133_s1 = sld [smem:[#allocation112_spill]]  ;;  %p2549_p3 = scmp.lt.s32.totalorder %s9865_s15, 1  ;;  %v9518_v0 = vmov 0.0   ;;  %vm9519_vm0 = vmmov 0   ;;  %v2821_v33 = vlaneseq }
 0x352   : > { %s11134_s13 = sld [smem:[#allocation103_spill]]  ;;  %7156 = vmatprep.subr.bf16.mxu1 %v9518_v0  ;;  %7148 = vmatprep.subr.bf16.mxu0 %v9518_v0  ;;  %v7954_v1 = vld [vmem:[#allocation14 + $0x8] sm:$0xff]   ;;  %v7956_v3 = vld [vmem:[#allocation14] sm:$0xff]   ;;  %vm2609_vm1 = vcmask 261120   ;;  %v6887_v7 = vld [vmem:[#allocation16] ss:$0 sm:$0xff] }
 0x353   : > { %7160 = vmatprep.mubr.msk.bf16.mxu1 %vm9519_vm0, %v9518_v0  ;;  %s2550_s8 = scalar_select %p2549_p3, %s9865_s15, 1  ;;  %7152 = vmatprep.mubr.msk.bf16.mxu0 %vm9519_vm0, %v9518_v0  ;;  %v6883_v8 = vld [vmem:[#allocation13] ss:$0 sm:$0xff]  ;;  %vm2772_vm2 = vcmask 64512   ;;  %v7959_v23 = vld [vmem:[#allocation17] sm:$0xff]   ;;  %v2822_v35 = vshrl.u32 %v2821_v33, 7 }
 0x354   : > { %7157 = vmatpush3.bf16.msra.mxu1 %v7954_v1  ;;  %s9520_s26 = smov 112   ;;  %s9521_s3 = smov 120   ;;  %v7958_v22 = vld [vmem:[#allocation17 + $0x8] sm:$0xff]   ;;  %v9523_v37 = vmov 0   ;;  %v6891_v49 = vld [vmem:[#allocation19] ss:$0 sm:$0xff] }
 0x355   : > { %s10397_s9 = sshll.u32 %s2550_s8, 3  ;;  %7158 = vmatprep.subr.bf16.mxu1 %v9518_v0  ;;  %s9522_s20 = smov 104   ;;  %v2565_v34 = vld [vmem:[%s2185_s16] sm:$0x1]  ;;  %v10450_v36 = vsub.s32 0, %v2822_v35  ;;  %v2564_v40 = vld [vmem:[#allocation11] sm:$0xff] }
 0x356   : > { %vm2819_vm3 = vcmp.ne.f32.partialorder %v2565_v34, 0.0  ;;  %vm2842_vm5 = vcmask 1043456   ;;  %s9524_s23 = smov 8   ;;  %s9525_s0 = smov 16   ;;  %vm3238_vm6 = vcmask 130048   ;;  %vm3241_vm7 = vcmask 195584  }
 0x357   : > { %v7955_v2 = vld [vmem:[%s11133_s1 + $0x8] sm:$0xff]   ;;  %v7957_v4 = vld [vmem:[%s11133_s1] sm:$0xff]   ;;  %v2820_v38 = vsel %vm2819_vm3, 1, %v9523_v37  ;;  %s9526_s16 = smov 24   ;;  %s11137_s6 = sld [smem:[#allocation104_spill]]  ;;  %vm6004_vm14 = vcmask 523264  }
 0x358   : > { %s2552_s17 = scalar_lea.vmem %s11134_s13, %s10397_s9  ;;  %7149 = vmatpush3.bf16.msra.mxu0 %v7955_v2  ;;  %7159 = vmatpush3.bf16.msra.mxu1 %v7956_v3  ;;  %v2824_v39 = vrot.slane %v2820_v38, %v10450_v36  ;;  %s11140_s8 = sld [smem:[#allocation130_spill]] }
 0x359   : > { %7150 = vmatprep.subr.bf16.mxu0 %v9518_v0  ;;  %v10405_v5 = vld [vmem:[%s2552_s17] sm:$0xff]  ;;  %7172 = vmatprep.subr.bf16.mxu1 %v9518_v0  ;;  %s11141_s17 = sld [smem:[#allocation105_spill]]  ;;  %p11150_p7 = scmp.ne.s32.totalorder %s11038_s2, 0 }
 0x35a   : > { %v2569_v6 = vpack.c.bf16 %v10405_v5, %v10405_v5  ;;  %vm10454_vm4 = vcmp.eq.s32.totalorder %v2824_v39, 1 }
 0x35c   : > { %7151 = vmatpush3.bf16.msra.mxu0 %v7957_v4  ;;  %7161 = vmatmul.mubr.msk.bf16.vlgmr.msra.gmra.mxu1 %vm2609_vm1, %v2569_v6 }
 0x35d   : > { %7164 = vmatprep.subr.bf16.mxu0 %v9518_v0  ;;  %7174 = vmatprep.mubr.msk.bf16.mxu1 %vm9519_vm0, %v9518_v0  ;;  %s2556_s13 = scalar_lea.vmem %s11137_s6, %s10397_s9 }
 0x35f   : > { %7153 = vmatmul.mubr.msk.bf16.vlgmr.msra.gmra.mxu0 %vm2609_vm1, %v2569_v6  ;;  %s2560_s6 = scalar_lea.vmem %s11141_s17, %s10397_s9  ;;  %s11143_s9 = sld [smem:[#allocation139_spill]] }
 0x360   : > { %7168 = vmatprep.mubr.msk.bf16.mxu0 %vm9519_vm0, %v9518_v0  ;;  %7165 = vmatpush3.bf16.msra.mxu0 %v7958_v22  ;;  %s9527_s17 = smov [#allocation75]  }
 0x361   : > { %7166 = vmatprep.subr.bf16.mxu0 %v9518_v0 }
 0x364   : > { %7167 = vmatpush3.bf16.msra.mxu0 %v7959_v23 }
 0x365   : > { %7178 = vmatprep.subr.bf16.mxu0 %v9518_v0 }
 0x367   : > { %7169 = vmatmul.mubr.msk.bf16.vlgmr.msra.gmra.mxu0 %vm2609_vm1, %v2569_v6 }
 0x368   : > { %7180 = vmatprep.mubr.msk.bf16.mxu0 %vm9519_vm0, %v9518_v0 }
 0x41c   : > { %v2706_v9 = vpop.f32.mrf.mxu1 }
 0x41d   : > { %v2707_v10 = vadd.f32 %v6887_v7, %v2706_v9 }
 0x41e   : > { %v7162_v13 = vpop.f32.mrf.mxu1 }
 0x41f   : > { %v2647_v11 = vpop.f32.mrf.mxu0  ;;  %v2712_v14 = vpack.c.bf16 %v2707_v10, %v2707_v10 }
 0x420   : > { %v2648_v12 = vadd.f32 %v6883_v8, %v2647_v11  ;;  %v2709_v16 = vpop.f32.mrf.mxu1 }
 0x421   : > { %v7154_v15 = vpop.f32.mrf.mxu0  ;;  %3004 = vrot.lane.b32.xlu1 %v2712_v14, %s9520_s26  ;;  %2891 = vrot.lane.b32.xlu0 %v2712_v14, %s9521_s3  ;;  %v2777_v19 = vsel %vm2772_vm2, %v2712_v14, 0 }
 0x422   : > { %v2653_v17 = vpack.c.bf16 %v2648_v12, %v2648_v12  ;;  %v7163_v20 = vpop.f32.mrf.mxu1  ;;  %7173 = vmatpush3.bf16.xpose.msra.mxu1 %v2777_v19 }
 0x423   : > { %v2650_v18 = vpop.f32.mrf.mxu0  ;;  %7184 = vmatprep.subr.bf16.mxu1 %v9518_v0 }
 0x425   : > { %v7155_v21 = vpop.f32.mrf.mxu0  ;;  %3002 = vrot.lane.b32.xlu1 %v2653_v17, %s9520_s26  ;;  %2888 = vrot.lane.b32.xlu0 %v2653_v17, %s9521_s3 }
 0x427   : > { %v2765_v50 = vpop.f32.mrf.mxu0 }
 0x428   : > { %v2766_v51 = vadd.f32 %v6891_v49, %v2765_v50 }
 0x429   : > { %3114 = vrot.lane.b32.xlu1 %v2653_v17, %s9522_s20  ;;  %3116 = vrot.lane.b32.xlu0 %v2712_v14, %s9522_s20  ;;  %v7170_v52 = vpop.f32.mrf.mxu0 }
 0x42a   : > { %7175 = vmatmul.mubr.msk.bf16.vlgmr.msra.gmra.mxu1 %vm2772_vm2, %v2653_v17  ;;  %v10461_v53 = vpack.c.bf16 %v2766_v51, %v2766_v51 }
 0x42b   : > { %7186 = vmatprep.mubr.msk.bf16.mxu1 %vm9519_vm0, %v9518_v0  ;;  %v2768_v54 = vpop.f32.mrf.mxu0 }
 0x42c   : > { %v2844_v55 = vsel %vm2842_vm5, %v10461_v53, 0 }
 0x42d   : > { %v7171_v56 = vpop.f32.mrf.mxu0  ;;  %7179 = vmatpush3.bf16.msra.mxu0 %v2844_v55 }
 0x42e   : > { %7190 = vmatprep.subr.bf16.mxu0 %v9518_v0 }
 0x493   : > { %v2892_v24 = vpop.permute.xlu0 %2891  ;;  %v3005_v26 = vpop.permute.xlu1 %3004 }
 0x494   : > { %v2897_v25 = vsel %vm2772_vm2, %v2892_v24, 0  ;;  %v3010_v28 = vsel %vm2772_vm2, %v3005_v26, 0 }
 0x495   : > { %7185 = vmatpush3.bf16.xpose.msra.mxu1 %v2897_v25 }
 0x496   : > { %7196 = vmatprep.subr.bf16.mxu1 %v9518_v0 }
 0x497   : > { %v2889_v27 = vpop.permute.xlu0 %2888  ;;  %v3003_v30 = vpop.permute.xlu1 %3002 }
 0x49b   : > { %v3117_v29 = vpop.permute.xlu0 %3116  ;;  %v3115_v32 = vpop.permute.xlu1 %3114 }
 0x49c   : > { %7187 = vmatmul.mubr.msk.bf16.vlgmr.msra.gmra.mxu1 %vm2772_vm2, %v2889_v27  ;;  %v3122_v31 = vsel %vm2772_vm2, %v3117_v29, 0 }
 0x49d   : > { %7197 = vmatpush3.bf16.xpose.msra.mxu1 %v3010_v28  ;;  %7198 = vmatprep.mubr.msk.bf16.mxu1 %vm9519_vm0, %v9518_v0 }
 0x49e   : > { %7208 = vmatprep.subr.bf16.mxu1 %v9518_v0 }
 0x4a4   : > { %7199 = vmatmul.mubr.msk.bf16.vlgmr.msra.gmra.mxu1 %vm2772_vm2, %v3003_v30 }
 0x4a5   : > { %7209 = vmatpush3.bf16.xpose.msra.mxu1 %v3122_v31  ;;  %7210 = vmatprep.mubr.msk.bf16.mxu1 %vm9519_vm0, %v9518_v0 }
 0x4a6   : > { %7220 = vmatprep.subr.bf16.mxu1 %v9518_v0 }
 0x4ac   : > { %7211 = vmatmul.mubr.msk.bf16.vlgmr.msra.gmra.mxu1 %vm2772_vm2, %v3115_v32 }
 0x4ad   : > { %7224 = vmatprep.mubr.msk.bf16.mxu1 %vm9519_vm0, %v9518_v0 }
 0x4ea   : > { %v2813_v41 = vpop.f32.mrf.mxu1 }
 0x4eb   : > { %v2814_v43 = vadd.f32 %v2813_v41, %v2564_v40 }
 0x4ec   : > { %v7176_v44 = vpop.f32.mrf.mxu1 }
 0x4ed   : > { %v2826_v45 = vsel %vm10454_vm4, -1e+30, %v2814_v43 }
 0x4ee   : > { %v2816_v46 = vpop.f32.mrf.mxu1  ;;  %v2827_v47 = vsel %vm2772_vm2, %v2826_v45, -inf }
 0x4ef   : > { %2828 = vmax.xlane.f32.xlu0 %v2827_v47 }
 0x4f0   : > { %v7177_v48 = vpop.f32.mrf.mxu1 }
 0x55c   : > { %v2933_v57 = vpop.f32.mrf.mxu1 }
 0x55d   : > { %v2934_v58 = vadd.f32 %v2933_v57, %v2564_v40 }
 0x55e   : > { %v7188_v59 = vpop.f32.mrf.mxu1 }
 0x55f   : > { %v2939_v60 = vsel %vm10454_vm4, -1e+30, %v2934_v58 }
 0x560   : > { %v2936_v61 = vpop.f32.mrf.mxu1  ;;  %v2940_v62 = vsel %vm2772_vm2, %v2939_v60, -inf }
 0x561   : > { %2941 = vmax.xlane.f32.xlu1 %v2940_v62 }
 0x562   : > { %v7189_v63 = vpop.f32.mrf.mxu1 }
 0x564   : > { %v3046_v1 = vpop.f32.mrf.mxu1 }
 0x565   : > { %v3047_v2 = vadd.f32 %v3046_v1, %v2564_v40 }
 0x566   : > { %v7200_v3 = vpop.f32.mrf.mxu1 }
 0x567   : > { %v3052_v4 = vsel %vm10454_vm4, -1e+30, %v3047_v2  ;;  %v7960_v2 = vld [vmem:[#allocation20 + $0x8] sm:$0xff]  }
 0x568   : > { %v3049_v6 = vpop.f32.mrf.mxu1  ;;  %v3053_v7 = vsel %vm2772_vm2, %v3052_v4, -inf  ;;  %7221 = vmatpush3.bf16.msra.mxu1 %v7960_v2 }
 0x569   : > { %3054 = vmax.xlane.f32.xlu0 %v3053_v7  ;;  %7222 = vmatprep.subr.bf16.mxu1 %v9518_v0 }
 0x56a   : > { %v7201_v8 = vpop.f32.mrf.mxu1 }
 0x56c   : > { %v3158_v9 = vpop.f32.mrf.mxu1 }
 0x56d   : > { %v3159_v10 = vadd.f32 %v3158_v9, %v2564_v40 }
 0x56e   : > { %v7212_v11 = vpop.f32.mrf.mxu1 }
 0x56f   : > { %v3164_v12 = vsel %vm10454_vm4, -1e+30, %v3159_v10 }
 0x570   : > { %v3161_v13 = vpop.f32.mrf.mxu1  ;;  %v3165_v14 = vsel %vm2772_vm2, %v3164_v12, -inf }
 0x571   : > { %3166 = vmax.xlane.f32.xlu0 %v3165_v14 }
 0x572   : > { %v7213_v15 = vpop.f32.mrf.mxu1 }
 0x578   : > { %v2829_v16 = vpop.xlane.xlu0 %2828 }
 0x579   : > { %v2830_v17 = vsub.f32 %v2826_v45, %v2829_v16 }
 0x57b   : > { %v2831_v18 = vmul.f32 1.442695, %v2830_v17 }
 0x57d   : > { %7998 = vpow2.f32 %v2831_v18 }
 0x58a   : > { %v7999_v19 = vpop.eup %7998 }
 0x58b   : > { %v2833_v20 = vsel %vm2772_vm2, %v7999_v19, 0.0 }
 0x58c   : > { %2834 = vadd.xlane.f32.xlu1 %v2833_v20 }
 0x59d   : > { %2953 = vrot.lane.b32.xlu1 %v10461_v53, %s9521_s3 }
 0x5ea   : > { %v2942_v21 = vpop.xlane.xlu1 %2941 }
 0x5eb   : > { %v2943_v22 = vsub.f32 %v2939_v60, %v2942_v21 }
 0x5ed   : > { %v2944_v23 = vmul.f32 1.442695, %v2943_v22 }
 0x5ef   : > { %8000 = vpow2.f32 %v2944_v23 }
 0x5f2   : > { %v3055_v24 = vpop.xlane.xlu0 %3054 }
 0x5f3   : > { %v3056_v25 = vsub.f32 %v3052_v4, %v3055_v24  ;;  %v7961_v4 = vld [vmem:[#allocation20] sm:$0xff]  }
 0x5f4   : > { %7223 = vmatpush3.bf16.msra.mxu1 %v7961_v4 }
 0x5f5   : > { %v3057_v26 = vmul.f32 1.442695, %v3056_v25  ;;  %7236 = vmatprep.subr.bf16.mxu1 %v9518_v0 }
 0x5f7   : > { %8002 = vpow2.f32 %v3057_v26 }
 0x5fa   : > { %v3167_v27 = vpop.xlane.xlu0 %3166 }
 0x5fb   : > { %v3168_v28 = vsub.f32 %v3164_v12, %v3167_v27  ;;  %v6903_v27 = vld [vmem:[#allocation22] ss:$0 sm:$0xff] }
 0x5fc   : > { %v8001_v29 = vpop.eup %8000 }
 0x5fd   : > { %v3169_v30 = vmul.f32 1.442695, %v3168_v28  ;;  %v2946_v31 = vsel %vm2772_vm2, %v8001_v29, 0.0 }
 0x5fe   : > { %2947 = vadd.xlane.f32.xlu0 %v2946_v31 }
 0x5ff   : > { %8004 = vpow2.f32 %v3169_v30 }
 0x604   : > { %v8003_v32 = vpop.eup %8002 }
 0x605   : > { %v3059_v33 = vsel %vm2772_vm2, %v8003_v32, 0.0 }
 0x606   : > { %3060 = vadd.xlane.f32.xlu1 %v3059_v33 }
 0x60c   : > { %v8005_v34 = vpop.eup %8004 }
 0x60d   : > { %v3171_v35 = vsel %vm2772_vm2, %v8005_v34, 0.0 }
 0x60e   : > { %3172 = vadd.xlane.f32.xlu0 %v3171_v35 }
 0x615   : > { %v2835_v38 = vpop.xlane.xlu1 %2834 }
 0x616   : > { %8006 = vrcp.f32 %v2835_v38 }
 0x617   : > { %3177 = vrot.lane.b32.xlu1 %v10461_v53, %s9522_s20 }
 0x619   : > { %v2954_v40 = vpop.permute.xlu1 %2953 }
 0x61a   : > { %v2959_v44 = vsel %vm2842_vm5, %v2954_v40, 0 }
 0x623   : > { %v8007_v39 = vpop.eup %8006 }
 0x624   : > { %3065 = vrot.lane.b32.xlu0 %v10461_v53, %s9520_s26  ;;  %v2837_v41 = vmul.f32 %v8007_v39, %v7999_v19 }
 0x626   : > { %v2838_v43 = vpack.c.bf16 %v2837_v41, %v2837_v41 }
 0x628   : > { %7181 = vmatmul.mubr.msk.bf16.vlgmr.msra.gmra.mxu0 %vm2772_vm2, %v2838_v43  ;;  %v7962_v43 = vld [vmem:[#allocation29 + $0x8] sm:$0xff]  }
 0x629   : > { %7191 = vmatpush3.bf16.msra.mxu0 %v2959_v44  ;;  %7192 = vmatprep.mubr.msk.bf16.mxu0 %vm9519_vm0, %v9518_v0  ;;  %v7963_v44 = vld [vmem:[#allocation29] sm:$0xff]  }
 0x62a   : > { %7202 = vmatprep.subr.bf16.mxu0 %v9518_v0 }
 0x687   : > { %v2948_v45 = vpop.xlane.xlu0 %2947 }
 0x688   : > { %8008 = vrcp.f32 %v2948_v45 }
 0x68f   : > { %v3061_v46 = vpop.xlane.xlu1 %3060 }
 0x690   : > { %8010 = vrcp.f32 %v3061_v46  ;;  %v7964_v46 = vld [vmem:[#allocation26 + $0x8] sm:$0xff]  }
 0x693   : > { %v3178_v55 = vpop.permute.xlu1 %3177 }
 0x694   : > { %v3183_v57 = vsel %vm2842_vm5, %v3178_v55, 0 }
 0x695   : > { %v8009_v47 = vpop.eup %8008 }
 0x696   : > { %v2950_v48 = vmul.f32 %v8009_v47, %v8001_v29  ;;  %v7965_v47 = vld [vmem:[#allocation26] sm:$0xff]  }
 0x697   : > { %v3173_v49 = vpop.xlane.xlu0 %3172 }
 0x698   : > { %8012 = vrcp.f32 %v3173_v49  ;;  %v2951_v50 = vpack.c.bf16 %v2950_v48, %v2950_v48 }
 0x69a   : > { %7193 = vmatmul.mubr.msk.bf16.vlgmr.msra.gmra.mxu0 %vm2772_vm2, %v2951_v50 }
 0x69b   : > { %v3066_v51 = vpop.permute.xlu0 %3065  ;;  %7204 = vmatprep.mubr.msk.bf16.mxu0 %vm9519_vm0, %v9518_v0 }
 0x69c   : > { %v3071_v52 = vsel %vm2842_vm5, %v3066_v51, 0 }
 0x69d   : > { %v8011_v53 = vpop.eup %8010  ;;  %7203 = vmatpush3.bf16.msra.mxu0 %v3071_v52  ;;  %v6907_v52 = vld [vmem:[#allocation23] ss:$0 sm:$0xff] }
 0x69e   : > { %7214 = vmatprep.subr.bf16.mxu0 %v9518_v0  ;;  %v3063_v54 = vmul.f32 %v8011_v53, %v8003_v32 }
 0x6a0   : > { %v3064_v56 = vpack.c.bf16 %v3063_v54, %v3063_v54  ;;  %v6908_v54 = vld [vmem:[#allocation25] ss:$0 sm:$0xff] }
 0x6a2   : > { %7205 = vmatmul.mubr.msk.bf16.vlgmr.msra.gmra.mxu0 %vm2772_vm2, %v3064_v56 }
 0x6a3   : > { %7215 = vmatpush3.bf16.msra.mxu0 %v3183_v57  ;;  %7216 = vmatprep.mubr.msk.bf16.mxu0 %vm9519_vm0, %v9518_v0 }
 0x6a4   : > { %7228 = vmatprep.subr.bf16.mxu0 %v9518_v0 }
 0x6a5   : > { %v8013_v58 = vpop.eup %8012 }
 0x6a6   : > { %v3175_v59 = vmul.f32 %v8013_v58, %v8005_v34  ;;  %v6913_v58 = vld [vmem:[#allocation31] ss:$0 sm:$0xff] }
 0x6a8   : > { %v3176_v60 = vpack.c.bf16 %v3175_v59, %v3175_v59 }
 0x6aa   : > { %7217 = vmatmul.mubr.msk.bf16.vlgmr.msra.gmra.mxu0 %vm2772_vm2, %v3176_v60 }
 0x6ab   : > { %7232 = vmatprep.mubr.msk.bf16.mxu0 %vm9519_vm0, %v9518_v0  ;;  %7229 = vmatpush3.bf16.msra.mxu0 %v7964_v46 }
 0x6ac   : > { %7230 = vmatprep.subr.bf16.mxu0 %v9518_v0 }
 0x6af   : > { %7231 = vmatpush3.bf16.msra.mxu0 %v7965_v47 }
 0x6b0   : > { %7244 = vmatprep.subr.bf16.mxu0 %v9518_v0 }
 0x6e8   : > { %v2880_v61 = vpop.f32.mrf.mxu0 }
 0x6e9   : > { %v2886_v21 = vpack.c.bf16 %v2880_v61, %v2880_v61 }
 0x6ea   : > { %v7182_v62 = vpop.f32.mrf.mxu0 }
 0x6ec   : > { %v2883_v63 = vpop.f32.mrf.mxu0 }
 0x6ee   : > { %v7183_v1 = vpop.f32.mrf.mxu0 }
 0x75a   : > { %v2995_v3 = vpop.f32.mrf.mxu0 }
 0x75b   : > { %v3001_v6 = vpack.c.bf16 %v2995_v3, %v2995_v3  ;;  %v6909_v3 = vld [vmem:[#allocation28] ss:$0 sm:$0xff] }
 0x75c   : > { %v7194_v7 = vpop.f32.mrf.mxu0 }
 0x75d   : > { %3227 = vrot.lane.b32.xlu1 %v3001_v6, %s9524_s23 }
 0x75e   : > { %v2998_v8 = vpop.f32.mrf.mxu0 }
 0x760   : > { %v7195_v9 = vpop.f32.mrf.mxu0 }
 0x762   : > { %v3107_v10 = vpop.f32.mrf.mxu0 }
 0x763   : > { %v3113_v11 = vpack.c.bf16 %v3107_v10, %v3107_v10 }
 0x764   : > { %v7206_v12 = vpop.f32.mrf.mxu0 }
 0x765   : > { %3230 = vrot.lane.b32.xlu0 %v3113_v11, %s9525_s0 }
 0x766   : > { %v3110_v13 = vpop.f32.mrf.mxu0 }
 0x767   : > { %v7966_v13 = vld [vmem:[#allocation32 + $0x8] sm:$0xff]  }
 0x768   : > { %v7207_v14 = vpop.f32.mrf.mxu0 }
 0x769   : > { %v7967_v14 = vld [vmem:[#allocation32] sm:$0xff]  }
 0x76a   : > { %v3219_v15 = vpop.f32.mrf.mxu0 }
 0x76b   : > { %v3225_v16 = vpack.c.bf16 %v3219_v15, %v3219_v15 }
 0x76c   : > { %v7218_v17 = vpop.f32.mrf.mxu0 }
 0x76d   : > { %3233 = vrot.lane.b32.xlu1 %v3225_v16, %s9526_s16 }
 0x76e   : > { %v3222_v18 = vpop.f32.mrf.mxu0 }
 0x770   : > { %v7219_v19 = vpop.f32.mrf.mxu0 }
 0x7cf   : > { %v3228_v20 = vpop.permute.xlu1 %3227 }
 0x7d0   : > { %v3237_v23 = vsel %vm2772_vm2, %v2886_v21, %v3228_v20 }
 0x7d7   : > { %v3231_v22 = vpop.permute.xlu0 %3230 }
 0x7d8   : > { %v3240_v24 = vsel %vm3238_vm6, %v3237_v23, %v3231_v22  ;;  %v2566_v22 = vld [vmem:[%s2193_s19] sm:$0x1]  ;;  %s2548_s19 = scalar_lea.vmem [#allocation75], %s10284_s4 }
 0x7d9   : > { %vm3585_vm8 = vcmp.ne.f32.partialorder %v2566_v22, 0.0 }
 0x7da   : > { %v3586_v23 = vsel %vm3585_vm8, 1, %v9523_v37 }
 0x7df   : > { %v3234_v25 = vpop.permute.xlu1 %3233 }
 0x7e0   : > { %v3243_v26 = vsel %vm3241_vm7, %v3240_v24, %v3234_v25  ;;  %v3590_v24 = vrot.slane %v3586_v23, %v10450_v36 }
 0x7e1   : > { %7225 = vmatmul.mubr.msk.bf16.vlgmr.msra.gmra.mxu1 %vm2609_vm1, %v3243_v26 }
 0x7e2   : > { %7240 = vmatprep.mubr.msk.bf16.mxu1 %vm9519_vm0, %v9518_v0  ;;  %7237 = vmatpush3.bf16.msra.mxu1 %v7962_v43  ;;  %vm10572_vm9 = vcmp.eq.s32.totalorder %v3590_v24, 1 }
 0x7e3   : > { %7238 = vmatprep.subr.bf16.mxu1 %v9518_v0 }
 0x7e6   : > { %7239 = vmatpush3.bf16.msra.mxu1 %v7963_v44 }
 0x7e7   : > { %7252 = vmatprep.subr.bf16.mxu1 %v9518_v0 }
 0x8a1   : > { %v3298_v28 = vpop.f32.mrf.mxu1 }
 0x8a2   : > { %v3299_v29 = vadd.f32 %v6903_v27, %v3298_v28 }
 0x8a3   : > { %v7226_v30 = vpop.f32.mrf.mxu1 }
 0x8a4   : > { %v3304_v31 = vadd.f32 %v3299_v29, %v10405_v5  ;;  %v2563_v5 = vld [vmem:[%s2556_s13] sm:$0xff]  ;;  %s11142_s13 = sld [smem:[#allocation153_spill]] }
 0x8a5   : > { %v3301_v32 = vpop.f32.mrf.mxu1  ;;  %v10520_v45 = vpack.c.bf16 %v2563_v5, %v2563_v5 }
 0x8a6   : > { %v3307_v33 = vsel %vm2609_vm1, %v3304_v31, 0.0  ;;  %v6917_v32 = vld [vmem:[#allocation34] ss:$0 sm:$0xff] }
 0x8a7   : > { %3308 = vadd.xlane.f32.xlu0 %v3307_v33  ;;  %v7227_v34 = vpop.f32.mrf.mxu1  ;;  %7241 = vmatmul.mubr.msk.bf16.vlgmr.msra.gmra.mxu1 %vm2609_vm1, %v10520_v45 }
 0x8a8   : > { %7254 = vmatprep.mubr.msk.bf16.mxu1 %vm9519_vm0, %v9518_v0 }
 0x930   : > { %v3309_v35 = vpop.xlane.xlu0 %3308 }
 0x931   : > { %v3311_v38 = vmul.f32 0.03125, %v3309_v35 }
 0x933   : > { %v3312_v39 = vsub.f32 %v3304_v31, %v3311_v38 }
 0x935   : > { %v3313_v40 = vmul.f32 %v3312_v39, %v3312_v39 }
 0x937   : > { %v3314_v41 = vsel %vm2609_vm1, %v3313_v40, 0.0 }
 0x938   : > { %3315 = vadd.xlane.f32.xlu1 %v3314_v41 }
 0x967   : > { %v3473_v59 = vpop.f32.mrf.mxu1 }
 0x968   : > { %v3474_v60 = vadd.f32 %v6913_v58, %v3473_v59 }
 0x969   : > { %v7242_v61 = vpop.f32.mrf.mxu1 }
 0x96a   : > { %v3479_v62 = vpack.c.bf16 %v3474_v60, %v3474_v60 }
 0x96b   : > { %v3476_v63 = vpop.f32.mrf.mxu1 }
 0x96c   : > { %3656 = vrot.lane.b32.xlu0 %v3479_v62, %s9521_s3  ;;  %v3543_v1 = vsel %vm2772_vm2, %v3479_v62, 0 }
 0x96d   : > { %v7243_v2 = vpop.f32.mrf.mxu1  ;;  %7253 = vmatpush3.bf16.xpose.msra.mxu1 %v3543_v1 }
 0x96e   : > { %7264 = vmatprep.subr.bf16.mxu1 %v9518_v0 }
 0x970   : > { %3770 = vrot.lane.b32.xlu0 %v3479_v62, %s9520_s26 }
 0x974   : > { %3883 = vrot.lane.b32.xlu0 %v3479_v62, %s9522_s20 }
 0x9c1   : > { %v3316_v48 = vpop.xlane.xlu1 %3315 }
 0x9c2   : > { %v3317_v49 = vmul.f32 0.03125, %v3316_v48 }
 0x9c4   : > { %v3318_v50 = vadd.f32 1e-05, %v3317_v49 }
 0x9c6   : > { %8014 = vrsqrt.f32 %v3318_v50 }
 0x9d3   : > { %v8015_v51 = vpop.eup %8014 }
 0x9d4   : > { %v3320_v53 = vmul.f32 %v8015_v51, %v3312_v39 }
 0x9d6   : > { %v3327_v55 = vmul.f32 %v6907_v52, %v3320_v53 }
 0x9d8   : > { %v10529_v56 = vadd.f32 %v6908_v54, %v3327_v55 }
 0x9da   : > { %v3335_v57 = vpack.c.bf16 %v10529_v56, %v10529_v56 }
 0x9dc   : > { %7233 = vmatmul.mubr.msk.bf16.vlgmr.msra.gmra.mxu0 %vm2609_vm1, %v3335_v57 }
 0x9dd   : > { %7248 = vmatprep.mubr.msk.bf16.mxu0 %vm9519_vm0, %v9518_v0  ;;  %7245 = vmatpush3.bf16.msra.mxu0 %v7966_v13 }
 0x9de   : > { %v3657_v8 = vpop.permute.xlu0 %3656  ;;  %7246 = vmatprep.subr.bf16.mxu0 %v9518_v0 }
 0x9df   : > { %v3662_v10 = vsel %vm2772_vm2, %v3657_v8, 0 }
 0x9e1   : > { %7247 = vmatpush3.bf16.msra.mxu0 %v7967_v14 }
 0x9e2   : > { %7258 = vmatprep.subr.bf16.mxu0 %v9518_v0  ;;  %v3771_v15 = vpop.permute.xlu0 %3770 }
 0x9e3   : > { %v3776_v17 = vsel %vm2772_vm2, %v3771_v15, 0 }
 0x9e4   : > { %7249 = vmatmul.mubr.msk.bf16.vlgmr.msra.gmra.mxu0 %vm2609_vm1, %v10520_v45 }
 0x9e5   : > { %7260 = vmatprep.mubr.msk.bf16.mxu0 %vm9519_vm0, %v9518_v0 }
 0x9e6   : > { %v3884_v18 = vpop.permute.xlu0 %3883 }
 0x9e7   : > { %v3889_v20 = vsel %vm2772_vm2, %v3884_v18, 0 }
 0xa9c   : > { %v3411_v4 = vpop.f32.mrf.mxu0 }
 0xa9d   : > { %v3412_v6 = vadd.f32 %v6909_v3, %v3411_v4 }
 0xa9e   : > { %v7234_v7 = vpop.f32.mrf.mxu0 }
 0xa9f   : > { %v3417_v9 = vpack.c.bf16 %v3412_v6, %v3412_v6 }
 0xaa0   : > { %v3414_v11 = vpop.f32.mrf.mxu0 }
 0xaa1   : > { %3653 = vrot.lane.b32.xlu1 %v3417_v9, %s9521_s3  ;;  %7255 = vmatmul.mubr.msk.bf16.vlgmr.msra.gmra.mxu1 %vm2772_vm2, %v3417_v9 }
 0xaa2   : > { %v7235_v12 = vpop.f32.mrf.mxu0  ;;  %7265 = vmatpush3.bf16.xpose.msra.mxu1 %v3662_v10  ;;  %7266 = vmatprep.mubr.msk.bf16.mxu1 %vm9519_vm0, %v9518_v0 }
 0xaa3   : > { %7276 = vmatprep.subr.bf16.mxu1 %v9518_v0 }
 0xaa4   : > { %v3532_v33 = vpop.f32.mrf.mxu0 }
 0xaa5   : > { %3768 = vrot.lane.b32.xlu1 %v3417_v9, %s9520_s26  ;;  %v3533_v34 = vadd.f32 %v6917_v32, %v3532_v33 }
 0xaa6   : > { %v7250_v35 = vpop.f32.mrf.mxu0 }
 0xaa7   : > { %v3538_v38 = vpack.c.bf16 %v3533_v34, %v3533_v34 }
 0xaa8   : > { %v3535_v39 = vpop.f32.mrf.mxu0 }
 0xaa9   : > { %3881 = vrot.lane.b32.xlu1 %v3417_v9, %s9522_s20  ;;  %v3609_v40 = vsel %vm2842_vm5, %v3538_v38, 0 }
 0xaaa   : > { %v7251_v41 = vpop.f32.mrf.mxu0  ;;  %7259 = vmatpush3.bf16.msra.mxu0 %v3609_v40 }
 0xaab   : > { %7270 = vmatprep.subr.bf16.mxu0 %v9518_v0 }
 0xb13   : > { %v3654_v16 = vpop.permute.xlu1 %3653 }
 0xb14   : > { %7267 = vmatmul.mubr.msk.bf16.vlgmr.msra.gmra.mxu1 %vm2772_vm2, %v3654_v16 }
 0xb15   : > { %7277 = vmatpush3.bf16.xpose.msra.mxu1 %v3776_v17  ;;  %7278 = vmatprep.mubr.msk.bf16.mxu1 %vm9519_vm0, %v9518_v0 }
 0xb16   : > { %7288 = vmatprep.subr.bf16.mxu1 %v9518_v0 }
 0xb17   : > { %v3769_v19 = vpop.permute.xlu1 %3768 }
 0xb1b   : > { %v3882_v21 = vpop.permute.xlu1 %3881 }
 0xb1c   : > { %7279 = vmatmul.mubr.msk.bf16.vlgmr.msra.gmra.mxu1 %vm2772_vm2, %v3769_v19 }
 0xb1d   : > { %7289 = vmatpush3.bf16.xpose.msra.mxu1 %v3889_v20  ;;  %7290 = vmatprep.mubr.msk.bf16.mxu1 %vm9519_vm0, %v9518_v0 }
 0xb1e   : > { %7300 = vmatprep.subr.bf16.mxu1 %v9518_v0 }
 0xb24   : > { %7291 = vmatmul.mubr.msk.bf16.vlgmr.msra.gmra.mxu1 %vm2772_vm2, %v3882_v21 }
 0xb25   : > { %7304 = vmatprep.mubr.msk.bf16.mxu1 %vm9519_vm0, %v9518_v0 }
 0xb61   : > { %v3579_v26 = vpop.f32.mrf.mxu1 }
 0xb62   : > { %v3592_v27 = vsel %vm10572_vm9, -1e+30, %v3579_v26 }
 0xb63   : > { %v7256_v28 = vpop.f32.mrf.mxu1  ;;  %v3593_v29 = vsel %vm2772_vm2, %v3592_v27, -inf }
 0xb64   : > { %3594 = vmax.xlane.f32.xlu0 %v3593_v29 }
 0xb65   : > { %v3582_v30 = vpop.f32.mrf.mxu1 }
 0xb67   : > { %v7257_v31 = vpop.f32.mrf.mxu1 }
 0xbd4   : > { %v3698_v43 = vpop.f32.mrf.mxu1 }
 0xbd5   : > { %v3704_v44 = vsel %vm10572_vm9, -1e+30, %v3698_v43 }
 0xbd6   : > { %v7268_v5 = vpop.f32.mrf.mxu1  ;;  %v3705_v46 = vsel %vm2772_vm2, %v3704_v44, -inf }
 0xbd7   : > { %3706 = vmax.xlane.f32.xlu1 %v3705_v46 }
 0xbd8   : > { %v3701_v47 = vpop.f32.mrf.mxu1 }
 0xbda   : > { %v7269_v48 = vpop.f32.mrf.mxu1 }
 0xbdc   : > { %v3812_v49 = vpop.f32.mrf.mxu1 }
 0xbdd   : > { %v3818_v50 = vsel %vm10572_vm9, -1e+30, %v3812_v49 }
 0xbde   : > { %v7280_v51 = vpop.f32.mrf.mxu1  ;;  %v3819_v52 = vsel %vm2772_vm2, %v3818_v50, -inf }
 0xbdf   : > { %3820 = vmax.xlane.f32.xlu0 %v3819_v52 }
 0xbe0   : > { %v3815_v53 = vpop.f32.mrf.mxu1 }
 0xbe1   : > { %v7968_v53 = vld [vmem:[#allocation35 + $0x8] sm:$0xff]  }
 0xbe2   : > { %v7281_v54 = vpop.f32.mrf.mxu1  ;;  %7301 = vmatpush3.bf16.msra.mxu1 %v7968_v53  ;;  %v6939_v53 = vld [vmem:[#allocation44] ss:$0 sm:$0xff] }
 0xbe3   : > { %7302 = vmatprep.subr.bf16.mxu1 %v9518_v0 }
 0xbe4   : > { %v3925_v55 = vpop.f32.mrf.mxu1 }
 0xbe5   : > { %v3931_v57 = vsel %vm10572_vm9, -1e+30, %v3925_v55  ;;  %v7969_v55 = vld [vmem:[#allocation35] sm:$0xff]  }
 0xbe6   : > { %v7292_v58 = vpop.f32.mrf.mxu1  ;;  %v3932_v59 = vsel %vm2772_vm2, %v3931_v57, -inf  ;;  %7303 = vmatpush3.bf16.msra.mxu1 %v7969_v55 }
 0xbe7   : > { %3933 = vmax.xlane.f32.xlu0 %v3932_v59  ;;  %7316 = vmatprep.subr.bf16.mxu1 %v9518_v0 }
 0xbe8   : > { %v3928_v60 = vpop.f32.mrf.mxu1 }
 0xbea   : > { %v7293_v61 = vpop.f32.mrf.mxu1 }
 0xbed   : > { %v3595_v62 = vpop.xlane.xlu0 %3594 }
 0xbee   : > { %v3596_v63 = vsub.f32 %v3592_v27, %v3595_v62 }
 0xbf0   : > { %v3597_v1 = vmul.f32 1.442695, %v3596_v63 }
 0xbf2   : > { %8016 = vpow2.f32 %v3597_v1 }
 0xbff   : > { %v8017_v2 = vpop.eup %8016 }
 0xc00   : > { %v3599_v3 = vsel %vm2772_vm2, %v8017_v2, 0.0 }
 0xc01   : > { %3600 = vadd.xlane.f32.xlu1 %v3599_v3 }
 0xc12   : > { %3718 = vrot.lane.b32.xlu1 %v3538_v38, %s9521_s3 }
 0xc60   : > { %v3707_v4 = vpop.xlane.xlu1 %3706 }
 0xc61   : > { %v3708_v6 = vsub.f32 %v3704_v44, %v3707_v4 }
 0xc63   : > { %v3709_v7 = vmul.f32 1.442695, %v3708_v6 }
 0xc65   : > { %8018 = vpow2.f32 %v3709_v7 }
 0xc68   : > { %v3821_v8 = vpop.xlane.xlu0 %3820 }
 0xc69   : > { %v3822_v9 = vsub.f32 %v3818_v50, %v3821_v8 }
 0xc6b   : > { %v3823_v10 = vmul.f32 1.442695, %v3822_v9 }
 0xc6d   : > { %8020 = vpow2.f32 %v3823_v10 }
 0xc70   : > { %v3934_v11 = vpop.xlane.xlu0 %3933 }
 0xc71   : > { %v3935_v12 = vsub.f32 %v3931_v57, %v3934_v11 }
 0xc72   : > { %v8019_v13 = vpop.eup %8018 }
 0xc73   : > { %v3936_v14 = vmul.f32 1.442695, %v3935_v12  ;;  %v3711_v15 = vsel %vm2772_vm2, %v8019_v13, 0.0 }
 0xc74   : > { %3712 = vadd.xlane.f32.xlu0 %v3711_v15 }
 0xc75   : > { %8022 = vpow2.f32 %v3936_v14 }
 0xc7a   : > { %v8021_v16 = vpop.eup %8020 }
 0xc7b   : > { %v3825_v17 = vsel %vm2772_vm2, %v8021_v16, 0.0 }
 0xc7c   : > { %3826 = vadd.xlane.f32.xlu1 %v3825_v17 }
 0xc82   : > { %v8023_v18 = vpop.eup %8022 }
 0xc83   : > { %v3938_v19 = vsel %vm2772_vm2, %v8023_v18, 0.0 }
 0xc84   : > { %3939 = vadd.xlane.f32.xlu0 %v3938_v19 }
 0xc8a   : > { %v3601_v20 = vpop.xlane.xlu1 %3600 }
 0xc8b   : > { %8024 = vrcp.f32 %v3601_v20 }
 0xc8d   : > { %3944 = vrot.lane.b32.xlu1 %v3538_v38, %s9522_s20 }
 0xc8e   : > { %v3719_v22 = vpop.permute.xlu1 %3718 }
 0xc8f   : > { %v3724_v25 = vsel %vm2842_vm5, %v3719_v22, 0 }
 0xc98   : > { %v8025_v21 = vpop.eup %8024 }
 0xc99   : > { %v3603_v23 = vmul.f32 %v8025_v21, %v8017_v2 }
 0xc9a   : > { %3831 = vrot.lane.b32.xlu0 %v3538_v38, %s9520_s26 }
 0xc9b   : > { %v3604_v24 = vpack.c.bf16 %v3603_v23, %v3603_v23 }
 0xc9d   : > { %7261 = vmatmul.mubr.msk.bf16.vlgmr.msra.gmra.mxu0 %vm2772_vm2, %v3604_v24 }
 0xc9e   : > { %7271 = vmatpush3.bf16.msra.mxu0 %v3724_v25  ;;  %7272 = vmatprep.mubr.msk.bf16.mxu0 %vm9519_vm0, %v9518_v0 }
 0xc9f   : > { %7282 = vmatprep.subr.bf16.mxu0 %v9518_v0 }
 0xcfd   : > { %v3713_v26 = vpop.xlane.xlu0 %3712 }
 0xcfe   : > { %8026 = vrcp.f32 %v3713_v26 }
 0xd05   : > { %v3827_v27 = vpop.xlane.xlu1 %3826 }
 0xd06   : > { %8028 = vrcp.f32 %v3827_v27 }
 0xd09   : > { %v3945_v38 = vpop.permute.xlu1 %3944 }
 0xd0a   : > { %v3950_v40 = vsel %vm2842_vm5, %v3945_v38, 0 }
 0xd0b   : > { %v8027_v28 = vpop.eup %8026 }
 0xd0c   : > { %v3715_v29 = vmul.f32 %v8027_v28, %v8019_v13 }
 0xd0d   : > { %v3940_v30 = vpop.xlane.xlu0 %3939 }
 0xd0e   : > { %8030 = vrcp.f32 %v3940_v30  ;;  %v3716_v31 = vpack.c.bf16 %v3715_v29, %v3715_v29  ;;  %v3767_v41 = vadd.f32 %v3715_v29, %v3603_v23  ;;  %v7970_v29 = vld [vmem:[%s11140_s8 + $0x8] sm:$0xff]   ;;  %v7971_v30 = vld [vmem:[%s11140_s8] sm:$0xff]  }
 0xd10   : > { %7273 = vmatmul.mubr.msk.bf16.vlgmr.msra.gmra.mxu0 %vm2772_vm2, %v3716_v31  ;;  %v7973_v31 = vld [vmem:[#allocation46 + $0x8] sm:$0xff]  }
 0xd11   : > { %v3832_v32 = vpop.permute.xlu0 %3831  ;;  %7284 = vmatprep.mubr.msk.bf16.mxu0 %vm9519_vm0, %v9518_v0 }
 0xd12   : > { %v3837_v33 = vsel %vm2842_vm5, %v3832_v32, 0  ;;  %v7974_v32 = vld [vmem:[#allocation43] sm:$0xff]  }
 0xd13   : > { %v8029_v34 = vpop.eup %8028  ;;  %7283 = vmatpush3.bf16.msra.mxu0 %v3837_v33  ;;  %v7975_v33 = vld [vmem:[#allocation46] sm:$0xff]  }
 0xd14   : > { %7294 = vmatprep.subr.bf16.mxu0 %v9518_v0  ;;  %v3829_v35 = vmul.f32 %v8029_v34, %v8021_v16  ;;  %v6929_v16 = vld [vmem:[#allocation37] ss:$0 sm:$0xff] }
 0xd16   : > { %v3830_v39 = vpack.c.bf16 %v3829_v35, %v3829_v35  ;;  %v3880_v44 = vadd.f32 %v3829_v35, %v3767_v41  ;;  %v6934_v41 = vld [vmem:[#allocation40] ss:$0 sm:$0xff] }
 0xd18   : > { %7285 = vmatmul.mubr.msk.bf16.vlgmr.msra.gmra.mxu0 %vm2772_vm2, %v3830_v39  ;;  %v6933_v39 = vld [vmem:[#allocation38] ss:$0 sm:$0xff] }
 0xd19   : > { %7295 = vmatpush3.bf16.msra.mxu0 %v3950_v40  ;;  %7296 = vmatprep.mubr.msk.bf16.mxu0 %vm9519_vm0, %v9518_v0 }
 0xd1a   : > { %7308 = vmatprep.subr.bf16.mxu0 %v9518_v0 }
 0xd1b   : > { %v8031_v43 = vpop.eup %8030 }
 0xd1c   : > { %v3942_v5 = vmul.f32 %v8031_v43, %v8023_v18 }
 0xd1e   : > { %v3943_v46 = vpack.c.bf16 %v3942_v5, %v3942_v5  ;;  %v3993_v47 = vadd.f32 %v3942_v5, %v3880_v44 }
 0xd20   : > { %7297 = vmatmul.mubr.msk.bf16.vlgmr.msra.gmra.mxu0 %vm2772_vm2, %v3943_v46  ;;  %v4010_v48 = vmul.f32 0.25, %v3993_v47  ;;  %v6935_v46 = vld [vmem:[#allocation41] ss:$0 sm:$0xff] }
 0xd21   : > { %7312 = vmatprep.mubr.msk.bf16.mxu0 %vm9519_vm0, %v9518_v0  ;;  %7309 = vmatpush3.bf16.msra.mxu0 %v7970_v29 }
 0xd22   : > { %4102 = vst.msk [vmem:[%s2548_s19] sm:$0xff] %vm2772_vm2, %v4010_v48  ;;  %7310 = vmatprep.subr.bf16.mxu0 %v9518_v0 }
 0xd25   : > { %7311 = vmatpush3.bf16.msra.mxu0 %v7971_v30 }
 0xd26   : > { %7324 = vmatprep.subr.bf16.mxu0 %v9518_v0 }
 0xd28   : > { %7313 = vmatmul.mubr.msk.bf16.vlgmr.msra.gmra.mxu0 %vm2609_vm1, %v10520_v45 }
 0xd29   : > { %7325 = vmatpush3.bf16.msra.mxu0 %v7973_v31  ;;  %7328 = vmatprep.mubr.msk.bf16.mxu0 %vm9519_vm0, %v9518_v0 }
 0xd2a   : > { %7326 = vmatprep.subr.bf16.mxu0 %v9518_v0 }
 0xd2d   : > { %7327 = vmatpush3.bf16.msra.mxu0 %v7975_v33 }
 0xd2e   : > { %7338 = vmatprep.subr.bf16.mxu0 %v9518_v0 }
 0xd5d   : > { %v3645_v49 = vpop.f32.mrf.mxu0 }
 0xd5e   : > { %v3651_v10 = vpack.c.bf16 %v3645_v49, %v3645_v49 }
 0xd5f   : > { %v7262_v50 = vpop.f32.mrf.mxu0 }
 0xd61   : > { %v3648_v51 = vpop.f32.mrf.mxu0 }
 0xd63   : > { %v7263_v52 = vpop.f32.mrf.mxu0 }
 0xdd0   : > { %v3760_v54 = vpop.f32.mrf.mxu0 }
 0xdd1   : > { %v3766_v57 = vpack.c.bf16 %v3760_v54, %v3760_v54  ;;  %v6943_v54 = vld [vmem:[#allocation47] ss:$0 sm:$0xff] }
 0xdd2   : > { %v7274_v58 = vpop.f32.mrf.mxu0 }
 0xdd3   : > { %3995 = vrot.lane.b32.xlu1 %v3766_v57, %s9524_s23 }
 0xdd4   : > { %v3763_v59 = vpop.f32.mrf.mxu0 }
 0xdd6   : > { %v7275_v60 = vpop.f32.mrf.mxu0 }
 0xdd8   : > { %v3873_v61 = vpop.f32.mrf.mxu0 }
 0xdd9   : > { %v3879_v62 = vpack.c.bf16 %v3873_v61, %v3873_v61 }
 0xdda   : > { %v7286_v63 = vpop.f32.mrf.mxu0 }
 0xddb   : > { %3998 = vrot.lane.b32.xlu0 %v3879_v62, %s9525_s0 }
 0xddc   : > { %v3876_v1 = vpop.f32.mrf.mxu0 }
 0xdde   : > { %v7287_v2 = vpop.f32.mrf.mxu0 }
 0xde0   : > { %v3986_v3 = vpop.f32.mrf.mxu0 }
 0xde1   : > { %v3992_v4 = vpack.c.bf16 %v3986_v3, %v3986_v3 }
 0xde2   : > { %v7298_v6 = vpop.f32.mrf.mxu0 }
 0xde3   : > { %4001 = vrot.lane.b32.xlu1 %v3992_v4, %s9526_s16 }
 0xde4   : > { %v3989_v7 = vpop.f32.mrf.mxu0 }
 0xde6   : > { %v7299_v8 = vpop.f32.mrf.mxu0 }
 0xde8   : > { %v4175_v47 = vpop.f32.mrf.mxu0 }
 0xde9   : > { %v4176_v48 = vadd.f32 %v6935_v46, %v4175_v47 }
 0xdea   : > { %v7314_v49 = vpop.f32.mrf.mxu0 }
 0xdeb   : > { %v4181_v50 = vpack.c.bf16 %v4176_v48, %v4176_v48 }
 0xdec   : > { %v4178_v51 = vpop.f32.mrf.mxu0 }
 0xdee   : > { %v7315_v52 = vpop.f32.mrf.mxu0 }
 0xe45   : > { %v3996_v9 = vpop.permute.xlu1 %3995 }
 0xe46   : > { %v4005_v12 = vsel %vm2772_vm2, %v3651_v10, %v3996_v9 }
 0xe4d   : > { %v3999_v11 = vpop.permute.xlu0 %3998 }
 0xe4e   : > { %v4007_v13 = vsel %vm3238_vm6, %v4005_v12, %v3999_v11 }
 0xe55   : > { %v4002_v14 = vpop.permute.xlu1 %4001 }
 0xe56   : > { %v4009_v15 = vsel %vm3241_vm7, %v4007_v13, %v4002_v14 }
 0xe57   : > { %7305 = vmatmul.mubr.msk.bf16.vlgmr.msra.gmra.mxu1 %vm2609_vm1, %v4009_v15 }
 0xe58   : > { %7320 = vmatprep.mubr.msk.bf16.mxu1 %vm9519_vm0, %v9518_v0 }
 0xf17   : > { %v4065_v17 = vpop.f32.mrf.mxu1 }
 0xf18   : > { %v4066_v18 = vadd.f32 %v6929_v16, %v4065_v17 }
 0xf19   : > { %v7306_v19 = vpop.f32.mrf.mxu1 }
 0xf1a   : > { %v4071_v20 = vadd.f32 %v4066_v18, %v10529_v56  ;;  %v7972_v56 = vld [vmem:[#allocation43 + $0x8] sm:$0xff]  }
 0xf1b   : > { %v4068_v21 = vpop.f32.mrf.mxu1  ;;  %7317 = vmatpush3.bf16.msra.mxu1 %v7972_v56 }
 0xf1c   : > { %v4074_v22 = vsel %vm2609_vm1, %v4071_v20, 0.0  ;;  %7318 = vmatprep.subr.bf16.mxu1 %v9518_v0 }
 0xf1d   : > { %4075 = vadd.xlane.f32.xlu0 %v4074_v22  ;;  %v7307_v23 = vpop.f32.mrf.mxu1 }
 0xf1f   : > { %7319 = vmatpush3.bf16.msra.mxu1 %v7974_v32 }
 0xf20   : > { %7332 = vmatprep.subr.bf16.mxu1 %v9518_v0 }
 0xfa6   : > { %v4076_v24 = vpop.xlane.xlu0 %4075 }
 0xfa7   : > { %v4077_v25 = vmul.f32 0.03125, %v4076_v24 }
 0xfa9   : > { %v4078_v26 = vsub.f32 %v4071_v20, %v4077_v25 }
 0xfab   : > { %v4079_v27 = vmul.f32 %v4078_v26, %v4078_v26 }
 0xfad   : > { %v4080_v28 = vsel %vm2609_vm1, %v4079_v27, 0.0 }
 0xfae   : > { %4081 = vadd.xlane.f32.xlu1 %v4080_v28 }
 0xfbf   : > { %4410 = vrot.lane.b32.xlu1 %v4181_v50, %s9521_s3 }
 0xfc3   : > { %4524 = vrot.lane.b32.xlu1 %v4181_v50, %s9520_s26 }
 0xfc7   : > { %4636 = vrot.lane.b32.xlu1 %v4181_v50, %s9522_s20 }
0x1037   : > { %v4082_v34 = vpop.xlane.xlu1 %4081 }
0x1038   : > { %v4083_v35 = vmul.f32 0.03125, %v4082_v34 }
0x103a   : > { %v4084_v45 = vadd.f32 1e-05, %v4083_v35 }
0x103b   : > { %v4411_v11 = vpop.permute.xlu1 %4410 }
0x103c   : > { %8032 = vrsqrt.f32 %v4084_v45 }
0x103f   : > { %v4525_v14 = vpop.permute.xlu1 %4524 }
0x1043   : > { %v4637_v16 = vpop.permute.xlu1 %4636 }
0x1049   : > { %v8033_v38 = vpop.eup %8032 }
0x104a   : > { %v4086_v40 = vmul.f32 %v8033_v38, %v4078_v26 }
0x104c   : > { %v4093_v43 = vmul.f32 %v6933_v39, %v4086_v40 }
0x104e   : > { %v10645_v44 = vadd.f32 %v6934_v41, %v4093_v43 }
0x1050   : > { %v10649_v5 = vpack.c.bf16 %v10645_v44, %v10645_v44 }
0x1052   : > { %7321 = vmatmul.mubr.msk.bf16.vlgmr.msra.gmra.mxu1 %vm2609_vm1, %v10649_v5  ;;  %7329 = vmatmul.mubr.msk.bf16.vlgmr.msra.gmra.mxu0 %vm2609_vm1, %v10649_v5 }
0x1053   : > { %7334 = vmatprep.mubr.msk.bf16.mxu1 %vm9519_vm0, %v9518_v0  ;;  %7340 = vmatprep.mubr.msk.bf16.mxu0 %vm9519_vm0, %v9518_v0 }
0x1112   : > { %v4237_v55 = vpop.f32.mrf.mxu1  ;;  %v4296_v57 = vpop.f32.mrf.mxu0 }
0x1113   : > { %v4238_v58 = vadd.f32 %v6939_v53, %v4237_v55  ;;  %v4297_v59 = vadd.f32 %v6943_v54, %v4296_v57 }
0x1114   : > { %v7322_v60 = vpop.f32.mrf.mxu1  ;;  %v7330_v61 = vpop.f32.mrf.mxu0 }
0x1115   : > { %v4243_v62 = vpack.c.bf16 %v4238_v58, %v4238_v58  ;;  %v10662_v63 = vpack.c.bf16 %v4297_v59, %v4297_v59 }
0x1116   : > { %v4240_v1 = vpop.f32.mrf.mxu1  ;;  %v4299_v2 = vpop.f32.mrf.mxu0 }
0x1117   : > { %4413 = vrot.lane.b32.xlu0 %v4243_v62, %s9521_s3  ;;  %v4307_v3 = vsel %vm2772_vm2, %v4243_v62, 0  ;;  %v4366_v4 = vsel %vm2842_vm5, %v10662_v63, 0 }
0x1118   : > { %v7323_v6 = vpop.f32.mrf.mxu1  ;;  %v7331_v7 = vpop.f32.mrf.mxu0  ;;  %7333 = vmatpush3.bf16.xpose.msra.mxu1 %v4307_v3  ;;  %7339 = vmatpush3.bf16.msra.mxu0 %v4366_v4 }
0x1119   : > { %7344 = vmatprep.subr.bf16.mxu1 %v9518_v0  ;;  %7350 = vmatprep.subr.bf16.mxu0 %v9518_v0 }
0x111b   : > { %4526 = vrot.lane.b32.xlu0 %v4243_v62, %s9520_s26 }
0x111f   : > { %4638 = vrot.lane.b32.xlu0 %v4243_v62, %s9522_s20  ;;  %7335 = vmatmul.mubr.msk.bf16.vlgmr.msra.gmra.mxu1 %vm2772_vm2, %v4181_v50 }
0x1120   : > { %7346 = vmatprep.mubr.msk.bf16.mxu1 %vm9519_vm0, %v9518_v0 }
0x1189   : > { %v4414_v8 = vpop.permute.xlu0 %4413 }
0x118a   : > { %v4419_v9 = vsel %vm2772_vm2, %v4414_v8, 0 }
0x118b   : > { %7345 = vmatpush3.bf16.xpose.msra.mxu1 %v4419_v9 }
0x118c   : > { %7356 = vmatprep.subr.bf16.mxu1 %v9518_v0 }
0x118d   : > { %v4527_v10 = vpop.permute.xlu0 %4526 }
0x118e   : > { %v4532_v12 = vsel %vm2772_vm2, %v4527_v10, 0 }
0x1191   : > { %v4639_v13 = vpop.permute.xlu0 %4638 }
0x1192   : > { %7347 = vmatmul.mubr.msk.bf16.vlgmr.msra.gmra.mxu1 %vm2772_vm2, %v4411_v11  ;;  %v4644_v15 = vsel %vm2772_vm2, %v4639_v13, 0 }
0x1193   : > { %7357 = vmatpush3.bf16.xpose.msra.mxu1 %v4532_v12  ;;  %7358 = vmatprep.mubr.msk.bf16.mxu1 %vm9519_vm0, %v9518_v0 }
0x1194   : > { %7368 = vmatprep.subr.bf16.mxu1 %v9518_v0 }
0x119a   : > { %7359 = vmatmul.mubr.msk.bf16.vlgmr.msra.gmra.mxu1 %vm2772_vm2, %v4525_v14 }
0x119b   : > { %7369 = vmatpush3.bf16.xpose.msra.mxu1 %v4644_v15  ;;  %7370 = vmatprep.mubr.msk.bf16.mxu1 %vm9519_vm0, %v9518_v0 }
0x119c   : > { %7380 = vmatprep.subr.bf16.mxu1 %v9518_v0 }
0x11a2   : > { %7371 = vmatmul.mubr.msk.bf16.vlgmr.msra.gmra.mxu1 %vm2772_vm2, %v4637_v16 }
0x11a3   : > { %7384 = vmatprep.mubr.msk.bf16.mxu1 %vm9519_vm0, %v9518_v0 }
0x11df   : > { %v4343_v17 = vpop.f32.mrf.mxu1 }
0x11e0   : > { %v4349_v18 = vsel %vm10454_vm4, -1e+30, %v4343_v17 }
0x11e1   : > { %v7336_v19 = vpop.f32.mrf.mxu1  ;;  %v4350_v20 = vsel %vm2772_vm2, %v4349_v18, -inf }
0x11e2   : > { %4351 = vmax.xlane.f32.xlu0 %v4350_v20 }
0x11e3   : > { %v4346_v21 = vpop.f32.mrf.mxu1 }
0x11e5   : > { %v7337_v22 = vpop.f32.mrf.mxu1 }
0x1252   : > { %v4455_v23 = vpop.f32.mrf.mxu1 }
0x1253   : > { %v4461_v24 = vsel %vm10454_vm4, -1e+30, %v4455_v23 }
0x1254   : > { %v7348_v25 = vpop.f32.mrf.mxu1  ;;  %v4462_v26 = vsel %vm2772_vm2, %v4461_v24, -inf }
0x1255   : > { %4463 = vmax.xlane.f32.xlu1 %v4462_v26 }
0x1256   : > { %v4458_v27 = vpop.f32.mrf.mxu1 }
0x1258   : > { %v7349_v28 = vpop.f32.mrf.mxu1 }
0x1259   : > { %v7976_v28 = vld [vmem:[#allocation49 + $0x8] sm:$0xff]  }
0x125a   : > { %v4568_v29 = vpop.f32.mrf.mxu1  ;;  %7381 = vmatpush3.bf16.msra.mxu1 %v7976_v28  ;;  %v4921_v28 = vld [vmem:[#allocation70] sm:$0x1] }
0x125b   : > { %v4574_v30 = vsel %vm10454_vm4, -1e+30, %v4568_v29  ;;  %7382 = vmatprep.subr.bf16.mxu1 %v9518_v0 }
0x125c   : > { %v7360_v56 = vpop.f32.mrf.mxu1  ;;  %v4575_v31 = vsel %vm2772_vm2, %v4574_v30, -inf }
0x125d   : > { %4576 = vmax.xlane.f32.xlu0 %v4575_v31 }
0x125e   : > { %v4571_v32 = vpop.f32.mrf.mxu1 }
0x1260   : > { %v7361_v33 = vpop.f32.mrf.mxu1 }
0x1262   : > { %v4680_v34 = vpop.f32.mrf.mxu1 }
0x1263   : > { %v4686_v35 = vsel %vm10454_vm4, -1e+30, %v4680_v34 }
0x1264   : > { %v7372_v45 = vpop.f32.mrf.mxu1  ;;  %v4687_v38 = vsel %vm2772_vm2, %v4686_v35, -inf }
0x1265   : > { %4688 = vmax.xlane.f32.xlu0 %v4687_v38 }
0x1266   : > { %v4683_v39 = vpop.f32.mrf.mxu1 }
0x1268   : > { %v7373_v40 = vpop.f32.mrf.mxu1 }
0x126b   : > { %v4352_v41 = vpop.xlane.xlu0 %4351 }
0x126c   : > { %v4353_v43 = vsub.f32 %v4349_v18, %v4352_v41 }
0x126e   : > { %v4354_v46 = vmul.f32 1.442695, %v4353_v43 }
0x1270   : > { %8034 = vpow2.f32 %v4354_v46 }
0x127d   : > { %v8035_v47 = vpop.eup %8034 }
0x127e   : > { %v4356_v48 = vsel %vm2772_vm2, %v8035_v47, 0.0 }
0x127f   : > { %4357 = vadd.xlane.f32.xlu1 %v4356_v48 }
0x1290   : > { %4475 = vrot.lane.b32.xlu1 %v10662_v63, %s9521_s3 }
0x12de   : > { %v4464_v49 = vpop.xlane.xlu1 %4463 }
0x12df   : > { %v4465_v42 = vsub.f32 %v4461_v24, %v4464_v49 }
0x12e1   : > { %v4466_v50 = vmul.f32 1.442695, %v4465_v42 }
0x12e3   : > { %8036 = vpow2.f32 %v4466_v50 }
0x12e6   : > { %v4577_v51 = vpop.xlane.xlu0 %4576 }
0x12e7   : > { %v4578_v52 = vsub.f32 %v4574_v30, %v4577_v51  ;;  %v7977_v30 = vld [vmem:[#allocation49] sm:$0xff]  }
0x12e8   : > { %7383 = vmatpush3.bf16.msra.mxu1 %v7977_v30 }
0x12e9   : > { %v4579_v53 = vmul.f32 1.442695, %v4578_v52  ;;  %7396 = vmatprep.subr.bf16.mxu1 %v9518_v0 }
0x12eb   : > { %8038 = vpow2.f32 %v4579_v53 }
0x12ee   : > { %v4689_v54 = vpop.xlane.xlu0 %4688 }
0x12ef   : > { %v4690_v55 = vsub.f32 %v4686_v35, %v4689_v54  ;;  %v6955_v54 = vld [vmem:[#allocation50] ss:$0 sm:$0xff] }
0x12f0   : > { %v8037_v57 = vpop.eup %8036 }
0x12f1   : > { %v4691_v58 = vmul.f32 1.442695, %v4690_v55  ;;  %v4468_v59 = vsel %vm2772_vm2, %v8037_v57, 0.0 }
0x12f2   : > { %4469 = vadd.xlane.f32.xlu0 %v4468_v59 }
0x12f3   : > { %8040 = vpow2.f32 %v4691_v58 }
0x12f8   : > { %v8039_v60 = vpop.eup %8038 }
0x12f9   : > { %v4581_v61 = vsel %vm2772_vm2, %v8039_v60, 0.0 }
0x12fa   : > { %4582 = vadd.xlane.f32.xlu1 %v4581_v61 }
0x1300   : > { %v8041_v62 = vpop.eup %8040 }
0x1301   : > { %v4693_v1 = vsel %vm2772_vm2, %v8041_v62, 0.0 }
0x1302   : > { %4694 = vadd.xlane.f32.xlu0 %v4693_v1 }
0x1308   : > { %v4358_v2 = vpop.xlane.xlu1 %4357 }
0x1309   : > { %8042 = vrcp.f32 %v4358_v2 }
0x130b   : > { %4699 = vrot.lane.b32.xlu1 %v10662_v63, %s9522_s20 }
0x130c   : > { %v4476_v6 = vpop.permute.xlu1 %4475 }
0x130d   : > { %v4481_v8 = vsel %vm2842_vm5, %v4476_v6, 0  ;;  %v7978_v6 = vld [vmem:[#allocation67 + $0x8] sm:$0xff]  }
0x1316   : > { %v8043_v3 = vpop.eup %8042 }
0x1317   : > { %v4360_v4 = vmul.f32 %v8043_v3, %v8035_v47 }
0x1318   : > { %4587 = vrot.lane.b32.xlu0 %v10662_v63, %s9520_s26 }
0x1319   : > { %v4361_v7 = vpack.c.bf16 %v4360_v4, %v4360_v4 }
0x131b   : > { %7341 = vmatmul.mubr.msk.bf16.vlgmr.msra.gmra.mxu0 %vm2772_vm2, %v4361_v7  ;;  %v7979_v7 = vld [vmem:[#allocation67] sm:$0xff]  }
0x131c   : > { %7351 = vmatpush3.bf16.msra.mxu0 %v4481_v8  ;;  %7352 = vmatprep.mubr.msk.bf16.mxu0 %vm9519_vm0, %v9518_v0  ;;  %v7984_v8 = vld [vmem:[#allocation71 + $0x8] sm:$0xff]  }
0x131d   : > { %7362 = vmatprep.subr.bf16.mxu0 %v9518_v0 }
0x137b   : > { %v4470_v9 = vpop.xlane.xlu0 %4469 }
0x137c   : > { %8044 = vrcp.f32 %v4470_v9  ;;  %v7985_v9 = vld [vmem:[#allocation71] sm:$0xff]  }
0x1383   : > { %v4583_v10 = vpop.xlane.xlu1 %4582 }
0x1384   : > { %8046 = vrcp.f32 %v4583_v10  ;;  %v4934_v10 = vld [vmem:[%s2560_s6] sm:$0xff]  ;;  %s9224_s6 = sshll.u32 %s9527_s17, 4  ;;  %s9225_s6 = int_to_ptr.vmem [resolvable:$false] %s9224_s6 }
0x1387   : > { %v4700_v18 = vpop.permute.xlu1 %4699 }
0x1388   : > { %v4705_v20 = vsel %vm2842_vm5, %v4700_v18, 0 }
0x1389   : > { %v8045_v11 = vpop.eup %8044 }
0x138a   : > { %v4472_v12 = vmul.f32 %v8045_v11, %v8037_v57  ;;  %v4935_v11 = vpack.c.bf16 %v4934_v10, %v4934_v10 }
0x138b   : > { %v4695_v13 = vpop.xlane.xlu0 %4694 }
0x138c   : > { %8048 = vrcp.f32 %v4695_v13  ;;  %v4473_v63 = vpack.c.bf16 %v4472_v12, %v4472_v12 }
0x138e   : > { %7353 = vmatmul.mubr.msk.bf16.vlgmr.msra.gmra.mxu0 %vm2772_vm2, %v4473_v63 }
0x138f   : > { %v4588_v14 = vpop.permute.xlu0 %4587  ;;  %7364 = vmatprep.mubr.msk.bf16.mxu0 %vm9519_vm0, %v9518_v0 }
0x1390   : > { %v4593_v15 = vsel %vm2842_vm5, %v4588_v14, 0 }
0x1391   : > { %v8047_v16 = vpop.eup %8046  ;;  %7363 = vmatpush3.bf16.msra.mxu0 %v4593_v15  ;;  %v6959_v15 = vld [vmem:[#allocation52] ss:$0 sm:$0xff] }
0x1392   : > { %7374 = vmatprep.subr.bf16.mxu0 %v9518_v0  ;;  %v4585_v17 = vmul.f32 %v8047_v16, %v8039_v60 }
0x1394   : > { %v4586_v19 = vpack.c.bf16 %v4585_v17, %v4585_v17  ;;  %v6960_v17 = vld [vmem:[#allocation53] ss:$0 sm:$0xff] }
0x1396   : > { %7365 = vmatmul.mubr.msk.bf16.vlgmr.msra.gmra.mxu0 %vm2772_vm2, %v4586_v19 }
0x1397   : > { %7375 = vmatpush3.bf16.msra.mxu0 %v4705_v20  ;;  %7376 = vmatprep.mubr.msk.bf16.mxu0 %vm9519_vm0, %v9518_v0  ;;  %v7980_v20 = vld [vmem:[%s11142_s13 + $0x8] sm:$0xff]  }
0x1398   : > { %7388 = vmatprep.subr.bf16.mxu0 %v9518_v0 }
0x1399   : > { %v8049_v21 = vpop.eup %8048 }
0x139a   : > { %v4697_v22 = vmul.f32 %v8049_v21, %v8041_v62 }
0x139c   : > { %v4698_v23 = vpack.c.bf16 %v4697_v22, %v4697_v22  ;;  %v7981_v22 = vld [vmem:[%s11142_s13] sm:$0xff]  }
0x139e   : > { %7377 = vmatmul.mubr.msk.bf16.vlgmr.msra.gmra.mxu0 %vm2772_vm2, %v4698_v23  ;;  %v4995_v23 = vld [vmem:[%s2177_s22] sm:$0xff]  ;;  %s11146_s22 = sld [smem:[#allocation145_spill]] }
0x139f   : > { %7392 = vmatprep.mubr.msk.bf16.mxu0 %vm9519_vm0, %v9518_v0  ;;  %7389 = vmatpush3.bf16.msra.mxu0 %v7978_v6  ;;  %v6977_v6 = vld [vmem:[#allocation58] ss:$0 sm:$0xff] }
0x13a0   : > { %7390 = vmatprep.subr.bf16.mxu0 %v9518_v0 }
0x13a3   : > { %7391 = vmatpush3.bf16.msra.mxu0 %v7979_v7  ;;  %v6981_v7 = vld [vmem:[#allocation61] ss:$0 sm:$0xff] }
0x13a4   : > { %7404 = vmatprep.subr.bf16.mxu0 %v9518_v0 }
0x13db   : > { %v4402_v24 = vpop.f32.mrf.mxu0 }
0x13dc   : > { %v4408_v49 = vpack.c.bf16 %v4402_v24, %v4402_v24  ;;  %v4996_v24 = vpack.c.bf16 %v4995_v23, %v4995_v23 }
0x13dd   : > { %v7342_v25 = vpop.f32.mrf.mxu0 }
0x13de   : > { %v7982_v25 = vld [vmem:[%s11143_s9 + $0x8] sm:$0xff]  }
0x13df   : > { %v4405_v26 = vpop.f32.mrf.mxu0 }
0x13e0   : > { %v7983_v26 = vld [vmem:[%s11143_s9] sm:$0xff]  }
0x13e1   : > { %v7343_v27 = vpop.f32.mrf.mxu0 }
0x13e2   : > { %v6961_v27 = vld [vmem:[#allocation68] ss:$0 sm:$0xff] }
0x144e   : > { %v4517_v29 = vpop.f32.mrf.mxu0 }
0x144f   : > { %v4523_v56 = vpack.c.bf16 %v4517_v29, %v4517_v29 }
0x1450   : > { %v7354_v31 = vpop.f32.mrf.mxu0 }
0x1451   : > { %4749 = vrot.lane.b32.xlu1 %v4523_v56, %s9524_s23  ;;  %v4926_v56 = vrot.slane %v4921_v28, %v10450_v36 }
0x1452   : > { %v4520_v32 = vpop.f32.mrf.mxu0 }
0x1454   : > { %v7355_v33 = vpop.f32.mrf.mxu0 }
0x1456   : > { %v4629_v34 = vpop.f32.mrf.mxu0 }
0x1457   : > { %v4635_v35 = vpack.c.bf16 %v4629_v34, %v4629_v34 }
0x1458   : > { %v7366_v45 = vpop.f32.mrf.mxu0 }
0x1459   : > { %4752 = vrot.lane.b32.xlu0 %v4635_v35, %s9525_s0 }
0x145a   : > { %v4632_v38 = vpop.f32.mrf.mxu0 }
0x145c   : > { %v7367_v39 = vpop.f32.mrf.mxu0 }
0x145e   : > { %v4741_v40 = vpop.f32.mrf.mxu0 }
0x145f   : > { %v4747_v41 = vpack.c.bf16 %v4741_v40, %v4741_v40 }
0x1460   : > { %v7378_v43 = vpop.f32.mrf.mxu0 }
0x1461   : > { %4755 = vrot.lane.b32.xlu1 %v4747_v41, %s9526_s16 }
0x1462   : > { %v4744_v46 = vpop.f32.mrf.mxu0 }
0x1464   : > { %v7379_v47 = vpop.f32.mrf.mxu0 }
0x1465   : > { %v6973_v47 = vld [vmem:[#allocation55] ss:$0 sm:$0xff] }
0x14c3   : > { %v4750_v48 = vpop.permute.xlu1 %4749 }
0x14c4   : > { %v4759_v50 = vsel %vm2772_vm2, %v4408_v49, %v4750_v48 }
0x14cb   : > { %v4753_v42 = vpop.permute.xlu0 %4752 }
0x14cc   : > { %v4761_v51 = vsel %vm3238_vm6, %v4759_v50, %v4753_v42 }
0x14d3   : > { %v4756_v52 = vpop.permute.xlu1 %4755 }
0x14d4   : > { %v4763_v53 = vsel %vm3241_vm7, %v4761_v51, %v4756_v52  ;;  %v7986_v51 = vld [vmem:[#allocation56 + $0x8] sm:$0xff]   ;;  %v7987_v52 = vld [vmem:[#allocation59 + $0x8] sm:$0xff]  }
0x14d5   : > { %7385 = vmatmul.mubr.msk.bf16.vlgmr.msra.gmra.mxu1 %vm2609_vm1, %v4763_v53 }
0x14d6   : > { %7400 = vmatprep.mubr.msk.bf16.mxu1 %vm9519_vm0, %v9518_v0  ;;  %7397 = vmatpush3.bf16.msra.mxu1 %v7984_v8 }
0x14d7   : > { %7398 = vmatprep.subr.bf16.mxu1 %v9518_v0 }
0x14da   : > { %7399 = vmatpush3.bf16.msra.mxu1 %v7985_v9 }
0x14db   : > { %7412 = vmatprep.subr.mxu1 %v9518_v0 }
0x14dd   : > { %7401 = vmatmul.mubr.msk.bf16.vlgmr.msra.gmra.mxu1 %vm2609_vm1, %v4935_v11 }
0x14de   : > { %7414 = vmatprep.mubr.msk.f32.mxu1 %vm9519_vm0, %v9518_v0 }
0x1595   : > { %v4818_v55 = vpop.f32.mrf.mxu1 }
0x1596   : > { %v4819_v57 = vadd.f32 %v6955_v54, %v4818_v55  ;;  %v7988_v55 = vld [vmem:[#allocation56] sm:$0xff]  }
0x1597   : > { %v7386_v58 = vpop.f32.mrf.mxu1 }
0x1598   : > { %v4826_v59 = vsel %vm2609_vm1, %v4819_v57, 0.0 }
0x1599   : > { %4827 = vadd.xlane.f32.xlu0 %v4826_v59  ;;  %v4821_v60 = vpop.f32.mrf.mxu1 }
0x159b   : > { %v7387_v61 = vpop.f32.mrf.mxu1 }
0x159d   : > { %v4989_v45 = vpop.f32.mrf.mxu1 }
0x159f   : > { %v7402_v38 = vpop.f32.mrf.mxu1 }
0x15a1   : > { %v4992_v40 = vpop.f32.mrf.mxu1 }
0x15a3   : > { %v7403_v43 = vpop.f32.mrf.mxu1 }
0x1622   : > { %v4828_v62 = vpop.xlane.xlu0 %4827 }
0x1623   : > { %v4829_v1 = vmul.f32 0.03125, %v4828_v62 }
0x1625   : > { %v4830_v2 = vsub.f32 %v4819_v57, %v4829_v1  ;;  %v7989_v57 = vld [vmem:[#allocation59] sm:$0xff]  }
0x1627   : > { %v4831_v3 = vmul.f32 %v4830_v2, %v4830_v2 }
0x1629   : > { %v4832_v4 = vsel %vm2609_vm1, %v4831_v3, 0.0 }
0x162a   : > { %4833 = vadd.xlane.f32.xlu1 %v4832_v4 }
0x16b3   : > { %v4834_v12 = vpop.xlane.xlu1 %4833 }
0x16b4   : > { %v4835_v13 = vmul.f32 0.03125, %v4834_v12 }
0x16b6   : > { %v4836_v63 = vadd.f32 1e-05, %v4835_v13 }
0x16b8   : > { %8050 = vrsqrt.f32 %v4836_v63 }
0x16c5   : > { %v8051_v14 = vpop.eup %8050 }
0x16c6   : > { %v4838_v16 = vmul.f32 %v8051_v14, %v4830_v2 }
0x16c8   : > { %v4845_v18 = vmul.f32 %v6959_v15, %v4838_v16 }
0x16ca   : > { %v4852_v19 = vadd.f32 %v6960_v17, %v4845_v18 }
0x16cc   : > { %v4853_v21 = vpack.c.bf16 %v4852_v19, %v4852_v19 }
0x16ce   : > { %7393 = vmatmul.mubr.msk.bf16.vlgmr.msra.gmra.mxu0 %vm2609_vm1, %v4853_v21 }
0x16cf   : > { %7405 = vmatpush3.bf16.msra.mxu0 %v7980_v20  ;;  %7408 = vmatprep.mubr.msk.bf16.mxu0 %vm9519_vm0, %v9518_v0 }
0x16d0   : > { %7406 = vmatprep.subr.bf16.mxu0 %v9518_v0 }
0x16d3   : > { %7407 = vmatpush3.bf16.msra.mxu0 %v7981_v22 }
0x16d4   : > { %7417 = vmatprep.subr.bf16.mxu0 %v9518_v0 }
0x16d6   : > { %7409 = vmatmul.mubr.msk.bf16.vlgmr.msra.gmra.mxu0 %vm2609_vm1, %v4996_v24 }
0x16d7   : > { %7418 = vmatpush3.bf16.msra.mxu0 %v7982_v25  ;;  %7421 = vmatprep.mubr.msk.bf16.mxu0 %vm9519_vm0, %v9518_v0 }
0x16d8   : > { %7419 = vmatprep.subr.bf16.mxu0 %v9518_v0 }
0x16db   : > { %7420 = vmatpush3.bf16.msra.mxu0 %v7983_v26 }
0x16dc   : > { %7433 = vmatprep.subr.bf16.mxu0 %v9518_v0 }
0x16de   : > { %7422 = vmatmul.mubr.msk.bf16.vlgmr.msra.gmra.mxu0 %vm2609_vm1, %v10649_v5 }
0x16df   : > { %7437 = vmatprep.mubr.msk.bf16.mxu0 %vm9519_vm0, %v9518_v0  ;;  %7434 = vmatpush3.bf16.msra.mxu0 %v7987_v52 }
0x16e0   : > { %7435 = vmatprep.subr.bf16.mxu0 %v9518_v0 }
0x16e3   : > { %7436 = vmatpush3.bf16.msra.mxu0 %v7989_v57 }
0x16e4   : > { %7447 = vmatprep.subr.bf16.mxu0 %v9518_v0 }
0x178e   : > { %v4914_v29 = vpop.f32.mrf.mxu0 }
0x178f   : > { %v4915_v30 = vadd.f32 %v6961_v27, %v4914_v29 }
0x1790   : > { %v7394_v31 = vpop.f32.mrf.mxu0 }
0x1791   : > { %v4920_v32 = vmax.f32 %v4915_v30, 0.0  ;;  %v2567_v31 = vld [vmem:[%s2201_s18] sm:$0x1]  ;;  %s11147_s18 = sld [smem:[#allocation156_spill]] }
0x1792   : > { %v4917_v33 = vpop.f32.mrf.mxu0 }
0x1793   : > { %7413 = vmatpush3.xpose.msra.mxu1 %v4920_v32  ;;  %v4928_v34 = vmul.f32 %v4926_v56, %v4920_v32  ;;  %v2568_v32 = vld [vmem:[%s2209_s24] sm:$0x1]  ;;  %s11148_s24 = sld [smem:[#allocation155_spill]] }
0x1794   : > { %v7395_v35 = vpop.f32.mrf.mxu0  ;;  %7425 = vmatprep.subr.bf16.mxu1 %v9518_v0 }
0x1795   : > { %4929 = vadd.xlane.f32.xlu0 %v4928_v34 }
0x1796   : > { %v5050_v5 = vpop.f32.mrf.mxu0  ;;  %7415 = vmatmul.mubr.f32.vlgmr.msra.gmra.mxu1 %v4921_v28 }
0x1797   : > { %7429 = vmatprep.mubr.msk.bf16.mxu1 %vm9519_vm0, %v9518_v0  ;;  %7426 = vmatpush3.bf16.msra.mxu1 %v7986_v51 }
0x1798   : > { %v7410_v39 = vpop.f32.mrf.mxu0  ;;  %7427 = vmatprep.subr.bf16.mxu1 %v9518_v0 }
0x179a   : > { %v5053_v41 = vpop.f32.mrf.mxu0 }
0x179b   : > { %7428 = vmatpush3.bf16.msra.mxu1 %v7988_v55 }
0x179c   : > { %v7411_v46 = vpop.f32.mrf.mxu0  ;;  %7441 = vmatprep.subr.bf16.mxu1 %v9518_v0 }
0x179e   : > { %v5210_v48 = vpop.f32.mrf.mxu0 }
0x179f   : > { %v5211_v49 = vadd.f32 %v6973_v47, %v5210_v48 }
0x17a0   : > { %v7423_v42 = vpop.f32.mrf.mxu0 }
0x17a1   : > { %v5216_v50 = vpack.c.bf16 %v5211_v49, %v5211_v49 }
0x17a2   : > { %v5213_v53 = vpop.f32.mrf.mxu0 }
0x17a3   : > { %5452 = vrot.lane.b32.xlu1 %v5216_v50, %s9521_s3 }
0x17a4   : > { %v7424_v54 = vpop.f32.mrf.mxu0 }
0x1815   : > { %v5453_v23 = vpop.permute.xlu1 %5452 }
0x181e   : > { %v4930_v58 = vpop.xlane.xlu0 %4929 }
0x181f   : > { %vm4931_vm10 = vcmp.gt.f32.partialorder %v4930_v58, 0.0 }
0x1820   : > { %v6965_v59 = vsel %vm4931_vm10, 1.0, %v9518_v0 }
0x1821   : > { %v5057_v60 = vsub.f32 1.0, %v6965_v59  ;;  %v5056_v61 = vmul.f32 %v6965_v59, %v4989_v45 }
0x1823   : > { %v5058_v62 = vmul.f32 %v5057_v60, %v5050_v5 }
0x1825   : > { %v5059_v1 = vadd.f32 %v5058_v62, %v5056_v61 }
0x1827   : > { %v5137_v2 = vpack.c.bf16 %v5059_v1, %v5059_v1 }
0x1829   : > { %7430 = vmatmul.mubr.msk.bf16.vlgmr.msra.gmra.mxu1 %vm2609_vm1, %v5137_v2  ;;  %7438 = vmatmul.mubr.msk.bf16.vlgmr.msra.gmra.mxu0 %vm2609_vm1, %v5137_v2 }
0x182a   : > { %7443 = vmatprep.mubr.msk.bf16.mxu1 %vm9519_vm0, %v9518_v0  ;;  %7449 = vmatprep.mubr.msk.bf16.mxu0 %vm9519_vm0, %v9518_v0 }
0x1856   : > { %v5126_v3 = vpop.f32.mrf.mxu1 }
0x1857   : > { %vm5130_vm11 = vcmp.gt.f32.partialorder %v5126_v3, 0.0 }
0x1858   : > { %v7416_v4 = vpop.f32.mrf.mxu1  ;;  %v6972_v30 = vsel %vm5130_vm11, 1.0, %v9518_v0 }
0x1859   : > { %v5134_v56 = vsub.f32 1.0, %v6972_v30  ;;  %v5133_v33 = vmul.f32 %v6972_v30, %v2567_v31 }
0x185b   : > { %v5135_v34 = vmul.f32 %v5134_v56, %v2568_v32 }
0x185d   : > { %v5136_v35 = vadd.f32 %v5135_v34, %v5133_v33 }
0x185f   : > { %vm5384_vm12 = vcmp.ne.f32.partialorder %v5136_v35, 0.0 }
0x1860   : > { %v5385_v45 = vsel %vm5384_vm12, 1, %v9523_v37 }
0x1861   : > { %v5389_v5 = vrot.slane %v5385_v45, %v10450_v36 }
0x1863   : > { %vm10825_vm13 = vcmp.eq.s32.totalorder %v5389_v5, 1 }
0x18e9   : > { %v5272_v8 = vpop.f32.mrf.mxu1  ;;  %v5331_v9 = vpop.f32.mrf.mxu0 }
0x18ea   : > { %v5273_v10 = vadd.f32 %v6977_v6, %v5272_v8  ;;  %v5332_v11 = vadd.f32 %v6981_v7, %v5331_v9 }
0x18eb   : > { %v7431_v12 = vpop.f32.mrf.mxu1  ;;  %v7439_v13 = vpop.f32.mrf.mxu0 }
0x18ec   : > { %v5278_v63 = vpack.c.bf16 %v5273_v10, %v5273_v10  ;;  %v10788_v14 = vpack.c.bf16 %v5332_v11, %v5332_v11 }
0x18ed   : > { %v5275_v15 = vpop.f32.mrf.mxu1  ;;  %v5334_v16 = vpop.f32.mrf.mxu0 }
0x18ee   : > { %5455 = vrot.lane.b32.xlu0 %v5278_v63, %s9521_s3  ;;  %5568 = vrot.lane.b32.xlu1 %v5278_v63, %s9520_s26  ;;  %v5342_v17 = vsel %vm2772_vm2, %v5278_v63, 0  ;;  %v5408_v18 = vsel %vm2842_vm5, %v10788_v14, 0 }
0x18ef   : > { %v7432_v19 = vpop.f32.mrf.mxu1  ;;  %v7440_v20 = vpop.f32.mrf.mxu0  ;;  %7442 = vmatpush3.bf16.xpose.msra.mxu1 %v5342_v17  ;;  %7448 = vmatpush3.bf16.msra.mxu0 %v5408_v18 }
0x18f0   : > { %7453 = vmatprep.subr.bf16.mxu1 %v9518_v0  ;;  %7459 = vmatprep.subr.bf16.mxu0 %v9518_v0 }
0x18f2   : > { %5566 = vrot.lane.b32.xlu0 %v5216_v50, %s9520_s26  ;;  %5680 = vrot.lane.b32.xlu1 %v5278_v63, %s9522_s20 }
0x18f6   : > { %5678 = vrot.lane.b32.xlu0 %v5216_v50, %s9522_s20  ;;  %7444 = vmatmul.mubr.msk.bf16.vlgmr.msra.gmra.mxu1 %vm2772_vm2, %v5216_v50 }
0x18f7   : > { %7455 = vmatprep.mubr.msk.bf16.mxu1 %vm9519_vm0, %v9518_v0 }
0x1960   : > { %v5456_v21 = vpop.permute.xlu0 %5455  ;;  %v5569_v24 = vpop.permute.xlu1 %5568 }
0x1961   : > { %v5461_v22 = vsel %vm2772_vm2, %v5456_v21, 0  ;;  %v5574_v25 = vsel %vm2772_vm2, %v5569_v24, 0 }
0x1962   : > { %7454 = vmatpush3.bf16.xpose.msra.mxu1 %v5461_v22 }
0x1963   : > { %7465 = vmatprep.subr.bf16.mxu1 %v9518_v0 }
0x1964   : > { %v5681_v26 = vpop.permute.xlu1 %5680  ;;  %v5567_v27 = vpop.permute.xlu0 %5566 }
0x1965   : > { %v5686_v28 = vsel %vm2772_vm2, %v5681_v26, 0 }
0x1968   : > { %v5679_v29 = vpop.permute.xlu0 %5678 }
0x1969   : > { %7456 = vmatmul.mubr.msk.bf16.vlgmr.msra.gmra.mxu1 %vm2772_vm2, %v5453_v23 }
0x196a   : > { %7466 = vmatpush3.bf16.xpose.msra.mxu1 %v5574_v25  ;;  %7467 = vmatprep.mubr.msk.bf16.mxu1 %vm9519_vm0, %v9518_v0 }
0x196b   : > { %7477 = vmatprep.subr.bf16.mxu1 %v9518_v0 }
0x1971   : > { %7468 = vmatmul.mubr.msk.bf16.vlgmr.msra.gmra.mxu1 %vm2772_vm2, %v5567_v27 }
0x1972   : > { %7478 = vmatpush3.bf16.xpose.msra.mxu1 %v5686_v28  ;;  %7479 = vmatprep.mubr.msk.bf16.mxu1 %vm9519_vm0, %v9518_v0 }
0x1973   : > { %7489 = vmatprep.subr.bf16.mxu1 %v9518_v0 }
0x1979   : > { %7480 = vmatmul.mubr.msk.bf16.vlgmr.msra.gmra.mxu1 %vm2772_vm2, %v5679_v29 }
0x197a   : > { %7493 = vmatprep.mubr.msk.bf16.mxu1 %vm9519_vm0, %v9518_v0 }
0x19b6   : > { %v5378_v38 = vpop.f32.mrf.mxu1 }
0x19b7   : > { %v5391_v40 = vsel %vm10825_vm13, -1e+30, %v5378_v38 }
0x19b8   : > { %v7445_v41 = vpop.f32.mrf.mxu1  ;;  %v5392_v43 = vsel %vm2772_vm2, %v5391_v40, -inf }
0x19b9   : > { %5393 = vmax.xlane.f32.xlu1 %v5392_v43 }
0x19ba   : > { %v5381_v46 = vpop.f32.mrf.mxu1 }
0x19bc   : > { %v7446_v47 = vpop.f32.mrf.mxu1 }
0x1a29   : > { %v5497_v48 = vpop.f32.mrf.mxu1 }
0x1a2a   : > { %v5503_v37 = vsel %vm10825_vm13, -1e+30, %v5497_v48 }
0x1a2b   : > { %v7457_v49 = vpop.f32.mrf.mxu1  ;;  %v5504_v36 = vsel %vm2772_vm2, %v5503_v37, -inf }
0x1a2c   : > { %5505 = vmax.xlane.f32.xlu0 %v5504_v36  ;;  %v7990_v49 = vld [vmem:[%s11146_s22 + $0x8] sm:$0xff]  }
0x1a2d   : > { %v5500_v42 = vpop.f32.mrf.mxu1  ;;  %7490 = vmatpush3.bf16.msra.mxu1 %v7990_v49 }
0x1a2e   : > { %v7991_v42 = vld [vmem:[%s11146_s22] sm:$0xff]   ;;  %7491 = vmatprep.subr.bf16.mxu1 %v9518_v0 }
0x1a2f   : > { %v7458_v50 = vpop.f32.mrf.mxu1 }
0x1a31   : > { %v5610_v51 = vpop.f32.mrf.mxu1  ;;  %7492 = vmatpush3.bf16.msra.mxu1 %v7991_v42 }
0x1a32   : > { %v5616_v52 = vsel %vm10825_vm13, -1e+30, %v5610_v51  ;;  %7505 = vmatprep.subr.bf16.mxu1 %v9518_v0 }
0x1a33   : > { %v7469_v53 = vpop.f32.mrf.mxu1  ;;  %v5617_v54 = vsel %vm2772_vm2, %v5616_v52, -inf }
0x1a34   : > { %5618 = vmax.xlane.f32.xlu0 %v5617_v54 }
0x1a35   : > { %v5613_v55 = vpop.f32.mrf.mxu1 }
0x1a37   : > { %v7470_v57 = vpop.f32.mrf.mxu1 }
0x1a39   : > { %v5722_v58 = vpop.f32.mrf.mxu1 }
0x1a3a   : > { %v5728_v59 = vsel %vm10825_vm13, -1e+30, %v5722_v58 }
0x1a3b   : > { %v7481_v60 = vpop.f32.mrf.mxu1  ;;  %v5729_v61 = vsel %vm2772_vm2, %v5728_v59, -inf }
0x1a3c   : > { %5730 = vmax.xlane.f32.xlu1 %v5729_v61 }
0x1a3d   : > { %v5725_v62 = vpop.f32.mrf.mxu1 }
0x1a3f   : > { %v7482_v1 = vpop.f32.mrf.mxu1 }
0x1a42   : > { %v5394_v2 = vpop.xlane.xlu1 %5393 }
0x1a43   : > { %v5395_v3 = vsub.f32 %v5391_v40, %v5394_v2 }
0x1a45   : > { %v5396_v4 = vmul.f32 1.442695, %v5395_v3 }
0x1a47   : > { %8052 = vpow2.f32 %v5396_v4 }
0x1a54   : > { %v8053_v6 = vpop.eup %8052 }
0x1a55   : > { %v5398_v7 = vsel %vm2772_vm2, %v8053_v6, 0.0 }
0x1a56   : > { %5399 = vadd.xlane.f32.xlu0 %v5398_v7 }
0x1ab5   : > { %v5506_v8 = vpop.xlane.xlu0 %5505 }
0x1ab6   : > { %v5507_v9 = vsub.f32 %v5503_v37, %v5506_v8 }
0x1ab8   : > { %v5508_v10 = vmul.f32 1.442695, %v5507_v9 }
0x1aba   : > { %8054 = vpow2.f32 %v5508_v10 }
0x1abd   : > { %v5619_v11 = vpop.xlane.xlu0 %5618 }
0x1abe   : > { %v5620_v12 = vsub.f32 %v5616_v52, %v5619_v11  ;;  %v6993_v11 = vld [vmem:[#allocation62] ss:$0 sm:$0xff] }
0x1ac0   : > { %v5621_v13 = vmul.f32 1.442695, %v5620_v12 }
0x1ac2   : > { %8056 = vpow2.f32 %v5621_v13 }
0x1ac5   : > { %v5731_v19 = vpop.xlane.xlu1 %5730 }
0x1ac6   : > { %v5732_v20 = vsub.f32 %v5728_v59, %v5731_v19 }
0x1ac7   : > { %v8055_v63 = vpop.eup %8054 }
0x1ac8   : > { %v5510_v15 = vsel %vm2772_vm2, %v8055_v63, 0.0  ;;  %v5733_v21 = vmul.f32 1.442695, %v5732_v20 }
0x1ac9   : > { %5511 = vadd.xlane.f32.xlu1 %v5510_v15 }
0x1acf   : > { %v8057_v16 = vpop.eup %8056 }
0x1ad0   : > { %v5623_v17 = vsel %vm2772_vm2, %v8057_v16, 0.0 }
0x1ad1   : > { %5624 = vadd.xlane.f32.xlu0 %v5623_v17 }
0x1ada   : > { %5629 = vrot.lane.b32.xlu1 %v10788_v14, %s9520_s26  ;;  %s11149_s26 = sld [smem:[#allocation157_spill]] }
0x1adf   : > { %v5400_v18 = vpop.xlane.xlu0 %5399 }
0x1ae0   : > { %8058 = vrcp.f32 %v5400_v18 }
0x1ae1   : > { %8060 = vpow2.f32 %v5733_v21 }
0x1ae7   : > { %5517 = vrot.lane.b32.xlu0 %v10788_v14, %s9521_s3  ;;  %s7013_s3 = sshll.u32 %s9865_s15, 7 }
0x1aed   : > { %v8059_v22 = vpop.eup %8058 }
0x1aee   : > { %v5402_v23 = vmul.f32 %v8059_v22, %v8053_v6  ;;  %v8061_v25 = vpop.eup %8060 }
0x1aef   : > { %v5735_v26 = vsel %vm2772_vm2, %v8061_v25, 0.0 }
0x1af0   : > { %v5403_v24 = vpack.c.bf16 %v5402_v23, %v5402_v23 }
0x1af2   : > { %7450 = vmatmul.mubr.msk.bf16.vlgmr.msra.gmra.mxu0 %vm2772_vm2, %v5403_v24  ;;  %v7992_v24 = vld [vmem:[#allocation73 + $0x8] sm:$0xff]  }
0x1af3   : > { %7461 = vmatprep.mubr.msk.bf16.mxu0 %vm9519_vm0, %v9518_v0 }
0x1afe   : > { %5736 = vadd.xlane.f32.xlu1 %v5735_v26  ;;  %v7995_v26 = vld [vmem:[%s11147_s18 + $0x10] sm:$0xff]  }
0x1b0f   : > { %5741 = vrot.lane.b32.xlu1 %v10788_v14, %s9522_s20  ;;  %s6109_s20 = scalar_lea.hbm %s9842_s5, %s7013_s3 }
0x1b52   : > { %v5512_v27 = vpop.xlane.xlu1 %5511 }
0x1b53   : > { %8062 = vrcp.f32 %v5512_v27 }
0x1b56   : > { %v5630_v32 = vpop.permute.xlu1 %5629 }
0x1b57   : > { %v5635_v34 = vsel %vm2842_vm5, %v5630_v32, 0  ;;  %v6998_v32 = vld [vmem:[#allocation65] ss:$0 sm:$0xff] }
0x1b5a   : > { %v5625_v28 = vpop.xlane.xlu0 %5624 }
0x1b5b   : > { %8064 = vrcp.f32 %v5625_v28 }
0x1b5e   : > { %v5518_v29 = vpop.permute.xlu0 %5517 }
0x1b5f   : > { %v5523_v30 = vsel %vm2842_vm5, %v5518_v29, 0 }
0x1b60   : > { %v8063_v56 = vpop.eup %8062  ;;  %7460 = vmatpush3.bf16.msra.mxu0 %v5523_v30 }
0x1b61   : > { %7471 = vmatprep.subr.bf16.mxu0 %v9518_v0  ;;  %v5514_v31 = vmul.f32 %v8063_v56, %v8055_v63  ;;  %v6997_v56 = vld [vmem:[#allocation64] ss:$0 sm:$0xff] }
0x1b63   : > { %v5515_v33 = vpack.c.bf16 %v5514_v31, %v5514_v31 }
0x1b65   : > { %7462 = vmatmul.mubr.msk.bf16.vlgmr.msra.gmra.mxu0 %vm2772_vm2, %v5515_v33 }
0x1b66   : > { %7472 = vmatpush3.bf16.msra.mxu0 %v5635_v34  ;;  %7473 = vmatprep.mubr.msk.bf16.mxu0 %vm9519_vm0, %v9518_v0 }
0x1b67   : > { %7483 = vmatprep.subr.bf16.mxu0 %v9518_v0 }
0x1b68   : > { %v8065_v14 = vpop.eup %8064 }
0x1b69   : > { %v5627_v35 = vmul.f32 %v8065_v14, %v8057_v16 }
0x1b6b   : > { %v5628_v45 = vpack.c.bf16 %v5627_v35, %v5627_v35  ;;  %v7996_v35 = vld [vmem:[%s11147_s18 + $0x8] sm:$0xff]  }
0x1b6d   : > { %7474 = vmatmul.mubr.msk.bf16.vlgmr.msra.gmra.mxu0 %vm2772_vm2, %v5628_v45  ;;  %v7997_v45 = vld [vmem:[%s11147_s18] sm:$0xff]  }
0x1b6e   : > { %7485 = vmatprep.mubr.msk.bf16.mxu0 %vm9519_vm0, %v9518_v0 }
0x1b87   : > { %v5737_v5 = vpop.xlane.xlu1 %5736 }
0x1b88   : > { %8066 = vrcp.f32 %v5737_v5  ;;  %v6999_v5 = vld [vmem:[%s11148_s24] ss:$0 sm:$0xff]  ;;  %s9226_s24 = scalar_lea.vmem %s9225_s6, 256 }
0x1b8b   : > { %v5742_v38 = vpop.permute.xlu1 %5741 }
0x1b8c   : > { %v5747_v39 = vsel %vm2842_vm5, %v5742_v38, 0 }
0x1b8d   : > { %7484 = vmatpush3.bf16.msra.mxu0 %v5747_v39 }
0x1b8e   : > { %7497 = vmatprep.subr.bf16.mxu0 %v9518_v0 }
0x1b95   : > { %v8067_v40 = vpop.eup %8066 }
0x1b96   : > { %v5739_v41 = vmul.f32 %v8067_v40, %v8061_v25  ;;  %v7993_v25 = vld [vmem:[#allocation73] sm:$0xff]  }
0x1b98   : > { %v5740_v43 = vpack.c.bf16 %v5739_v41, %v5739_v41 }
0x1b9a   : > { %7486 = vmatmul.mubr.msk.bf16.vlgmr.msra.gmra.mxu0 %vm2772_vm2, %v5740_v43 }
0x1b9b   : > { %7501 = vmatprep.mubr.msk.bf16.mxu0 %vm9519_vm0, %v9518_v0  ;;  %7498 = vmatpush3.bf16.msra.mxu0 %v7992_v24 }
0x1b9c   : > { %7499 = vmatprep.subr.bf16.mxu0 %v9518_v0 }
0x1b9f   : > { %7500 = vmatpush3.bf16.msra.mxu0 %v7993_v25 }
0x1bb2   : > { %v5444_v46 = vpop.f32.mrf.mxu0 }
0x1bb3   : > { %v5450_v4 = vpack.c.bf16 %v5444_v46, %v5444_v46 }
0x1bb4   : > { %v7451_v47 = vpop.f32.mrf.mxu0 }
0x1bb6   : > { %v5447_v48 = vpop.f32.mrf.mxu0 }
0x1bb7   : > { %v7003_v48 = vld [vmem:[%s11149_s26] ss:$0 sm:$0xff] }
0x1bb8   : > { %v7452_v37 = vpop.f32.mrf.mxu0 }
0x1c25   : > { %v5559_v36 = vpop.f32.mrf.mxu0 }
0x1c26   : > { %v5565_v50 = vpack.c.bf16 %v5559_v36, %v5559_v36 }
0x1c27   : > { %v7463_v51 = vpop.f32.mrf.mxu0 }
0x1c28   : > { %5791 = vrot.lane.b32.xlu0 %v5565_v50, %s9524_s23  ;;  %s6111_s23 = sshll.u32 %s2548_s19, 4  ;;  %s6112_s23 = int_to_ptr.vmem [resolvable:$true] %s6111_s23 }
0x1c29   : > { %v5562_v52 = vpop.f32.mrf.mxu0  ;;  %p9227_p10 = scmp.lt.s32.totalorder %s6112_s23, %s9225_s6 }
0x1c2b   : > { %v7464_v53 = vpop.f32.mrf.mxu0 }
0x1c2d   : > { %v5671_v54 = vpop.f32.mrf.mxu0 }
0x1c2e   : > { %v5677_v55 = vpack.c.bf16 %v5671_v54, %v5671_v54 }
0x1c2f   : > { %v7475_v57 = vpop.f32.mrf.mxu0 }
0x1c30   : > { %5794 = vrot.lane.b32.xlu1 %v5677_v55, %s9525_s0  ;;  %s6085_s0 = scalar_lea.sflag [#allocation76], %s10281_s28 }
0x1c31   : > { %v5674_v58 = vpop.f32.mrf.mxu0 }
0x1c33   : > { %v7476_v59 = vpop.f32.mrf.mxu0 }
0x1c5a   : > { %v5783_v60 = vpop.f32.mrf.mxu0 }
0x1c5b   : > { %v5789_v61 = vpack.c.bf16 %v5783_v60, %v5783_v60 }
0x1c5c   : > { %v7487_v62 = vpop.f32.mrf.mxu0 }
0x1c5d   : > { %5797 = vrot.lane.b32.xlu0 %v5789_v61, %s9526_s16  ;;  %s9220_s16 = scalar_lea.vmem %s6112_s23, 128 }
0x1c5e   : > { %v5786_v1 = vpop.f32.mrf.mxu0  ;;  %p9221_p2 = scmp.ne.s32.totalorder %s6112_s23, %s9220_s16  ;;  %p9228_p4 = scmp.lt.s32.totalorder %s9226_s24, %s9220_s16 }
0x1c60   : > { %v7488_v2 = vpop.f32.mrf.mxu0  ;;  %p9222_p5 = pnand %p9221_p2, %p11150_p7  ;;  %p9229_p0 = por %p9228_p4, %p9227_p10 }
0x1c62   : > { %p9223_p9 = pneg %p9222_p5 }
0x1c64   : > { %p9230_p1 = pnand %p9229_p0, %p9223_p9 }
0x1c9a   : > { %v5792_v3 = vpop.permute.xlu0 %5791 }
0x1c9b   : > { %v5801_v7 = vsel %vm2772_vm2, %v5450_v4, %v5792_v3 }
0x1ca2   : > { %v5795_v6 = vpop.permute.xlu1 %5794 }
0x1ca3   : > { %v5803_v8 = vsel %vm3238_vm6, %v5801_v7, %v5795_v6 }
0x1ccf   : > { %v5798_v9 = vpop.permute.xlu0 %5797 }
0x1cd0   : > { %v5805_v10 = vsel %vm3241_vm7, %v5803_v8, %v5798_v9 }
0x1cd1   : > { %7494 = vmatmul.mubr.msk.bf16.vlgmr.msra.gmra.mxu1 %vm2609_vm1, %v5805_v10 }
0x1cd2   : > { %7513 = vmatprep.mubr.msk.bf16.mxu1 %vm9519_vm0, %v9518_v0 }
0x1d91   : > { %v5860_v12 = vpop.f32.mrf.mxu1 }
0x1d92   : > { %v5861_v13 = vadd.f32 %v6993_v11, %v5860_v12 }
0x1d93   : > { %v7495_v63 = vpop.f32.mrf.mxu1 }
0x1d94   : > { %v5866_v15 = vadd.f32 %v5861_v13, %v10645_v44  ;;  %v7994_v44 = vld [vmem:[%s11147_s18 + $0x18] sm:$0xff]  }
0x1d95   : > { %v5863_v16 = vpop.f32.mrf.mxu1  ;;  %7506 = vmatpush3.bf16.msra.mxu1 %v7994_v44 }
0x1d96   : > { %v5869_v17 = vsel %vm2609_vm1, %v5866_v15, 0.0  ;;  %7507 = vmatprep.subr.bf16.mxu1 %v9518_v0 }
0x1d97   : > { %5870 = vadd.xlane.f32.xlu1 %v5869_v17  ;;  %v7496_v18 = vpop.f32.mrf.mxu1 }
0x1d99   : > { %7508 = vmatpush3.bf16.msra.mxu1 %v7995_v26 }
0x1d9a   : > { %7509 = vmatprep.subr.bf16.mxu1 %v9518_v0 }
0x1d9d   : > { %7510 = vmatpush3.bf16.msra.mxu1 %v7996_v35 }
0x1d9e   : > { %7511 = vmatprep.subr.bf16.mxu1 %v9518_v0 }
0x1da1   : > { %7512 = vmatpush3.bf16.msra.mxu1 %v7997_v45 }
0x1e20   : > { %v5871_v19 = vpop.xlane.xlu1 %5870 }
0x1e21   : > { %v5872_v20 = vmul.f32 0.03125, %v5871_v19 }
0x1e23   : > { %v5873_v21 = vsub.f32 %v5866_v15, %v5872_v20 }
0x1e25   : > { %v5874_v22 = vmul.f32 %v5873_v21, %v5873_v21 }
0x1e27   : > { %v5875_v23 = vsel %vm2609_vm1, %v5874_v22, 0.0 }
0x1e28   : > { %5876 = vadd.xlane.f32.xlu0 %v5875_v23 }
0x1eb1   : > { %v5877_v27 = vpop.xlane.xlu0 %5876 }
0x1eb2   : > { %v5878_v28 = vmul.f32 0.03125, %v5877_v27 }
0x1eb4   : > { %v5879_v29 = vadd.f32 1e-05, %v5878_v28 }
0x1eb6   : > { %8068 = vrsqrt.f32 %v5879_v29 }
0x1ec3   : > { %v8069_v30 = vpop.eup %8068 }
0x1ec4   : > { %v5881_v31 = vmul.f32 %v8069_v30, %v5873_v21 }
0x1ec6   : > { %v5888_v33 = vmul.f32 %v6997_v56, %v5881_v31 }
0x1ec8   : > { %v5895_v34 = vadd.f32 %v6998_v32, %v5888_v33 }
0x1eca   : > { %v5896_v14 = vpack.c.bf16 %v5895_v34, %v5895_v34 }
0x1ecc   : > { %7502 = vmatmul.mubr.msk.bf16.vlgmr.msra.gmra.mxu0 %vm2609_vm1, %v5896_v14 }
0x1f8c   : > { %v5957_v38 = vpop.f32.mrf.mxu0 }
0x1f8d   : > { %v5958_v39 = vadd.f32 %v6999_v5, %v5957_v38 }
0x1f8e   : > { %v7503_v40 = vpop.f32.mrf.mxu0 }
0x1f8f   : > { %v5963_v41 = vmax.f32 %v5958_v39, 0.0 }
0x1f90   : > { %v5960_v43 = vpop.f32.mrf.mxu0 }
0x1f91   : > { %v5964_v46 = vpack.c.bf16 %v5963_v41, %v5963_v41 }
0x1f92   : > { %v7504_v47 = vpop.f32.mrf.mxu0 }
0x1f93   : > { %7514 = vmatmul.mubr.msk.bf16.vlgmr.msra.gmra.mxu1 %vm6004_vm14, %v5964_v46 }
0x2053   : > { %v6042_v37 = vpop.f32.mrf.mxu1 }
0x2054   : > { %v6043_v49 = vadd.f32 %v7003_v48, %v6042_v37 }
0x2055   : > { %v7515_v0 = vpop.f32.mrf.mxu1 }
0x2056   : > { %v6048_v36 = vadd.f32 %v6043_v49, %v5895_v34 }
0x2057   : > { %v6045_v42 = vpop.f32.mrf.mxu1 }
0x2058   : > { %v6051_v50 = vsel %vm2609_vm1, %v6048_v36, 0.0 }
0x2059   : > { %6052 = vadd.xlane.f32.xlu0 %v6051_v50  ;;  %v7516_v51 = vpop.f32.mrf.mxu1 }
0x20e2   : > { %v6053_v52 = vpop.xlane.xlu0 %6052 }
0x20e3   : > { %v6054_v53 = vmul.f32 0.03125, %v6053_v52 }
0x20e5   : > { %v6055_v54 = vsub.f32 %v6048_v36, %v6054_v53 }
0x20e7   : > { %v6056_v55 = vmul.f32 %v6055_v54, %v6055_v54 }
0x20e9   : > { %v6057_v57 = vsel %vm2609_vm1, %v6056_v55, 0.0 }
0x20ea   : > { %6058 = vadd.xlane.f32.xlu1 %v6057_v57 }
0x20eb   : > { %9233 = shalt.err (!%p9230_p1)
}
0x20ec   : > { %s9234_s26 = scalar_lea.hbm %s6109_s20, 128  ;;  %s9238_s19 = scalar_lea.hbm %s9842_s5, 256 }
0x20ed   : > { %p9235_p12 = scmp.ne.s32.totalorder %s6109_s20, %s9234_s26  ;;  %p9239_p13 = scmp.lt.s32.totalorder %s6109_s20, %s9842_s5 }
0x20ee   : > { %p9240_p8 = scmp.lt.s32.totalorder %s9238_s19, %s9234_s26 }
0x20ef   : > { %p9236_p6 = pnand %p9235_p12, %p11150_p7 }
0x20f0   : > { %p9241_p3 = por %p9240_p8, %p9239_p13 }
0x20f1   : > { %p9237_p11 = pneg %p9236_p6 }
0x20f3   : > { %p9242_p2 = pnand %p9241_p3, %p9237_p11 }
0x20f5   : > { %9245 = shalt.err (!%p9242_p2)
}
0x20f6   : > { %s11151_s16 = sld [smem:[#allocation158_spill]]  ;;  %s2541_s24 = scalar_lea.vmem [#allocation74], %s10284_s4 }
0x20f7   : > { %s11152_s17 = sld [smem:[#allocation159_spill]]  ;;  %s6098_s26 = sshll.u32 %s2541_s24, 4  ;;  %s6099_s26 = int_to_ptr.vmem [resolvable:$true] %s6098_s26 }
0x20f8   : > { %s11153_s6 = sld [smem:[#allocation160_spill]] }
0x20f9   : > { %7696 = dma.vmem_to_hbm [thread:$0]  (%p11150_p7), %s6112_s23, 128, %s6109_s20, %s6085_s0  }
0x20fa   : > { %s6080_s20 = scalar_lea.sflag [#allocation4], %s10281_s28  ;;  %s9246_s23 = scalar_lea.vmem %s6099_s26, 128 }
0x20fb   : > { %p9247_p5 = scmp.ne.s32.totalorder %s6099_s26, %s9246_s23  ;;  %s9528_s0 = smov [#allocation74]  }
0x20fc   : > { %v7009_v62 = vld [vmem:[%s11151_s16] ss:$0 sm:$0xff]  ;;  %s9250_s1 = sshll.u32 %s9528_s0, 4  ;;  %s9251_s1 = int_to_ptr.vmem [resolvable:$false] %s9250_s1 }
0x20fd   : > { %v7010_v2 = vld [vmem:[%s11152_s17] ss:$0 sm:$0xff]  ;;  %p9248_p9 = pnand %p9247_p5, %p11150_p7  ;;  %s9252_s16 = scalar_lea.vmem %s9251_s1, 256 }
0x20fe   : > { %s6096_s19 = scalar_lea.hbm %s11153_s6, %s7013_s3  ;;  %p9253_p4 = scmp.lt.s32.totalorder %s6099_s26, %s9251_s1 }
0x20ff   : > { %p9249_p10 = pneg %p9248_p9  ;;  %p9254_p0 = scmp.lt.s32.totalorder %s9252_s16, %s9246_s23 }
0x2101   : > { %p9255_p1 = por %p9254_p0, %p9253_p4 }
0x2103   : > { %p9256_p12 = pnand %p9255_p1, %p9249_p10 }
0x2173   : > { %v6059_v58 = vpop.xlane.xlu1 %6058 }
0x2174   : > { %v6060_v59 = vmul.f32 0.03125, %v6059_v58 }
0x2176   : > { %v6061_v60 = vadd.f32 1e-05, %v6060_v59 }
0x2178   : > { %8070 = vrsqrt.f32 %v6061_v60 }
0x2185   : > { %v8071_v61 = vpop.eup %8070 }
0x2186   : > { %v6063_v1 = vmul.f32 %v8071_v61, %v6055_v54 }
0x2188   : > { %v6070_v3 = vmul.f32 %v7009_v62, %v6063_v1 }
0x218a   : > { %v6077_v4 = vadd.f32 %v7010_v2, %v6070_v3 }
0x218c   : > { %6078 = vst.msk [vmem:[%s2541_s24] sm:$0xff] %vm2609_vm1, %v6077_v4 }
0x218d   : > { %9259 = shalt.err (!%p9256_p12)
}
0x218e   : > { %s9260_s15 = scalar_lea.hbm %s6096_s19, 128  ;;  %s9264_s28 = scalar_lea.hbm %s11153_s6, 256 }
0x218f   : > { %p9261_p6 = scmp.ne.s32.totalorder %s6096_s19, %s9260_s15  ;;  %p9265_p8 = scmp.lt.s32.totalorder %s6096_s19, %s11153_s6 }
0x2190   : > { %p9266_p3 = scmp.lt.s32.totalorder %s9264_s28, %s9260_s15 }
0x2191   : > { %p9262_p11 = pnand %p9261_p6, %p11150_p7 }
0x2192   : > { %p9267_p2 = por %p9266_p3, %p9265_p8 }
0x2193   : > { %p9263_p13 = pneg %p9262_p11 }
0x2195   : > { %p9268_p5 = pnand %p9267_p2, %p9263_p13 }
0x2197   : > { %9271 = shalt.err (!%p9268_p5)
}
0x2198   : > { %7695 = dma.vmem_to_hbm [thread:$0]  (%p11150_p7), %s6099_s26, 128, %s6096_s19, %s6080_s20  }
0x2199 PF: > { %s11154_s4 = sld [smem:[#allocation161_spill]]  ;;  %p11157_p10 = scmp.ge.s32.totalorder %s9406_s11, 2 }
0x219a   : > { %s11155_s1 = sld [smem:[#allocation164_spill]] }
0x219f   : > { %s6123_s3 = sand.u32 1, %s11154_s4  }
0x21a0   : > { %p11156_p9 = scmp.ne.s32.totalorder %s11155_s1, 0  ;;  %s6124_s17 = scalar_lea.sflag [#allocation4], %s6123_s3 }
0x21a2   : > { %p7716_p4 = pnand %p11157_p10, %p11156_p9 }
0x21a4   : > { %p7717_p0 = pneg %p7716_p4 }
0x21a6   : > { %9385 = dma.done.wait (%p7717_p0), %s6124_s17, 128  }
0x21a7   : > { %9387 = vsyncadd (%p7717_p0), %s6124_s17, 4294967168  ;;  %s6133_s24 = scalar_lea.sflag [#allocation76], %s6123_s3 }
0x21a8   : > { %9389 = dma.done.wait (%p7717_p0), %s6133_s24, 128  }
0x21a9   : > { %9391 = vsyncadd (%p7717_p0), %s6133_s24, 4294967168  ;;  %s11158_s11 = sld [smem:[#allocation162_spill]]  ;;  %s11160_s0 = smov %s9398_s7 }
0x21aa   : > { %s11159_s2 = sld [smem:[#allocation163_spill]]  ;;  %s11161_s7 = smov %s9402_s10 }
0x21af   : > { %p167_p7 = scmp.ge.s32.totalorder %s11158_s11, 4  }
0x21b0   : > { %s11162_s10 = smov %s11159_s2 }
0x21b1   :  { %169 = sbr.rel (!%p167_p7) target bundleno = 154 (0x9a), region = 608 }
0x21b6   :  { %6138 = vsyncpa [#allocation3], 1 }
0x21b7   :  { %6140 = vsyncpa [#allocation3 + $0x1], 1 }
0x21b8   :  { %6141 = vsyncpa [#allocation6], 1 }
0x21b9   :  { %6143 = vsyncpa [#allocation6 + $0x1], 1 }
0x21ba   :  { %6144 = vsyncpa [#allocation9], 1 }
0x21bb   :  { %6146 = vsyncpa [#allocation9 + $0x1], 1 }
0x21bc   :  { %6147 = vsyncpa [#allocation12], 1 }
0x21bd   :  { %6148 = vsyncpa [#allocation15], 1 }
0x21be   :  { %6149 = vsyncpa [#allocation18], 1 }
0x21bf   :  { %6150 = vsyncpa [#allocation21], 1 }
0x21c0   :  { %6151 = vsyncpa [#allocation24], 1 }
0x21c1   :  { %6152 = vsyncpa [#allocation27], 1 }
0x21c2   :  { %6153 = vsyncpa [#allocation30], 1 }
0x21c3   :  { %6154 = vsyncpa [#allocation33], 1 }
0x21c4   :  { %6155 = vsyncpa [#allocation36], 1 }
0x21c5   :  { %6156 = vsyncpa [#allocation39], 1 }
0x21c6   :  { %6157 = vsyncpa [#allocation42], 1 }
0x21c7   :  { %6158 = vsyncpa [#allocation45], 1 }
0x21c8   :  { %6159 = vsyncpa [#allocation48], 1 }
0x21c9   :  { %6160 = vsyncpa [#allocation51], 1 }
0x21ca   :  { %6161 = vsyncpa [#allocation54], 1 }
0x21cb   :  { %6162 = vsyncpa [#allocation57], 1 }
0x21cc   :  { %6163 = vsyncpa [#allocation60], 1 }
0x21cd   :  { %6164 = vsyncpa [#allocation63], 1 }
0x21ce   :  { %6165 = vsyncpa [#allocation66], 1 }
0x21cf   :  { %6166 = vsyncpa [#allocation69], 1 }
0x21d0   :  { %6167 = vsyncpa [#allocation72], 1 }
0x21d1   :  { %6168 = vsyncpa [#allocation4], 1 }
0x21d2   :  { %6170 = vsyncpa [#allocation4 + $0x1], 1 }
0x21d3   :  { %6171 = vsyncpa [#allocation76], 1 }
0x21d4   :  { %6173 = vsyncpa [#allocation76 + $0x1], 1 }

</bundles_post_ra>
